<compile_context>
chip_gen: v6e
topology: v6e:2x2x1
jax: 0.10.0
libtpu: 0.0.40
codegen_flags: <defaults>
</compile_context>

<pallas_src>
import numpy as np
import jax
import jax.numpy as jnp
from jax.experimental import pallas as pl
from jax.experimental.pallas import tpu as pltpu

NEG_SLOPE = 0.01  # nn.LeakyReLU default negative_slope


def _leaky(x):
    return jnp.where(x > 0.0, x, NEG_SLOPE * x)


# ---------------------------------------------------------------------------
# Fused kernel: whole CNN forward for one image, entirely in VMEM.
# ---------------------------------------------------------------------------
def _cnn_fused_kernel(x_ref, w1_ref, b1_ref, w2_ref, b2_ref, w3_ref, b3_ref,
                      wf1_ref, bf1_ref, wf2_ref, bf2_ref, o_ref,
                      a1_ref, a2_ref):
    """Refs:
      x_ref  : [4, 7, 28*C]   input rows split as h = 4*q + r (dims: r, q, (w,c))
      w1_ref : [10, 28*C, 96] conv1 banded weights, index = px*5 + dy,
                              lanes (w, c_in) -> (pooled col j, c_out)
      w2_ref : [10, 96, 24]   conv2 banded weights (a1 lanes -> (j2, c_out))
      w3_ref : [2, 24, 12]    conv3 banded weights (a2 lanes -> (ow3, c_out))
      wf1_ref: [3, 12, 20]    fc1 weights per conv3 output row (torch flatten
                              order folded in);  wf2_ref: [20, 10]
      b*_ref : [1, n]         lane-tiled biases
      o_ref  : [1, 10]        logits for this image
      a1_ref : [2, 6, 96]     VMEM scratch: pooled conv1 activations split by
                              row parity (makes conv2's stride-2 rows contiguous)
      a2_ref : [4, 24]        VMEM scratch: pooled conv2 activations
    """
    f32 = jnp.float32

    # ---- conv1 (5x5, C->8) + MaxPool(2,2) + LeakyReLU ------------------------
    for ip in range(2):                          # parity of the pooled row index
        acc = None
        for py in range(2):                      # pool-window row slot
            for px in range(2):                  # pool-window col slot (in weights)
                part = None
                for dy in range(5):
                    t = 2 * ip + py + dy         # input row = 4*(i + t//4) + t%4
                    xs = x_ref[t % 4, t // 4:t // 4 + 6, :]            # [6, 28C]
                    d = jnp.dot(xs, w1_ref[px * 5 + dy],
                                preferred_element_type=f32)            # [6, 96]
                    part = d if part is None else part + d
                acc = part if acc is None else jnp.maximum(acc, part)
        # bias commutes with the max; LeakyReLU after the pool, as in PyTorch.
        a1_ref[ip] = _leaky(acc + b1_ref[...]).astype(a1_ref.dtype)
        # TODO(synk): nn.Dropout(0.2) after the activation is identity in eval
        # mode; training-mode dropout is not emulated.

    # ---- conv2 (5x5, 8->6) + MaxPool(2,2) + LeakyReLU -------------------------
    acc = None
    for py in range(2):
        for px in range(2):
            part = None
            for dy in range(5):
                s = py + dy                      # a1 row = 2*(i2 + s//2) + s%2
                xs = a1_ref[s % 2, s // 2:s // 2 + 4, :]               # [4, 96]
                d = jnp.dot(xs, w2_ref[px * 5 + dy],
                            preferred_element_type=f32)                # [4, 24]
                part = d if part is None else part + d
            acc = part if acc is None else jnp.maximum(acc, part)
    a2_ref[...] = _leaky(acc + b2_ref[...]).astype(a2_ref.dtype)

    # ---- conv3 (2x2, 6->4) + LeakyReLU ----------------------------------------
    h3 = None
    for dy in range(2):
        d = jnp.dot(a2_ref[dy:dy + 3, :], w3_ref[dy],
                    preferred_element_type=f32)                        # [3, 12]
        h3 = d if h3 is None else h3 + d
    h3 = _leaky(h3 + b3_ref[...])                                      # [3, 12]

    # ---- Flatten (torch order folded into wf1) + fc1 + LeakyReLU + fc2 --------
    h4 = None
    for r in range(3):                           # conv3 output row
        d = jnp.dot(h3[r:r + 1, :].astype(wf1_ref.dtype), wf1_ref[r],
                    preferred_element_type=f32)                        # [1, 20]
        h4 = d if h4 is None else h4 + d
    h4 = _leaky(h4 + bf1_ref[...])
    y = jnp.dot(h4.astype(wf2_ref.dtype), wf2_ref[...],
                preferred_element_type=f32) + bf2_ref[...]             # [1, 10]
    o_ref[...] = y.astype(o_ref.dtype)


# ---------------------------------------------------------------------------
# One-time parameter re-layout (hoisted out of the jitted hot path).
# ---------------------------------------------------------------------------
def prepare_params(params, compute_dtype=jnp.float32):
    """Build banded (Toeplitz-style) conv weights whose bands also encode the
    max-pool column parity, plus lane-tiled biases and flatten-order-permuted
    FC weights.  Pure host-side numpy; done once per model."""
    w1 = np.asarray(params["w1"], np.float32)
    b1 = np.asarray(params["b1"], np.float32)
    w2 = np.asarray(params["w2"], np.float32)
    b2 = np.asarray(params["b2"], np.float32)
    w3 = np.asarray(params["w3"], np.float32)
    b3 = np.asarray(params["b3"], np.float32)
    wf1 = np.asarray(params["wf1"], np.float32)
    bf1 = np.asarray(params["bf1"], np.float32)
    wf2 = np.asarray(params["wf2"], np.float32)
    bf2 = np.asarray(params["bf2"], np.float32)
    c_in = w1.shape[1]

    # conv1: lanes (w, c_in) -> (pooled col j (0..11), c_out (0..7))
    W1 = np.zeros((10, 28 * c_in, 12 * 8), np.float32)
    for px in range(2):
        for dy in range(5):
            k = px * 5 + dy
            for j in range(12):
                for dx in range(5):
                    w = 2 * j + px + dx
                    W1[k, w * c_in:(w + 1) * c_in, j * 8:(j + 1) * 8] = \
                        w1[:, :, dy, dx].T
    # conv2: a1 lanes (j, c1) -> (pooled col j2 (0..3), c_out (0..5))
    W2 = np.zeros((10, 12 * 8, 4 * 6), np.float32)
    for px in range(2):
        for dy in range(5):
            k = px * 5 + dy
            for j2 in range(4):
                for dx in range(5):
                    ji = 2 * j2 + px + dx
                    W2[k, ji * 8:(ji + 1) * 8, j2 * 6:(j2 + 1) * 6] = \
                        w2[:, :, dy, dx].T
    # conv3: a2 lanes (j2, c2) -> (out col ow (0..2), c_out (0..3))
    W3 = np.zeros((2, 4 * 6, 3 * 4), np.float32)
    for dy in range(2):
        for ow in range(3):
            for dx in range(2):
                ji = ow + dx
                W3[dy, ji * 6:(ji + 1) * 6, ow * 4:(ow + 1) * 4] = \
                    w3[:, :, dy, dx].T
    # fc1: one [12, 20] block per conv3 output row; torch flatten f = c3*9+r*3+ow
    WF1 = np.zeros((3, 12, 20), np.float32)
    for r in range(3):
        for ow in range(3):
            for c3 in range(4):
                WF1[r, ow * 4 + c3, :] = wf1[:, c3 * 9 + r * 3 + ow]

    prep_np = {
        "W1": W1, "W2": W2, "W3": W3, "WF1": WF1, "WF2": wf2.T,
        "B1": np.tile(b1, 12)[None, :], "B2": np.tile(b2, 4)[None, :],
        "B3": np.tile(b3, 3)[None, :],
        "BF1": bf1[None, :], "BF2": bf2[None, :],
    }
    prep = {}
    for k, v in prep_np.items():
        dt = compute_dtype if k.startswith("W") else jnp.float32
        prep[k] = jnp.asarray(v, dtype=dt)
    return prep


# ---------------------------------------------------------------------------
# Forward wrapper
# ---------------------------------------------------------------------------
def cnn_forward(x, prep):
    """x: [B, C, 28, 28] (NCHW, PyTorch layout).  Returns logits [B, 10]."""
    B, C, H, W = x.shape
    assert H == 28 and W == 28, "CNN head (Linear(36, 20)) requires 28x28 inputs"
    cdt = prep["W1"].dtype

    # NCHW -> [B, 28, 28*C] -> split rows as h = 4*q + r -> [B, 4, 7, 28*C].
    # This is the only wrapper-side data movement (1x the input bytes).
    xh = jnp.transpose(x, (0, 2, 3, 1)).reshape(B, H, W * C)
    xs4 = jnp.transpose(xh.reshape(B, H // 4, 4, W * C), (0, 2, 1, 3)).astype(cdt)

    def _full(a):
        nd = a.ndim
        return pl.BlockSpec(a.shape, lambda b: (0,) * nd)  # VMEM-resident

    wkeys = ("W1", "B1", "W2", "B2", "W3", "B3", "WF1", "BF1", "WF2", "BF2")
    weights = [prep[k] for k in wkeys]

    flops = 2 * B * (40 * 6 * 28 * C * 96 + 20 * 4 * 96 * 24
                     + 2 * 3 * 24 * 12 + 3 * 12 * 20 + 20 * 10)
    bytes_accessed = (int(xs4.size) * xs4.dtype.itemsize + B * 10 * 4
                      + sum(int(w.size) * w.dtype.itemsize for w in weights))

    out = pl.pallas_call(
        _cnn_fused_kernel,
        out_shape=jax.ShapeDtypeStruct((B, 1, 10), jnp.float32),
        grid_spec=pltpu.PrefetchScalarGridSpec(
            num_scalar_prefetch=0,
            grid=(B,),
            in_specs=[pl.BlockSpec((None, 4, H // 4, W * C),
                                   lambda b: (b, 0, 0, 0))]
                     + [_full(w) for w in weights],
            out_specs=pl.BlockSpec((None, 1, 10), lambda b: (b, 0, 0)),
            scratch_shapes=[pltpu.VMEM((2, 6, 96), cdt),
                            pltpu.VMEM((4, 24), cdt)],
        ),
        compiler_params=pltpu.CompilerParams(
            dimension_semantics=("parallel",)),
        cost_estimate=pl.CostEstimate(flops=flops, transcendentals=0,
                                      bytes_accessed=bytes_accessed),
    )(xs4, *weights)
    return out.reshape(B, 10)


# ---------------------------------------------------------------------------
# Reference + init
# ---------------------------------------------------------------------------
def init_params(key, channels_in=1):
    """Matches initialize_weights('uniform'): weights ~ U[0,1), biases = 0.01."""
    shapes = {
        "w1": (8, channels_in, 5, 5), "b1": (8,),
        "w2": (6, 8, 5, 5),           "b2": (6,),
        "w3": (4, 6, 2, 2),           "b3": (4,),
        "wf1": (20, 36),              "bf1": (20,),
        "wf2": (10, 20),              "bf2": (10,),
    }
    n_w = sum(1 for k in shapes if k.startswith("w"))
    keys = jax.random.split(key, n_w)
    params, ki = {}, 0
    for name, shp in shapes.items():
        if name.startswith("w"):
            params[name] = jax.random.uniform(keys[ki], shp, dtype=jnp.float32)
            ki += 1
        else:
            params[name] = jnp.full(shp, 0.01, dtype=jnp.float32)
    return params


def cnn_ref(x, params):
    """Pure-JAX reference replicating the PyTorch module (eval mode)."""
    prec = jax.lax.Precision.HIGHEST

    def conv(h, w, b):
        y = jax.lax.conv_general_dilated(
            h, w, window_strides=(1, 1), padding="VALID",
            dimension_numbers=("NCHW", "OIHW", "NCHW"), precision=prec)
        return y + b.reshape(1, -1, 1, 1)

    def maxpool(h):
        return jax.lax.reduce_window(h, -jnp.inf, jax.lax.max,
                                     (1, 1, 2, 2), (1, 1, 2, 2), "VALID")

    h = _leaky(maxpool(conv(x, params["w1"], params["b1"])))
    h = _leaky(maxpool(conv(h, params["w2"], params["b2"])))
    h = _leaky(conv(h, params["w3"], params["b3"]))
    h = h.reshape(h.shape[0], -1)                 # torch Flatten (NCHW order)
    h = _leaky(jnp.dot(h, params["wf1"].T, precision=prec) + params["bf1"])
    return jnp.dot(h, params["wf2"].T, precision=prec) + params["bf2"]


if __name__ == "__main__":
    key = jax.random.PRNGKey(0)
    kx, kp = jax.random.split(key)

    # 28x28 input -> 4x3x3 before Flatten, matching Linear(3*3*4, 20).
    B, C_IN, HW = 2, 1, 28
    x = jax.random.normal(kx, (B, C_IN, HW, HW), dtype=jnp.float32)
    params = init_params(kp, channels_in=C_IN)

    prep = prepare_params(params)                 # one-time weight re-layout (f32)
    fwd = jax.jit(cnn_forward)
    out = jax.block_until_ready(fwd(x, prep))
    ref = cnn_ref(x, params)

    assert out.shape == (B, 10), out.shape
    # U[0,1) init gives |outputs| ~ 1e5 and the in-kernel MXU f32 matmuls may use
    # reduced-precision passes, hence the relative tolerance; any semantic bug in
    # the banded-weight / pooling / flatten plumbing would be O(1) relative error.
    assert jnp.allclose(out, ref, rtol=2e-2, atol=1e-2), (
        "mismatch vs reference: max abs diff "
        f"{float(jnp.max(jnp.abs(out - ref)))}")

    print("KERNEL_OK")
</pallas_src>

<mosaic_0001>
module attributes {stable_mosaic.version = 11 : i64} {
  func.func @_cnn_fused_kernel(%arg0: i32, %arg1: memref<1x4x7x28xf32, #tpu.memory_space<vmem>>, %arg2: memref<10x28x96xf32, #tpu.memory_space<vmem>>, %arg3: memref<1x96xf32, #tpu.memory_space<vmem>>, %arg4: memref<10x96x24xf32, #tpu.memory_space<vmem>>, %arg5: memref<1x24xf32, #tpu.memory_space<vmem>>, %arg6: memref<2x24x12xf32, #tpu.memory_space<vmem>>, %arg7: memref<1x12xf32, #tpu.memory_space<vmem>>, %arg8: memref<3x12x20xf32, #tpu.memory_space<vmem>>, %arg9: memref<1x20xf32, #tpu.memory_space<vmem>>, %arg10: memref<20x10xf32, #tpu.memory_space<vmem>>, %arg11: memref<1x10xf32, #tpu.memory_space<vmem>>, %arg12: memref<1x1x10xf32, #tpu.memory_space<vmem>>, %arg13: memref<2x6x96xf32, #tpu.memory_space<vmem>>, %arg14: memref<4x24xf32, #tpu.memory_space<vmem>>) attributes {dimension_semantics = [#tpu.dimension_semantics<parallel>], iteration_bounds = array<i64: 2>, scalar_prefetch = 0 : i64, scratch_operands = 2 : i64, tpu.core_type = #tpu.core_type<tc>, window_params = [{transform_indices = @transform_0, window_bounds = array<i64: 1, 4, 7, 28>}, {pipeline_mode = #tpu.pipeline_mode<synchronous>, transform_indices = @transform_1, window_bounds = array<i64: 10, 28, 96>}, {pipeline_mode = #tpu.pipeline_mode<synchronous>, transform_indices = @transform_2, window_bounds = array<i64: 1, 96>}, {pipeline_mode = #tpu.pipeline_mode<synchronous>, transform_indices = @transform_3, window_bounds = array<i64: 10, 96, 24>}, {pipeline_mode = #tpu.pipeline_mode<synchronous>, transform_indices = @transform_4, window_bounds = array<i64: 1, 24>}, {pipeline_mode = #tpu.pipeline_mode<synchronous>, transform_indices = @transform_5, window_bounds = array<i64: 2, 24, 12>}, {pipeline_mode = #tpu.pipeline_mode<synchronous>, transform_indices = @transform_6, window_bounds = array<i64: 1, 12>}, {pipeline_mode = #tpu.pipeline_mode<synchronous>, transform_indices = @transform_7, window_bounds = array<i64: 3, 12, 20>}, {pipeline_mode = #tpu.pipeline_mode<synchronous>, transform_indices = @transform_8, window_bounds = array<i64: 1, 20>}, {pipeline_mode = #tpu.pipeline_mode<synchronous>, transform_indices = @transform_9, window_bounds = array<i64: 20, 10>}, {pipeline_mode = #tpu.pipeline_mode<synchronous>, transform_indices = @transform_10, window_bounds = array<i64: 1, 10>}, {transform_indices = @transform_11, window_bounds = array<i64: 1, 1, 10>}]} {
    %c0 = arith.constant 0 : index
    %c0_0 = arith.constant 0 : index
    %c0_1 = arith.constant 0 : index
    %c0_2 = arith.constant 0 : index
    %0 = vector.load %arg1[%c0, %c0_0, %c0_1, %c0_2] : memref<1x4x7x28xf32, #tpu.memory_space<vmem>>, vector<1x1x6x28xf32>
    %1 = vector.shape_cast %0 : vector<1x1x6x28xf32> to vector<6x28xf32>
    %c0_3 = arith.constant 0 : index
    %c0_4 = arith.constant 0 : index
    %c0_5 = arith.constant 0 : index
    %2 = vector.load %arg2[%c0_3, %c0_4, %c0_5] : memref<10x28x96xf32, #tpu.memory_space<vmem>>, vector<1x28x96xf32>
    %3 = vector.shape_cast %2 : vector<1x28x96xf32> to vector<28x96xf32>
    %cst = arith.constant dense<0.000000e+00> : vector<6x96xf32>
    %4 = tpu.matmul %1, %3, %cst {dimension_numbers = #tpu.dot_dimension_numbers<[1], [0], [0], [1], [0, 0, 1, 1], [], []>} : vector<6x28xf32>, vector<28x96xf32>, vector<6x96xf32> -> vector<6x96xf32>
    %c0_6 = arith.constant 0 : index
    %c1 = arith.constant 1 : index
    %c0_7 = arith.constant 0 : index
    %c0_8 = arith.constant 0 : index
    %5 = vector.load %arg1[%c0_6, %c1, %c0_7, %c0_8] : memref<1x4x7x28xf32, #tpu.memory_space<vmem>>, vector<1x1x6x28xf32>
    %6 = vector.shape_cast %5 : vector<1x1x6x28xf32> to vector<6x28xf32>
    %c1_9 = arith.constant 1 : index
    %c0_10 = arith.constant 0 : index
    %c0_11 = arith.constant 0 : index
    %7 = vector.load %arg2[%c1_9, %c0_10, %c0_11] : memref<10x28x96xf32, #tpu.memory_space<vmem>>, vector<1x28x96xf32>
    %8 = vector.shape_cast %7 : vector<1x28x96xf32> to vector<28x96xf32>
    %cst_12 = arith.constant dense<0.000000e+00> : vector<6x96xf32>
    %9 = tpu.matmul %6, %8, %cst_12 {dimension_numbers = #tpu.dot_dimension_numbers<[1], [0], [0], [1], [0, 0, 1, 1], [], []>} : vector<6x28xf32>, vector<28x96xf32>, vector<6x96xf32> -> vector<6x96xf32>
    %10 = arith.addf %4, %9 : vector<6x96xf32>
    %c0_13 = arith.constant 0 : index
    %c2 = arith.constant 2 : index
    %c0_14 = arith.constant 0 : index
    %c0_15 = arith.constant 0 : index
    %11 = vector.load %arg1[%c0_13, %c2, %c0_14, %c0_15] : memref<1x4x7x28xf32, #tpu.memory_space<vmem>>, vector<1x1x6x28xf32>
    %12 = vector.shape_cast %11 : vector<1x1x6x28xf32> to vector<6x28xf32>
    %c2_16 = arith.constant 2 : index
    %c0_17 = arith.constant 0 : index
    %c0_18 = arith.constant 0 : index
    %13 = vector.load %arg2[%c2_16, %c0_17, %c0_18] : memref<10x28x96xf32, #tpu.memory_space<vmem>>, vector<1x28x96xf32>
    %14 = vector.shape_cast %13 : vector<1x28x96xf32> to vector<28x96xf32>
    %cst_19 = arith.constant dense<0.000000e+00> : vector<6x96xf32>
    %15 = tpu.matmul %12, %14, %cst_19 {dimension_numbers = #tpu.dot_dimension_numbers<[1], [0], [0], [1], [0, 0, 1, 1], [], []>} : vector<6x28xf32>, vector<28x96xf32>, vector<6x96xf32> -> vector<6x96xf32>
    %16 = arith.addf %10, %15 : vector<6x96xf32>
    %c0_20 = arith.constant 0 : index
    %c3 = arith.constant 3 : index
    %c0_21 = arith.constant 0 : index
    %c0_22 = arith.constant 0 : index
    %17 = vector.load %arg1[%c0_20, %c3, %c0_21, %c0_22] : memref<1x4x7x28xf32, #tpu.memory_space<vmem>>, vector<1x1x6x28xf32>
    %18 = vector.shape_cast %17 : vector<1x1x6x28xf32> to vector<6x28xf32>
    %c3_23 = arith.constant 3 : index
    %c0_24 = arith.constant 0 : index
    %c0_25 = arith.constant 0 : index
    %19 = vector.load %arg2[%c3_23, %c0_24, %c0_25] : memref<10x28x96xf32, #tpu.memory_space<vmem>>, vector<1x28x96xf32>
    %20 = vector.shape_cast %19 : vector<1x28x96xf32> to vector<28x96xf32>
    %cst_26 = arith.constant dense<0.000000e+00> : vector<6x96xf32>
    %21 = tpu.matmul %18, %20, %cst_26 {dimension_numbers = #tpu.dot_dimension_numbers<[1], [0], [0], [1], [0, 0, 1, 1], [], []>} : vector<6x28xf32>, vector<28x96xf32>, vector<6x96xf32> -> vector<6x96xf32>
    %22 = arith.addf %16, %21 : vector<6x96xf32>
    %c0_27 = arith.constant 0 : index
    %c0_28 = arith.constant 0 : index
    %c1_29 = arith.constant 1 : index
    %c0_30 = arith.constant 0 : index
    %23 = vector.load %arg1[%c0_27, %c0_28, %c1_29, %c0_30] : memref<1x4x7x28xf32, #tpu.memory_space<vmem>>, vector<1x1x6x28xf32>
    %24 = vector.shape_cast %23 : vector<1x1x6x28xf32> to vector<6x28xf32>
    %c4 = arith.constant 4 : index
    %c0_31 = arith.constant 0 : index
    %c0_32 = arith.constant 0 : index
    %25 = vector.load %arg2[%c4, %c0_31, %c0_32] : memref<10x28x96xf32, #tpu.memory_space<vmem>>, vector<1x28x96xf32>
    %26 = vector.shape_cast %25 : vector<1x28x96xf32> to vector<28x96xf32>
    %cst_33 = arith.constant dense<0.000000e+00> : vector<6x96xf32>
    %27 = tpu.matmul %24, %26, %cst_33 {dimension_numbers = #tpu.dot_dimension_numbers<[1], [0], [0], [1], [0, 0, 1, 1], [], []>} : vector<6x28xf32>, vector<28x96xf32>, vector<6x96xf32> -> vector<6x96xf32>
    %28 = arith.addf %22, %27 : vector<6x96xf32>
    %c0_34 = arith.constant 0 : index
    %c0_35 = arith.constant 0 : index
    %c0_36 = arith.constant 0 : index
    %c0_37 = arith.constant 0 : index
    %29 = vector.load %arg1[%c0_34, %c0_35, %c0_36, %c0_37] : memref<1x4x7x28xf32, #tpu.memory_space<vmem>>, vector<1x1x6x28xf32>
    %30 = vector.shape_cast %29 : vector<1x1x6x28xf32> to vector<6x28xf32>
    %c5 = arith.constant 5 : index
    %c0_38 = arith.constant 0 : index
    %c0_39 = arith.constant 0 : index
    %31 = vector.load %arg2[%c5, %c0_38, %c0_39] : memref<10x28x96xf32, #tpu.memory_space<vmem>>, vector<1x28x96xf32>
    %32 = vector.shape_cast %31 : vector<1x28x96xf32> to vector<28x96xf32>
    %cst_40 = arith.constant dense<0.000000e+00> : vector<6x96xf32>
    %33 = tpu.matmul %30, %32, %cst_40 {dimension_numbers = #tpu.dot_dimension_numbers<[1], [0], [0], [1], [0, 0, 1, 1], [], []>} : vector<6x28xf32>, vector<28x96xf32>, vector<6x96xf32> -> vector<6x96xf32>
    %c0_41 = arith.constant 0 : index
    %c1_42 = arith.constant 1 : index
    %c0_43 = arith.constant 0 : index
    %c0_44 = arith.constant 0 : index
    %34 = vector.load %arg1[%c0_41, %c1_42, %c0_43, %c0_44] : memref<1x4x7x28xf32, #tpu.memory_space<vmem>>, vector<1x1x6x28xf32>
    %35 = vector.shape_cast %34 : vector<1x1x6x28xf32> to vector<6x28xf32>
    %c6 = arith.constant 6 : index
    %c0_45 = arith.constant 0 : index
    %c0_46 = arith.constant 0 : index
    %36 = vector.load %arg2[%c6, %c0_45, %c0_46] : memref<10x28x96xf32, #tpu.memory_space<vmem>>, vector<1x28x96xf32>
    %37 = vector.shape_cast %36 : vector<1x28x96xf32> to vector<28x96xf32>
    %cst_47 = arith.constant dense<0.000000e+00> : vector<6x96xf32>
    %38 = tpu.matmul %35, %37, %cst_47 {dimension_numbers = #tpu.dot_dimension_numbers<[1], [0], [0], [1], [0, 0, 1, 1], [], []>} : vector<6x28xf32>, vector<28x96xf32>, vector<6x96xf32> -> vector<6x96xf32>
    %39 = arith.addf %33, %38 : vector<6x96xf32>
    %c0_48 = arith.constant 0 : index
    %c2_49 = arith.constant 2 : index
    %c0_50 = arith.constant 0 : index
    %c0_51 = arith.constant 0 : index
    %40 = vector.load %arg1[%c0_48, %c2_49, %c0_50, %c0_51] : memref<1x4x7x28xf32, #tpu.memory_space<vmem>>, vector<1x1x6x28xf32>
    %41 = vector.shape_cast %40 : vector<1x1x6x28xf32> to vector<6x28xf32>
    %c7 = arith.constant 7 : index
    %c0_52 = arith.constant 0 : index
    %c0_53 = arith.constant 0 : index
    %42 = vector.load %arg2[%c7, %c0_52, %c0_53] : memref<10x28x96xf32, #tpu.memory_space<vmem>>, vector<1x28x96xf32>
    %43 = vector.shape_cast %42 : vector<1x28x96xf32> to vector<28x96xf32>
    %cst_54 = arith.constant dense<0.000000e+00> : vector<6x96xf32>
    %44 = tpu.matmul %41, %43, %cst_54 {dimension_numbers = #tpu.dot_dimension_numbers<[1], [0], [0], [1], [0, 0, 1, 1], [], []>} : vector<6x28xf32>, vector<28x96xf32>, vector<6x96xf32> -> vector<6x96xf32>
    %45 = arith.addf %39, %44 : vector<6x96xf32>
    %c0_55 = arith.constant 0 : index
    %c3_56 = arith.constant 3 : index
    %c0_57 = arith.constant 0 : index
    %c0_58 = arith.constant 0 : index
    %46 = vector.load %arg1[%c0_55, %c3_56, %c0_57, %c0_58] : memref<1x4x7x28xf32, #tpu.memory_space<vmem>>, vector<1x1x6x28xf32>
    %47 = vector.shape_cast %46 : vector<1x1x6x28xf32> to vector<6x28xf32>
    %c8 = arith.constant 8 : index
    %c0_59 = arith.constant 0 : index
    %c0_60 = arith.constant 0 : index
    %48 = vector.load %arg2[%c8, %c0_59, %c0_60] : memref<10x28x96xf32, #tpu.memory_space<vmem>>, vector<1x28x96xf32>
    %49 = vector.shape_cast %48 : vector<1x28x96xf32> to vector<28x96xf32>
    %cst_61 = arith.constant dense<0.000000e+00> : vector<6x96xf32>
    %50 = tpu.matmul %47, %49, %cst_61 {dimension_numbers = #tpu.dot_dimension_numbers<[1], [0], [0], [1], [0, 0, 1, 1], [], []>} : vector<6x28xf32>, vector<28x96xf32>, vector<6x96xf32> -> vector<6x96xf32>
    %51 = arith.addf %45, %50 : vector<6x96xf32>
    %c0_62 = arith.constant 0 : index
    %c0_63 = arith.constant 0 : index
    %c1_64 = arith.constant 1 : index
    %c0_65 = arith.constant 0 : index
    %52 = vector.load %arg1[%c0_62, %c0_63, %c1_64, %c0_65] : memref<1x4x7x28xf32, #tpu.memory_space<vmem>>, vector<1x1x6x28xf32>
    %53 = vector.shape_cast %52 : vector<1x1x6x28xf32> to vector<6x28xf32>
    %c9 = arith.constant 9 : index
    %c0_66 = arith.constant 0 : index
    %c0_67 = arith.constant 0 : index
    %54 = vector.load %arg2[%c9, %c0_66, %c0_67] : memref<10x28x96xf32, #tpu.memory_space<vmem>>, vector<1x28x96xf32>
    %55 = vector.shape_cast %54 : vector<1x28x96xf32> to vector<28x96xf32>
    %cst_68 = arith.constant dense<0.000000e+00> : vector<6x96xf32>
    %56 = tpu.matmul %53, %55, %cst_68 {dimension_numbers = #tpu.dot_dimension_numbers<[1], [0], [0], [1], [0, 0, 1, 1], [], []>} : vector<6x28xf32>, vector<28x96xf32>, vector<6x96xf32> -> vector<6x96xf32>
    %57 = arith.addf %51, %56 : vector<6x96xf32>
    %58 = arith.maximumf %28, %57 : vector<6x96xf32>
    %c0_69 = arith.constant 0 : index
    %c1_70 = arith.constant 1 : index
    %c0_71 = arith.constant 0 : index
    %c0_72 = arith.constant 0 : index
    %59 = vector.load %arg1[%c0_69, %c1_70, %c0_71, %c0_72] : memref<1x4x7x28xf32, #tpu.memory_space<vmem>>, vector<1x1x6x28xf32>
    %60 = vector.shape_cast %59 : vector<1x1x6x28xf32> to vector<6x28xf32>
    %c0_73 = arith.constant 0 : index
    %c0_74 = arith.constant 0 : index
    %c0_75 = arith.constant 0 : index
    %61 = vector.load %arg2[%c0_73, %c0_74, %c0_75] : memref<10x28x96xf32, #tpu.memory_space<vmem>>, vector<1x28x96xf32>
    %62 = vector.shape_cast %61 : vector<1x28x96xf32> to vector<28x96xf32>
    %cst_76 = arith.constant dense<0.000000e+00> : vector<6x96xf32>
    %63 = tpu.matmul %60, %62, %cst_76 {dimension_numbers = #tpu.dot_dimension_numbers<[1], [0], [0], [1], [0, 0, 1, 1], [], []>} : vector<6x28xf32>, vector<28x96xf32>, vector<6x96xf32> -> vector<6x96xf32>
    %c0_77 = arith.constant 0 : index
    %c2_78 = arith.constant 2 : index
    %c0_79 = arith.constant 0 : index
    %c0_80 = arith.constant 0 : index
    %64 = vector.load %arg1[%c0_77, %c2_78, %c0_79, %c0_80] : memref<1x4x7x28xf32, #tpu.memory_space<vmem>>, vector<1x1x6x28xf32>
    %65 = vector.shape_cast %64 : vector<1x1x6x28xf32> to vector<6x28xf32>
    %c1_81 = arith.constant 1 : index
    %c0_82 = arith.constant 0 : index
    %c0_83 = arith.constant 0 : index
    %66 = vector.load %arg2[%c1_81, %c0_82, %c0_83] : memref<10x28x96xf32, #tpu.memory_space<vmem>>, vector<1x28x96xf32>
    %67 = vector.shape_cast %66 : vector<1x28x96xf32> to vector<28x96xf32>
    %cst_84 = arith.constant dense<0.000000e+00> : vector<6x96xf32>
    %68 = tpu.matmul %65, %67, %cst_84 {dimension_numbers = #tpu.dot_dimension_numbers<[1], [0], [0], [1], [0, 0, 1, 1], [], []>} : vector<6x28xf32>, vector<28x96xf32>, vector<6x96xf32> -> vector<6x96xf32>
    %69 = arith.addf %63, %68 : vector<6x96xf32>
    %c0_85 = arith.constant 0 : index
    %c3_86 = arith.constant 3 : index
    %c0_87 = arith.constant 0 : index
    %c0_88 = arith.constant 0 : index
    %70 = vector.load %arg1[%c0_85, %c3_86, %c0_87, %c0_88] : memref<1x4x7x28xf32, #tpu.memory_space<vmem>>, vector<1x1x6x28xf32>
    %71 = vector.shape_cast %70 : vector<1x1x6x28xf32> to vector<6x28xf32>
    %c2_89 = arith.constant 2 : index
    %c0_90 = arith.constant 0 : index
    %c0_91 = arith.constant 0 : index
    %72 = vector.load %arg2[%c2_89, %c0_90, %c0_91] : memref<10x28x96xf32, #tpu.memory_space<vmem>>, vector<1x28x96xf32>
    %73 = vector.shape_cast %72 : vector<1x28x96xf32> to vector<28x96xf32>
    %cst_92 = arith.constant dense<0.000000e+00> : vector<6x96xf32>
    %74 = tpu.matmul %71, %73, %cst_92 {dimension_numbers = #tpu.dot_dimension_numbers<[1], [0], [0], [1], [0, 0, 1, 1], [], []>} : vector<6x28xf32>, vector<28x96xf32>, vector<6x96xf32> -> vector<6x96xf32>
    %75 = arith.addf %69, %74 : vector<6x96xf32>
    %c0_93 = arith.constant 0 : index
    %c0_94 = arith.constant 0 : index
    %c1_95 = arith.constant 1 : index
    %c0_96 = arith.constant 0 : index
    %76 = vector.load %arg1[%c0_93, %c0_94, %c1_95, %c0_96] : memref<1x4x7x28xf32, #tpu.memory_space<vmem>>, vector<1x1x6x28xf32>
    %77 = vector.shape_cast %76 : vector<1x1x6x28xf32> to vector<6x28xf32>
    %c3_97 = arith.constant 3 : index
    %c0_98 = arith.constant 0 : index
    %c0_99 = arith.constant 0 : index
    %78 = vector.load %arg2[%c3_97, %c0_98, %c0_99] : memref<10x28x96xf32, #tpu.memory_space<vmem>>, vector<1x28x96xf32>
    %79 = vector.shape_cast %78 : vector<1x28x96xf32> to vector<28x96xf32>
    %cst_100 = arith.constant dense<0.000000e+00> : vector<6x96xf32>
    %80 = tpu.matmul %77, %79, %cst_100 {dimension_numbers = #tpu.dot_dimension_numbers<[1], [0], [0], [1], [0, 0, 1, 1], [], []>} : vector<6x28xf32>, vector<28x96xf32>, vector<6x96xf32> -> vector<6x96xf32>
    %81 = arith.addf %75, %80 : vector<6x96xf32>
    %c0_101 = arith.constant 0 : index
    %c1_102 = arith.constant 1 : index
    %c1_103 = arith.constant 1 : index
    %c0_104 = arith.constant 0 : index
    %82 = vector.load %arg1[%c0_101, %c1_102, %c1_103, %c0_104] : memref<1x4x7x28xf32, #tpu.memory_space<vmem>>, vector<1x1x6x28xf32>
    %83 = vector.shape_cast %82 : vector<1x1x6x28xf32> to vector<6x28xf32>
    %c4_105 = arith.constant 4 : index
    %c0_106 = arith.constant 0 : index
    %c0_107 = arith.constant 0 : index
    %84 = vector.load %arg2[%c4_105, %c0_106, %c0_107] : memref<10x28x96xf32, #tpu.memory_space<vmem>>, vector<1x28x96xf32>
    %85 = vector.shape_cast %84 : vector<1x28x96xf32> to vector<28x96xf32>
    %cst_108 = arith.constant dense<0.000000e+00> : vector<6x96xf32>
    %86 = tpu.matmul %83, %85, %cst_108 {dimension_numbers = #tpu.dot_dimension_numbers<[1], [0], [0], [1], [0, 0, 1, 1], [], []>} : vector<6x28xf32>, vector<28x96xf32>, vector<6x96xf32> -> vector<6x96xf32>
    %87 = arith.addf %81, %86 : vector<6x96xf32>
    %88 = arith.maximumf %58, %87 : vector<6x96xf32>
    %c0_109 = arith.constant 0 : index
    %c1_110 = arith.constant 1 : index
    %c0_111 = arith.constant 0 : index
    %c0_112 = arith.constant 0 : index
    %89 = vector.load %arg1[%c0_109, %c1_110, %c0_111, %c0_112] : memref<1x4x7x28xf32, #tpu.memory_space<vmem>>, vector<1x1x6x28xf32>
    %90 = vector.shape_cast %89 : vector<1x1x6x28xf32> to vector<6x28xf32>
    %c5_113 = arith.constant 5 : index
    %c0_114 = arith.constant 0 : index
    %c0_115 = arith.constant 0 : index
    %91 = vector.load %arg2[%c5_113, %c0_114, %c0_115] : memref<10x28x96xf32, #tpu.memory_space<vmem>>, vector<1x28x96xf32>
    %92 = vector.shape_cast %91 : vector<1x28x96xf32> to vector<28x96xf32>
    %cst_116 = arith.constant dense<0.000000e+00> : vector<6x96xf32>
    %93 = tpu.matmul %90, %92, %cst_116 {dimension_numbers = #tpu.dot_dimension_numbers<[1], [0], [0], [1], [0, 0, 1, 1], [], []>} : vector<6x28xf32>, vector<28x96xf32>, vector<6x96xf32> -> vector<6x96xf32>
    %c0_117 = arith.constant 0 : index
    %c2_118 = arith.constant 2 : index
    %c0_119 = arith.constant 0 : index
    %c0_120 = arith.constant 0 : index
    %94 = vector.load %arg1[%c0_117, %c2_118, %c0_119, %c0_120] : memref<1x4x7x28xf32, #tpu.memory_space<vmem>>, vector<1x1x6x28xf32>
    %95 = vector.shape_cast %94 : vector<1x1x6x28xf32> to vector<6x28xf32>
    %c6_121 = arith.constant 6 : index
    %c0_122 = arith.constant 0 : index
    %c0_123 = arith.constant 0 : index
    %96 = vector.load %arg2[%c6_121, %c0_122, %c0_123] : memref<10x28x96xf32, #tpu.memory_space<vmem>>, vector<1x28x96xf32>
    %97 = vector.shape_cast %96 : vector<1x28x96xf32> to vector<28x96xf32>
    %cst_124 = arith.constant dense<0.000000e+00> : vector<6x96xf32>
    %98 = tpu.matmul %95, %97, %cst_124 {dimension_numbers = #tpu.dot_dimension_numbers<[1], [0], [0], [1], [0, 0, 1, 1], [], []>} : vector<6x28xf32>, vector<28x96xf32>, vector<6x96xf32> -> vector<6x96xf32>
    %99 = arith.addf %93, %98 : vector<6x96xf32>
    %c0_125 = arith.constant 0 : index
    %c3_126 = arith.constant 3 : index
    %c0_127 = arith.constant 0 : index
    %c0_128 = arith.constant 0 : index
    %100 = vector.load %arg1[%c0_125, %c3_126, %c0_127, %c0_128] : memref<1x4x7x28xf32, #tpu.memory_space<vmem>>, vector<1x1x6x28xf32>
    %101 = vector.shape_cast %100 : vector<1x1x6x28xf32> to vector<6x28xf32>
    %c7_129 = arith.constant 7 : index
    %c0_130 = arith.constant 0 : index
    %c0_131 = arith.constant 0 : index
    %102 = vector.load %arg2[%c7_129, %c0_130, %c0_131] : memref<10x28x96xf32, #tpu.memory_space<vmem>>, vector<1x28x96xf32>
    %103 = vector.shape_cast %102 : vector<1x28x96xf32> to vector<28x96xf32>
    %cst_132 = arith.constant dense<0.000000e+00> : vector<6x96xf32>
    %104 = tpu.matmul %101, %103, %cst_132 {dimension_numbers = #tpu.dot_dimension_numbers<[1], [0], [0], [1], [0, 0, 1, 1], [], []>} : vector<6x28xf32>, vector<28x96xf32>, vector<6x96xf32> -> vector<6x96xf32>
    %105 = arith.addf %99, %104 : vector<6x96xf32>
    %c0_133 = arith.constant 0 : index
    %c0_134 = arith.constant 0 : index
    %c1_135 = arith.constant 1 : index
    %c0_136 = arith.constant 0 : index
    %106 = vector.load %arg1[%c0_133, %c0_134, %c1_135, %c0_136] : memref<1x4x7x28xf32, #tpu.memory_space<vmem>>, vector<1x1x6x28xf32>
    %107 = vector.shape_cast %106 : vector<1x1x6x28xf32> to vector<6x28xf32>
    %c8_137 = arith.constant 8 : index
    %c0_138 = arith.constant 0 : index
    %c0_139 = arith.constant 0 : index
    %108 = vector.load %arg2[%c8_137, %c0_138, %c0_139] : memref<10x28x96xf32, #tpu.memory_space<vmem>>, vector<1x28x96xf32>
    %109 = vector.shape_cast %108 : vector<1x28x96xf32> to vector<28x96xf32>
    %cst_140 = arith.constant dense<0.000000e+00> : vector<6x96xf32>
    %110 = tpu.matmul %107, %109, %cst_140 {dimension_numbers = #tpu.dot_dimension_numbers<[1], [0], [0], [1], [0, 0, 1, 1], [], []>} : vector<6x28xf32>, vector<28x96xf32>, vector<6x96xf32> -> vector<6x96xf32>
    %111 = arith.addf %105, %110 : vector<6x96xf32>
    %c0_141 = arith.constant 0 : index
    %c1_142 = arith.constant 1 : index
    %c1_143 = arith.constant 1 : index
    %c0_144 = arith.constant 0 : index
    %112 = vector.load %arg1[%c0_141, %c1_142, %c1_143, %c0_144] : memref<1x4x7x28xf32, #tpu.memory_space<vmem>>, vector<1x1x6x28xf32>
    %113 = vector.shape_cast %112 : vector<1x1x6x28xf32> to vector<6x28xf32>
    %c9_145 = arith.constant 9 : index
    %c0_146 = arith.constant 0 : index
    %c0_147 = arith.constant 0 : index
    %114 = vector.load %arg2[%c9_145, %c0_146, %c0_147] : memref<10x28x96xf32, #tpu.memory_space<vmem>>, vector<1x28x96xf32>
    %115 = vector.shape_cast %114 : vector<1x28x96xf32> to vector<28x96xf32>
    %cst_148 = arith.constant dense<0.000000e+00> : vector<6x96xf32>
    %116 = tpu.matmul %113, %115, %cst_148 {dimension_numbers = #tpu.dot_dimension_numbers<[1], [0], [0], [1], [0, 0, 1, 1], [], []>} : vector<6x28xf32>, vector<28x96xf32>, vector<6x96xf32> -> vector<6x96xf32>
    %117 = arith.addf %111, %116 : vector<6x96xf32>
    %118 = arith.maximumf %88, %117 : vector<6x96xf32>
    %c0_149 = arith.constant 0 : index
    %c0_150 = arith.constant 0 : index
    %119 = vector.load %arg3[%c0_149, %c0_150] : memref<1x96xf32, #tpu.memory_space<vmem>>, vector<1x96xf32>
    %120 = vector.broadcast %119 : vector<1x96xf32> to vector<6x96xf32>
    %121 = arith.addf %118, %120 : vector<6x96xf32>
    %cst_151 = arith.constant 0.000000e+00 : f32
    %122 = vector.broadcast %cst_151 : f32 to vector<6x96xf32>
    %123 = arith.cmpf ogt, %121, %122 : vector<6x96xf32>
    %cst_152 = arith.constant 0.00999999977 : f32
    %124 = vector.broadcast %cst_152 : f32 to vector<6x96xf32>
    %125 = arith.mulf %124, %121 : vector<6x96xf32>
    %126 = arith.select %123, %121, %125 : vector<6x96xi1>, vector<6x96xf32>
    %c0_153 = arith.constant 0 : index
    %c0_154 = arith.constant 0 : index
    %c0_155 = arith.constant 0 : index
    %127 = vector.load %arg13[%c0_153, %c0_154, %c0_155] : memref<2x6x96xf32, #tpu.memory_space<vmem>>, vector<1x6x96xf32>
    %128 = vector.shape_cast %127 : vector<1x6x96xf32> to vector<6x96xf32>
    %129 = vector.shape_cast %126 : vector<6x96xf32> to vector<1x6x96xf32>
    tpu.vector_store %arg13[%c0_153, %c0_154, %c0_155], %129 {strides = array<i32>} : memref<2x6x96xf32, #tpu.memory_space<vmem>>, vector<1x6x96xf32>,
    %c0_156 = arith.constant 0 : index
    %c2_157 = arith.constant 2 : index
    %c0_158 = arith.constant 0 : index
    %c0_159 = arith.constant 0 : index
    %130 = vector.load %arg1[%c0_156, %c2_157, %c0_158, %c0_159] : memref<1x4x7x28xf32, #tpu.memory_space<vmem>>, vector<1x1x6x28xf32>
    %131 = vector.shape_cast %130 : vector<1x1x6x28xf32> to vector<6x28xf32>
    %c0_160 = arith.constant 0 : index
    %c0_161 = arith.constant 0 : index
    %c0_162 = arith.constant 0 : index
    %132 = vector.load %arg2[%c0_160, %c0_161, %c0_162] : memref<10x28x96xf32, #tpu.memory_space<vmem>>, vector<1x28x96xf32>
    %133 = vector.shape_cast %132 : vector<1x28x96xf32> to vector<28x96xf32>
    %cst_163 = arith.constant dense<0.000000e+00> : vector<6x96xf32>
    %134 = tpu.matmul %131, %133, %cst_163 {dimension_numbers = #tpu.dot_dimension_numbers<[1], [0], [0], [1], [0, 0, 1, 1], [], []>} : vector<6x28xf32>, vector<28x96xf32>, vector<6x96xf32> -> vector<6x96xf32>
    %c0_164 = arith.constant 0 : index
    %c3_165 = arith.constant 3 : index
    %c0_166 = arith.constant 0 : index
    %c0_167 = arith.constant 0 : index
    %135 = vector.load %arg1[%c0_164, %c3_165, %c0_166, %c0_167] : memref<1x4x7x28xf32, #tpu.memory_space<vmem>>, vector<1x1x6x28xf32>
    %136 = vector.shape_cast %135 : vector<1x1x6x28xf32> to vector<6x28xf32>
    %c1_168 = arith.constant 1 : index
    %c0_169 = arith.constant 0 : index
    %c0_170 = arith.constant 0 : index
    %137 = vector.load %arg2[%c1_168, %c0_169, %c0_170] : memref<10x28x96xf32, #tpu.memory_space<vmem>>, vector<1x28x96xf32>
    %138 = vector.shape_cast %137 : vector<1x28x96xf32> to vector<28x96xf32>
    %cst_171 = arith.constant dense<0.000000e+00> : vector<6x96xf32>
    %139 = tpu.matmul %136, %138, %cst_171 {dimension_numbers = #tpu.dot_dimension_numbers<[1], [0], [0], [1], [0, 0, 1, 1], [], []>} : vector<6x28xf32>, vector<28x96xf32>, vector<6x96xf32> -> vector<6x96xf32>
    %140 = arith.addf %134, %139 : vector<6x96xf32>
    %c0_172 = arith.constant 0 : index
    %c0_173 = arith.constant 0 : index
    %c1_174 = arith.constant 1 : index
    %c0_175 = arith.constant 0 : index
    %141 = vector.load %arg1[%c0_172, %c0_173, %c1_174, %c0_175] : memref<1x4x7x28xf32, #tpu.memory_space<vmem>>, vector<1x1x6x28xf32>
    %142 = vector.shape_cast %141 : vector<1x1x6x28xf32> to vector<6x28xf32>
    %c2_176 = arith.constant 2 : index
    %c0_177 = arith.constant 0 : index
    %c0_178 = arith.constant 0 : index
    %143 = vector.load %arg2[%c2_176, %c0_177, %c0_178] : memref<10x28x96xf32, #tpu.memory_space<vmem>>, vector<1x28x96xf32>
    %144 = vector.shape_cast %143 : vector<1x28x96xf32> to vector<28x96xf32>
    %cst_179 = arith.constant dense<0.000000e+00> : vector<6x96xf32>
    %145 = tpu.matmul %142, %144, %cst_179 {dimension_numbers = #tpu.dot_dimension_numbers<[1], [0], [0], [1], [0, 0, 1, 1], [], []>} : vector<6x28xf32>, vector<28x96xf32>, vector<6x96xf32> -> vector<6x96xf32>
    %146 = arith.addf %140, %145 : vector<6x96xf32>
    %c0_180 = arith.constant 0 : index
    %c1_181 = arith.constant 1 : index
    %c1_182 = arith.constant 1 : index
    %c0_183 = arith.constant 0 : index
    %147 = vector.load %arg1[%c0_180, %c1_181, %c1_182, %c0_183] : memref<1x4x7x28xf32, #tpu.memory_space<vmem>>, vector<1x1x6x28xf32>
    %148 = vector.shape_cast %147 : vector<1x1x6x28xf32> to vector<6x28xf32>
    %c3_184 = arith.constant 3 : index
    %c0_185 = arith.constant 0 : index
    %c0_186 = arith.constant 0 : index
    %149 = vector.load %arg2[%c3_184, %c0_185, %c0_186] : memref<10x28x96xf32, #tpu.memory_space<vmem>>, vector<1x28x96xf32>
    %150 = vector.shape_cast %149 : vector<1x28x96xf32> to vector<28x96xf32>
    %cst_187 = arith.constant dense<0.000000e+00> : vector<6x96xf32>
    %151 = tpu.matmul %148, %150, %cst_187 {dimension_numbers = #tpu.dot_dimension_numbers<[1], [0], [0], [1], [0, 0, 1, 1], [], []>} : vector<6x28xf32>, vector<28x96xf32>, vector<6x96xf32> -> vector<6x96xf32>
    %152 = arith.addf %146, %151 : vector<6x96xf32>
    %c0_188 = arith.constant 0 : index
    %c2_189 = arith.constant 2 : index
    %c1_190 = arith.constant 1 : index
    %c0_191 = arith.constant 0 : index
    %153 = vector.load %arg1[%c0_188, %c2_189, %c1_190, %c0_191] : memref<1x4x7x28xf32, #tpu.memory_space<vmem>>, vector<1x1x6x28xf32>
    %154 = vector.shape_cast %153 : vector<1x1x6x28xf32> to vector<6x28xf32>
    %c4_192 = arith.constant 4 : index
    %c0_193 = arith.constant 0 : index
    %c0_194 = arith.constant 0 : index
    %155 = vector.load %arg2[%c4_192, %c0_193, %c0_194] : memref<10x28x96xf32, #tpu.memory_space<vmem>>, vector<1x28x96xf32>
    %156 = vector.shape_cast %155 : vector<1x28x96xf32> to vector<28x96xf32>
    %cst_195 = arith.constant dense<0.000000e+00> : vector<6x96xf32>
    %157 = tpu.matmul %154, %156, %cst_195 {dimension_numbers = #tpu.dot_dimension_numbers<[1], [0], [0], [1], [0, 0, 1, 1], [], []>} : vector<6x28xf32>, vector<28x96xf32>, vector<6x96xf32> -> vector<6x96xf32>
    %158 = arith.addf %152, %157 : vector<6x96xf32>
    %c0_196 = arith.constant 0 : index
    %c2_197 = arith.constant 2 : index
    %c0_198 = arith.constant 0 : index
    %c0_199 = arith.constant 0 : index
    %159 = vector.load %arg1[%c0_196, %c2_197, %c0_198, %c0_199] : memref<1x4x7x28xf32, #tpu.memory_space<vmem>>, vector<1x1x6x28xf32>
    %160 = vector.shape_cast %159 : vector<1x1x6x28xf32> to vector<6x28xf32>
    %c5_200 = arith.constant 5 : index
    %c0_201 = arith.constant 0 : index
    %c0_202 = arith.constant 0 : index
    %161 = vector.load %arg2[%c5_200, %c0_201, %c0_202] : memref<10x28x96xf32, #tpu.memory_space<vmem>>, vector<1x28x96xf32>
    %162 = vector.shape_cast %161 : vector<1x28x96xf32> to vector<28x96xf32>
    %cst_203 = arith.constant dense<0.000000e+00> : vector<6x96xf32>
    %163 = tpu.matmul %160, %162, %cst_203 {dimension_numbers = #tpu.dot_dimension_numbers<[1], [0], [0], [1], [0, 0, 1, 1], [], []>} : vector<6x28xf32>, vector<28x96xf32>, vector<6x96xf32> -> vector<6x96xf32>
    %c0_204 = arith.constant 0 : index
    %c3_205 = arith.constant 3 : index
    %c0_206 = arith.constant 0 : index
    %c0_207 = arith.constant 0 : index
    %164 = vector.load %arg1[%c0_204, %c3_205, %c0_206, %c0_207] : memref<1x4x7x28xf32, #tpu.memory_space<vmem>>, vector<1x1x6x28xf32>
    %165 = vector.shape_cast %164 : vector<1x1x6x28xf32> to vector<6x28xf32>
    %c6_208 = arith.constant 6 : index
    %c0_209 = arith.constant 0 : index
    %c0_210 = arith.constant 0 : index
    %166 = vector.load %arg2[%c6_208, %c0_209, %c0_210] : memref<10x28x96xf32, #tpu.memory_space<vmem>>, vector<1x28x96xf32>
    %167 = vector.shape_cast %166 : vector<1x28x96xf32> to vector<28x96xf32>
    %cst_211 = arith.constant dense<0.000000e+00> : vector<6x96xf32>
    %168 = tpu.matmul %165, %167, %cst_211 {dimension_numbers = #tpu.dot_dimension_numbers<[1], [0], [0], [1], [0, 0, 1, 1], [], []>} : vector<6x28xf32>, vector<28x96xf32>, vector<6x96xf32> -> vector<6x96xf32>
    %169 = arith.addf %163, %168 : vector<6x96xf32>
    %c0_212 = arith.constant 0 : index
    %c0_213 = arith.constant 0 : index
    %c1_214 = arith.constant 1 : index
    %c0_215 = arith.constant 0 : index
    %170 = vector.load %arg1[%c0_212, %c0_213, %c1_214, %c0_215] : memref<1x4x7x28xf32, #tpu.memory_space<vmem>>, vector<1x1x6x28xf32>
    %171 = vector.shape_cast %170 : vector<1x1x6x28xf32> to vector<6x28xf32>
    %c7_216 = arith.constant 7 : index
    %c0_217 = arith.constant 0 : index
    %c0_218 = arith.constant 0 : index
    %172 = vector.load %arg2[%c7_216, %c0_217, %c0_218] : memref<10x28x96xf32, #tpu.memory_space<vmem>>, vector<1x28x96xf32>
    %173 = vector.shape_cast %172 : vector<1x28x96xf32> to vector<28x96xf32>
    %cst_219 = arith.constant dense<0.000000e+00> : vector<6x96xf32>
    %174 = tpu.matmul %171, %173, %cst_219 {dimension_numbers = #tpu.dot_dimension_numbers<[1], [0], [0], [1], [0, 0, 1, 1], [], []>} : vector<6x28xf32>, vector<28x96xf32>, vector<6x96xf32> -> vector<6x96xf32>
    %175 = arith.addf %169, %174 : vector<6x96xf32>
    %c0_220 = arith.constant 0 : index
    %c1_221 = arith.constant 1 : index
    %c1_222 = arith.constant 1 : index
    %c0_223 = arith.constant 0 : index
    %176 = vector.load %arg1[%c0_220, %c1_221, %c1_222, %c0_223] : memref<1x4x7x28xf32, #tpu.memory_space<vmem>>, vector<1x1x6x28xf32>
    %177 = vector.shape_cast %176 : vector<1x1x6x28xf32> to vector<6x28xf32>
    %c8_224 = arith.constant 8 : index
    %c0_225 = arith.constant 0 : index
    %c0_226 = arith.constant 0 : index
    %178 = vector.load %arg2[%c8_224, %c0_225, %c0_226] : memref<10x28x96xf32, #tpu.memory_space<vmem>>, vector<1x28x96xf32>
    %179 = vector.shape_cast %178 : vector<1x28x96xf32> to vector<28x96xf32>
    %cst_227 = arith.constant dense<0.000000e+00> : vector<6x96xf32>
    %180 = tpu.matmul %177, %179, %cst_227 {dimension_numbers = #tpu.dot_dimension_numbers<[1], [0], [0], [1], [0, 0, 1, 1], [], []>} : vector<6x28xf32>, vector<28x96xf32>, vector<6x96xf32> -> vector<6x96xf32>
    %181 = arith.addf %175, %180 : vector<6x96xf32>
    %c0_228 = arith.constant 0 : index
    %c2_229 = arith.constant 2 : index
    %c1_230 = arith.constant 1 : index
    %c0_231 = arith.constant 0 : index
    %182 = vector.load %arg1[%c0_228, %c2_229, %c1_230, %c0_231] : memref<1x4x7x28xf32, #tpu.memory_space<vmem>>, vector<1x1x6x28xf32>
    %183 = vector.shape_cast %182 : vector<1x1x6x28xf32> to vector<6x28xf32>
    %c9_232 = arith.constant 9 : index
    %c0_233 = arith.constant 0 : index
    %c0_234 = arith.constant 0 : index
    %184 = vector.load %arg2[%c9_232, %c0_233, %c0_234] : memref<10x28x96xf32, #tpu.memory_space<vmem>>, vector<1x28x96xf32>
    %185 = vector.shape_cast %184 : vector<1x28x96xf32> to vector<28x96xf32>
    %cst_235 = arith.constant dense<0.000000e+00> : vector<6x96xf32>
    %186 = tpu.matmul %183, %185, %cst_235 {dimension_numbers = #tpu.dot_dimension_numbers<[1], [0], [0], [1], [0, 0, 1, 1], [], []>} : vector<6x28xf32>, vector<28x96xf32>, vector<6x96xf32> -> vector<6x96xf32>
    %187 = arith.addf %181, %186 : vector<6x96xf32>
    %188 = arith.maximumf %158, %187 : vector<6x96xf32>
    %c0_236 = arith.constant 0 : index
    %c3_237 = arith.constant 3 : index
    %c0_238 = arith.constant 0 : index
    %c0_239 = arith.constant 0 : index
    %189 = vector.load %arg1[%c0_236, %c3_237, %c0_238, %c0_239] : memref<1x4x7x28xf32, #tpu.memory_space<vmem>>, vector<1x1x6x28xf32>
    %190 = vector.shape_cast %189 : vector<1x1x6x28xf32> to vector<6x28xf32>
    %c0_240 = arith.constant 0 : index
    %c0_241 = arith.constant 0 : index
    %c0_242 = arith.constant 0 : index
    %191 = vector.load %arg2[%c0_240, %c0_241, %c0_242] : memref<10x28x96xf32, #tpu.memory_space<vmem>>, vector<1x28x96xf32>
    %192 = vector.shape_cast %191 : vector<1x28x96xf32> to vector<28x96xf32>
    %cst_243 = arith.constant dense<0.000000e+00> : vector<6x96xf32>
    %193 = tpu.matmul %190, %192, %cst_243 {dimension_numbers = #tpu.dot_dimension_numbers<[1], [0], [0], [1], [0, 0, 1, 1], [], []>} : vector<6x28xf32>, vector<28x96xf32>, vector<6x96xf32> -> vector<6x96xf32>
    %c0_244 = arith.constant 0 : index
    %c0_245 = arith.constant 0 : index
    %c1_246 = arith.constant 1 : index
    %c0_247 = arith.constant 0 : index
    %194 = vector.load %arg1[%c0_244, %c0_245, %c1_246, %c0_247] : memref<1x4x7x28xf32, #tpu.memory_space<vmem>>, vector<1x1x6x28xf32>
    %195 = vector.shape_cast %194 : vector<1x1x6x28xf32> to vector<6x28xf32>
    %c1_248 = arith.constant 1 : index
    %c0_249 = arith.constant 0 : index
    %c0_250 = arith.constant 0 : index
    %196 = vector.load %arg2[%c1_248, %c0_249, %c0_250] : memref<10x28x96xf32, #tpu.memory_space<vmem>>, vector<1x28x96xf32>
    %197 = vector.shape_cast %196 : vector<1x28x96xf32> to vector<28x96xf32>
    %cst_251 = arith.constant dense<0.000000e+00> : vector<6x96xf32>
    %198 = tpu.matmul %195, %197, %cst_251 {dimension_numbers = #tpu.dot_dimension_numbers<[1], [0], [0], [1], [0, 0, 1, 1], [], []>} : vector<6x28xf32>, vector<28x96xf32>, vector<6x96xf32> -> vector<6x96xf32>
    %199 = arith.addf %193, %198 : vector<6x96xf32>
    %c0_252 = arith.constant 0 : index
    %c1_253 = arith.constant 1 : index
    %c1_254 = arith.constant 1 : index
    %c0_255 = arith.constant 0 : index
    %200 = vector.load %arg1[%c0_252, %c1_253, %c1_254, %c0_255] : memref<1x4x7x28xf32, #tpu.memory_space<vmem>>, vector<1x1x6x28xf32>
    %201 = vector.shape_cast %200 : vector<1x1x6x28xf32> to vector<6x28xf32>
    %c2_256 = arith.constant 2 : index
    %c0_257 = arith.constant 0 : index
    %c0_258 = arith.constant 0 : index
    %202 = vector.load %arg2[%c2_256, %c0_257, %c0_258] : memref<10x28x96xf32, #tpu.memory_space<vmem>>, vector<1x28x96xf32>
    %203 = vector.shape_cast %202 : vector<1x28x96xf32> to vector<28x96xf32>
    %cst_259 = arith.constant dense<0.000000e+00> : vector<6x96xf32>
    %204 = tpu.matmul %201, %203, %cst_259 {dimension_numbers = #tpu.dot_dimension_numbers<[1], [0], [0], [1], [0, 0, 1, 1], [], []>} : vector<6x28xf32>, vector<28x96xf32>, vector<6x96xf32> -> vector<6x96xf32>
    %205 = arith.addf %199, %204 : vector<6x96xf32>
    %c0_260 = arith.constant 0 : index
    %c2_261 = arith.constant 2 : index
    %c1_262 = arith.constant 1 : index
    %c0_263 = arith.constant 0 : index
    %206 = vector.load %arg1[%c0_260, %c2_261, %c1_262, %c0_263] : memref<1x4x7x28xf32, #tpu.memory_space<vmem>>, vector<1x1x6x28xf32>
    %207 = vector.shape_cast %206 : vector<1x1x6x28xf32> to vector<6x28xf32>
    %c3_264 = arith.constant 3 : index
    %c0_265 = arith.constant 0 : index
    %c0_266 = arith.constant 0 : index
    %208 = vector.load %arg2[%c3_264, %c0_265, %c0_266] : memref<10x28x96xf32, #tpu.memory_space<vmem>>, vector<1x28x96xf32>
    %209 = vector.shape_cast %208 : vector<1x28x96xf32> to vector<28x96xf32>
    %cst_267 = arith.constant dense<0.000000e+00> : vector<6x96xf32>
    %210 = tpu.matmul %207, %209, %cst_267 {dimension_numbers = #tpu.dot_dimension_numbers<[1], [0], [0], [1], [0, 0, 1, 1], [], []>} : vector<6x28xf32>, vector<28x96xf32>, vector<6x96xf32> -> vector<6x96xf32>
    %211 = arith.addf %205, %210 : vector<6x96xf32>
    %c0_268 = arith.constant 0 : index
    %c3_269 = arith.constant 3 : index
    %c1_270 = arith.constant 1 : index
    %c0_271 = arith.constant 0 : index
    %212 = vector.load %arg1[%c0_268, %c3_269, %c1_270, %c0_271] : memref<1x4x7x28xf32, #tpu.memory_space<vmem>>, vector<1x1x6x28xf32>
    %213 = vector.shape_cast %212 : vector<1x1x6x28xf32> to vector<6x28xf32>
    %c4_272 = arith.constant 4 : index
    %c0_273 = arith.constant 0 : index
    %c0_274 = arith.constant 0 : index
    %214 = vector.load %arg2[%c4_272, %c0_273, %c0_274] : memref<10x28x96xf32, #tpu.memory_space<vmem>>, vector<1x28x96xf32>
    %215 = vector.shape_cast %214 : vector<1x28x96xf32> to vector<28x96xf32>
    %cst_275 = arith.constant dense<0.000000e+00> : vector<6x96xf32>
    %216 = tpu.matmul %213, %215, %cst_275 {dimension_numbers = #tpu.dot_dimension_numbers<[1], [0], [0], [1], [0, 0, 1, 1], [], []>} : vector<6x28xf32>, vector<28x96xf32>, vector<6x96xf32> -> vector<6x96xf32>
    %217 = arith.addf %211, %216 : vector<6x96xf32>
    %218 = arith.maximumf %188, %217 : vector<6x96xf32>
    %c0_276 = arith.constant 0 : index
    %c3_277 = arith.constant 3 : index
    %c0_278 = arith.constant 0 : index
    %c0_279 = arith.constant 0 : index
    %219 = vector.load %arg1[%c0_276, %c3_277, %c0_278, %c0_279] : memref<1x4x7x28xf32, #tpu.memory_space<vmem>>, vector<1x1x6x28xf32>
    %220 = vector.shape_cast %219 : vector<1x1x6x28xf32> to vector<6x28xf32>
    %c5_280 = arith.constant 5 : index
    %c0_281 = arith.constant 0 : index
    %c0_282 = arith.constant 0 : index
    %221 = vector.load %arg2[%c5_280, %c0_281, %c0_282] : memref<10x28x96xf32, #tpu.memory_space<vmem>>, vector<1x28x96xf32>
    %222 = vector.shape_cast %221 : vector<1x28x96xf32> to vector<28x96xf32>
    %cst_283 = arith.constant dense<0.000000e+00> : vector<6x96xf32>
    %223 = tpu.matmul %220, %222, %cst_283 {dimension_numbers = #tpu.dot_dimension_numbers<[1], [0], [0], [1], [0, 0, 1, 1], [], []>} : vector<6x28xf32>, vector<28x96xf32>, vector<6x96xf32> -> vector<6x96xf32>
    %c0_284 = arith.constant 0 : index
    %c0_285 = arith.constant 0 : index
    %c1_286 = arith.constant 1 : index
    %c0_287 = arith.constant 0 : index
    %224 = vector.load %arg1[%c0_284, %c0_285, %c1_286, %c0_287] : memref<1x4x7x28xf32, #tpu.memory_space<vmem>>, vector<1x1x6x28xf32>
    %225 = vector.shape_cast %224 : vector<1x1x6x28xf32> to vector<6x28xf32>
    %c6_288 = arith.constant 6 : index
    %c0_289 = arith.constant 0 : index
    %c0_290 = arith.constant 0 : index
    %226 = vector.load %arg2[%c6_288, %c0_289, %c0_290] : memref<10x28x96xf32, #tpu.memory_space<vmem>>, vector<1x28x96xf32>
    %227 = vector.shape_cast %226 : vector<1x28x96xf32> to vector<28x96xf32>
    %cst_291 = arith.constant dense<0.000000e+00> : vector<6x96xf32>
    %228 = tpu.matmul %225, %227, %cst_291 {dimension_numbers = #tpu.dot_dimension_numbers<[1], [0], [0], [1], [0, 0, 1, 1], [], []>} : vector<6x28xf32>, vector<28x96xf32>, vector<6x96xf32> -> vector<6x96xf32>
    %229 = arith.addf %223, %228 : vector<6x96xf32>
    %c0_292 = arith.constant 0 : index
    %c1_293 = arith.constant 1 : index
    %c1_294 = arith.constant 1 : index
    %c0_295 = arith.constant 0 : index
    %230 = vector.load %arg1[%c0_292, %c1_293, %c1_294, %c0_295] : memref<1x4x7x28xf32, #tpu.memory_space<vmem>>, vector<1x1x6x28xf32>
    %231 = vector.shape_cast %230 : vector<1x1x6x28xf32> to vector<6x28xf32>
    %c7_296 = arith.constant 7 : index
    %c0_297 = arith.constant 0 : index
    %c0_298 = arith.constant 0 : index
    %232 = vector.load %arg2[%c7_296, %c0_297, %c0_298] : memref<10x28x96xf32, #tpu.memory_space<vmem>>, vector<1x28x96xf32>
    %233 = vector.shape_cast %232 : vector<1x28x96xf32> to vector<28x96xf32>
    %cst_299 = arith.constant dense<0.000000e+00> : vector<6x96xf32>
    %234 = tpu.matmul %231, %233, %cst_299 {dimension_numbers = #tpu.dot_dimension_numbers<[1], [0], [0], [1], [0, 0, 1, 1], [], []>} : vector<6x28xf32>, vector<28x96xf32>, vector<6x96xf32> -> vector<6x96xf32>
    %235 = arith.addf %229, %234 : vector<6x96xf32>
    %c0_300 = arith.constant 0 : index
    %c2_301 = arith.constant 2 : index
    %c1_302 = arith.constant 1 : index
    %c0_303 = arith.constant 0 : index
    %236 = vector.load %arg1[%c0_300, %c2_301, %c1_302, %c0_303] : memref<1x4x7x28xf32, #tpu.memory_space<vmem>>, vector<1x1x6x28xf32>
    %237 = vector.shape_cast %236 : vector<1x1x6x28xf32> to vector<6x28xf32>
    %c8_304 = arith.constant 8 : index
    %c0_305 = arith.constant 0 : index
    %c0_306 = arith.constant 0 : index
    %238 = vector.load %arg2[%c8_304, %c0_305, %c0_306] : memref<10x28x96xf32, #tpu.memory_space<vmem>>, vector<1x28x96xf32>
    %239 = vector.shape_cast %238 : vector<1x28x96xf32> to vector<28x96xf32>
    %cst_307 = arith.constant dense<0.000000e+00> : vector<6x96xf32>
    %240 = tpu.matmul %237, %239, %cst_307 {dimension_numbers = #tpu.dot_dimension_numbers<[1], [0], [0], [1], [0, 0, 1, 1], [], []>} : vector<6x28xf32>, vector<28x96xf32>, vector<6x96xf32> -> vector<6x96xf32>
    %241 = arith.addf %235, %240 : vector<6x96xf32>
    %c0_308 = arith.constant 0 : index
    %c3_309 = arith.constant 3 : index
    %c1_310 = arith.constant 1 : index
    %c0_311 = arith.constant 0 : index
    %242 = vector.load %arg1[%c0_308, %c3_309, %c1_310, %c0_311] : memref<1x4x7x28xf32, #tpu.memory_space<vmem>>, vector<1x1x6x28xf32>
    %243 = vector.shape_cast %242 : vector<1x1x6x28xf32> to vector<6x28xf32>
    %c9_312 = arith.constant 9 : index
    %c0_313 = arith.constant 0 : index
    %c0_314 = arith.constant 0 : index
    %244 = vector.load %arg2[%c9_312, %c0_313, %c0_314] : memref<10x28x96xf32, #tpu.memory_space<vmem>>, vector<1x28x96xf32>
    %245 = vector.shape_cast %244 : vector<1x28x96xf32> to vector<28x96xf32>
    %cst_315 = arith.constant dense<0.000000e+00> : vector<6x96xf32>
    %246 = tpu.matmul %243, %245, %cst_315 {dimension_numbers = #tpu.dot_dimension_numbers<[1], [0], [0], [1], [0, 0, 1, 1], [], []>} : vector<6x28xf32>, vector<28x96xf32>, vector<6x96xf32> -> vector<6x96xf32>
    %247 = arith.addf %241, %246 : vector<6x96xf32>
    %248 = arith.maximumf %218, %247 : vector<6x96xf32>
    %c0_316 = arith.constant 0 : index
    %c0_317 = arith.constant 0 : index
    %249 = vector.load %arg3[%c0_316, %c0_317] : memref<1x96xf32, #tpu.memory_space<vmem>>, vector<1x96xf32>
    %250 = vector.broadcast %249 : vector<1x96xf32> to vector<6x96xf32>
    %251 = arith.addf %248, %250 : vector<6x96xf32>
    %cst_318 = arith.constant 0.000000e+00 : f32
    %252 = vector.broadcast %cst_318 : f32 to vector<6x96xf32>
    %253 = arith.cmpf ogt, %251, %252 : vector<6x96xf32>
    %cst_319 = arith.constant 0.00999999977 : f32
    %254 = vector.broadcast %cst_319 : f32 to vector<6x96xf32>
    %255 = arith.mulf %254, %251 : vector<6x96xf32>
    %256 = arith.select %253, %251, %255 : vector<6x96xi1>, vector<6x96xf32>
    %c1_320 = arith.constant 1 : index
    %c0_321 = arith.constant 0 : index
    %c0_322 = arith.constant 0 : index
    %257 = vector.load %arg13[%c1_320, %c0_321, %c0_322] : memref<2x6x96xf32, #tpu.memory_space<vmem>>, vector<1x6x96xf32>
    %258 = vector.shape_cast %257 : vector<1x6x96xf32> to vector<6x96xf32>
    %259 = vector.shape_cast %256 : vector<6x96xf32> to vector<1x6x96xf32>
    tpu.vector_store %arg13[%c1_320, %c0_321, %c0_322], %259 {strides = array<i32>} : memref<2x6x96xf32, #tpu.memory_space<vmem>>, vector<1x6x96xf32>,
    %c0_323 = arith.constant 0 : index
    %c0_324 = arith.constant 0 : index
    %c0_325 = arith.constant 0 : index
    %260 = vector.load %arg13[%c0_323, %c0_324, %c0_325] : memref<2x6x96xf32, #tpu.memory_space<vmem>>, vector<1x4x96xf32>
    %261 = vector.shape_cast %260 : vector<1x4x96xf32> to vector<4x96xf32>
    %c0_326 = arith.constant 0 : index
    %c0_327 = arith.constant 0 : index
    %c0_328 = arith.constant 0 : index
    %262 = vector.load %arg4[%c0_326, %c0_327, %c0_328] : memref<10x96x24xf32, #tpu.memory_space<vmem>>, vector<1x96x24xf32>
    %263 = vector.shape_cast %262 : vector<1x96x24xf32> to vector<96x24xf32>
    %cst_329 = arith.constant dense<0.000000e+00> : vector<4x24xf32>
    %264 = tpu.matmul %261, %263, %cst_329 {dimension_numbers = #tpu.dot_dimension_numbers<[1], [0], [0], [1], [0, 0, 1, 1], [], []>} : vector<4x96xf32>, vector<96x24xf32>, vector<4x24xf32> -> vector<4x24xf32>
    %c1_330 = arith.constant 1 : index
    %c0_331 = arith.constant 0 : index
    %c0_332 = arith.constant 0 : index
    %265 = vector.load %arg13[%c1_330, %c0_331, %c0_332] : memref<2x6x96xf32, #tpu.memory_space<vmem>>, vector<1x4x96xf32>
    %266 = vector.shape_cast %265 : vector<1x4x96xf32> to vector<4x96xf32>
    %c1_333 = arith.constant 1 : index
    %c0_334 = arith.constant 0 : index
    %c0_335 = arith.constant 0 : index
    %267 = vector.load %arg4[%c1_333, %c0_334, %c0_335] : memref<10x96x24xf32, #tpu.memory_space<vmem>>, vector<1x96x24xf32>
    %268 = vector.shape_cast %267 : vector<1x96x24xf32> to vector<96x24xf32>
    %cst_336 = arith.constant dense<0.000000e+00> : vector<4x24xf32>
    %269 = tpu.matmul %266, %268, %cst_336 {dimension_numbers = #tpu.dot_dimension_numbers<[1], [0], [0], [1], [0, 0, 1, 1], [], []>} : vector<4x96xf32>, vector<96x24xf32>, vector<4x24xf32> -> vector<4x24xf32>
    %270 = arith.addf %264, %269 : vector<4x24xf32>
    %c0_337 = arith.constant 0 : index
    %c1_338 = arith.constant 1 : index
    %c0_339 = arith.constant 0 : index
    %271 = vector.load %arg13[%c0_337, %c1_338, %c0_339] : memref<2x6x96xf32, #tpu.memory_space<vmem>>, vector<1x4x96xf32>
    %272 = vector.shape_cast %271 : vector<1x4x96xf32> to vector<4x96xf32>
    %c2_340 = arith.constant 2 : index
    %c0_341 = arith.constant 0 : index
    %c0_342 = arith.constant 0 : index
    %273 = vector.load %arg4[%c2_340, %c0_341, %c0_342] : memref<10x96x24xf32, #tpu.memory_space<vmem>>, vector<1x96x24xf32>
    %274 = vector.shape_cast %273 : vector<1x96x24xf32> to vector<96x24xf32>
    %cst_343 = arith.constant dense<0.000000e+00> : vector<4x24xf32>
    %275 = tpu.matmul %272, %274, %cst_343 {dimension_numbers = #tpu.dot_dimension_numbers<[1], [0], [0], [1], [0, 0, 1, 1], [], []>} : vector<4x96xf32>, vector<96x24xf32>, vector<4x24xf32> -> vector<4x24xf32>
    %276 = arith.addf %270, %275 : vector<4x24xf32>
    %c1_344 = arith.constant 1 : index
    %c1_345 = arith.constant 1 : index
    %c0_346 = arith.constant 0 : index
    %277 = vector.load %arg13[%c1_344, %c1_345, %c0_346] : memref<2x6x96xf32, #tpu.memory_space<vmem>>, vector<1x4x96xf32>
    %278 = vector.shape_cast %277 : vector<1x4x96xf32> to vector<4x96xf32>
    %c3_347 = arith.constant 3 : index
    %c0_348 = arith.constant 0 : index
    %c0_349 = arith.constant 0 : index
    %279 = vector.load %arg4[%c3_347, %c0_348, %c0_349] : memref<10x96x24xf32, #tpu.memory_space<vmem>>, vector<1x96x24xf32>
    %280 = vector.shape_cast %279 : vector<1x96x24xf32> to vector<96x24xf32>
    %cst_350 = arith.constant dense<0.000000e+00> : vector<4x24xf32>
    %281 = tpu.matmul %278, %280, %cst_350 {dimension_numbers = #tpu.dot_dimension_numbers<[1], [0], [0], [1], [0, 0, 1, 1], [], []>} : vector<4x96xf32>, vector<96x24xf32>, vector<4x24xf32> -> vector<4x24xf32>
    %282 = arith.addf %276, %281 : vector<4x24xf32>
    %c0_351 = arith.constant 0 : index
    %c2_352 = arith.constant 2 : index
    %c0_353 = arith.constant 0 : index
    %283 = vector.load %arg13[%c0_351, %c2_352, %c0_353] : memref<2x6x96xf32, #tpu.memory_space<vmem>>, vector<1x4x96xf32>
    %284 = vector.shape_cast %283 : vector<1x4x96xf32> to vector<4x96xf32>
    %c4_354 = arith.constant 4 : index
    %c0_355 = arith.constant 0 : index
    %c0_356 = arith.constant 0 : index
    %285 = vector.load %arg4[%c4_354, %c0_355, %c0_356] : memref<10x96x24xf32, #tpu.memory_space<vmem>>, vector<1x96x24xf32>
    %286 = vector.shape_cast %285 : vector<1x96x24xf32> to vector<96x24xf32>
    %cst_357 = arith.constant dense<0.000000e+00> : vector<4x24xf32>
    %287 = tpu.matmul %284, %286, %cst_357 {dimension_numbers = #tpu.dot_dimension_numbers<[1], [0], [0], [1], [0, 0, 1, 1], [], []>} : vector<4x96xf32>, vector<96x24xf32>, vector<4x24xf32> -> vector<4x24xf32>
    %288 = arith.addf %282, %287 : vector<4x24xf32>
    %c0_358 = arith.constant 0 : index
    %c0_359 = arith.constant 0 : index
    %c0_360 = arith.constant 0 : index
    %289 = vector.load %arg13[%c0_358, %c0_359, %c0_360] : memref<2x6x96xf32, #tpu.memory_space<vmem>>, vector<1x4x96xf32>
    %290 = vector.shape_cast %289 : vector<1x4x96xf32> to vector<4x96xf32>
    %c5_361 = arith.constant 5 : index
    %c0_362 = arith.constant 0 : index
    %c0_363 = arith.constant 0 : index
    %291 = vector.load %arg4[%c5_361, %c0_362, %c0_363] : memref<10x96x24xf32, #tpu.memory_space<vmem>>, vector<1x96x24xf32>
    %292 = vector.shape_cast %291 : vector<1x96x24xf32> to vector<96x24xf32>
    %cst_364 = arith.constant dense<0.000000e+00> : vector<4x24xf32>
    %293 = tpu.matmul %290, %292, %cst_364 {dimension_numbers = #tpu.dot_dimension_numbers<[1], [0], [0], [1], [0, 0, 1, 1], [], []>} : vector<4x96xf32>, vector<96x24xf32>, vector<4x24xf32> -> vector<4x24xf32>
    %c1_365 = arith.constant 1 : index
    %c0_366 = arith.constant 0 : index
    %c0_367 = arith.constant 0 : index
    %294 = vector.load %arg13[%c1_365, %c0_366, %c0_367] : memref<2x6x96xf32, #tpu.memory_space<vmem>>, vector<1x4x96xf32>
    %295 = vector.shape_cast %294 : vector<1x4x96xf32> to vector<4x96xf32>
    %c6_368 = arith.constant 6 : index
    %c0_369 = arith.constant 0 : index
    %c0_370 = arith.constant 0 : index
    %296 = vector.load %arg4[%c6_368, %c0_369, %c0_370] : memref<10x96x24xf32, #tpu.memory_space<vmem>>, vector<1x96x24xf32>
    %297 = vector.shape_cast %296 : vector<1x96x24xf32> to vector<96x24xf32>
    %cst_371 = arith.constant dense<0.000000e+00> : vector<4x24xf32>
    %298 = tpu.matmul %295, %297, %cst_371 {dimension_numbers = #tpu.dot_dimension_numbers<[1], [0], [0], [1], [0, 0, 1, 1], [], []>} : vector<4x96xf32>, vector<96x24xf32>, vector<4x24xf32> -> vector<4x24xf32>
    %299 = arith.addf %293, %298 : vector<4x24xf32>
    %c0_372 = arith.constant 0 : index
    %c1_373 = arith.constant 1 : index
    %c0_374 = arith.constant 0 : index
    %300 = vector.load %arg13[%c0_372, %c1_373, %c0_374] : memref<2x6x96xf32, #tpu.memory_space<vmem>>, vector<1x4x96xf32>
    %301 = vector.shape_cast %300 : vector<1x4x96xf32> to vector<4x96xf32>
    %c7_375 = arith.constant 7 : index
    %c0_376 = arith.constant 0 : index
    %c0_377 = arith.constant 0 : index
    %302 = vector.load %arg4[%c7_375, %c0_376, %c0_377] : memref<10x96x24xf32, #tpu.memory_space<vmem>>, vector<1x96x24xf32>
    %303 = vector.shape_cast %302 : vector<1x96x24xf32> to vector<96x24xf32>
    %cst_378 = arith.constant dense<0.000000e+00> : vector<4x24xf32>
    %304 = tpu.matmul %301, %303, %cst_378 {dimension_numbers = #tpu.dot_dimension_numbers<[1], [0], [0], [1], [0, 0, 1, 1], [], []>} : vector<4x96xf32>, vector<96x24xf32>, vector<4x24xf32> -> vector<4x24xf32>
    %305 = arith.addf %299, %304 : vector<4x24xf32>
    %c1_379 = arith.constant 1 : index
    %c1_380 = arith.constant 1 : index
    %c0_381 = arith.constant 0 : index
    %306 = vector.load %arg13[%c1_379, %c1_380, %c0_381] : memref<2x6x96xf32, #tpu.memory_space<vmem>>, vector<1x4x96xf32>
    %307 = vector.shape_cast %306 : vector<1x4x96xf32> to vector<4x96xf32>
    %c8_382 = arith.constant 8 : index
    %c0_383 = arith.constant 0 : index
    %c0_384 = arith.constant 0 : index
    %308 = vector.load %arg4[%c8_382, %c0_383, %c0_384] : memref<10x96x24xf32, #tpu.memory_space<vmem>>, vector<1x96x24xf32>
    %309 = vector.shape_cast %308 : vector<1x96x24xf32> to vector<96x24xf32>
    %cst_385 = arith.constant dense<0.000000e+00> : vector<4x24xf32>
    %310 = tpu.matmul %307, %309, %cst_385 {dimension_numbers = #tpu.dot_dimension_numbers<[1], [0], [0], [1], [0, 0, 1, 1], [], []>} : vector<4x96xf32>, vector<96x24xf32>, vector<4x24xf32> -> vector<4x24xf32>
    %311 = arith.addf %305, %310 : vector<4x24xf32>
    %c0_386 = arith.constant 0 : index
    %c2_387 = arith.constant 2 : index
    %c0_388 = arith.constant 0 : index
    %312 = vector.load %arg13[%c0_386, %c2_387, %c0_388] : memref<2x6x96xf32, #tpu.memory_space<vmem>>, vector<1x4x96xf32>
    %313 = vector.shape_cast %312 : vector<1x4x96xf32> to vector<4x96xf32>
    %c9_389 = arith.constant 9 : index
    %c0_390 = arith.constant 0 : index
    %c0_391 = arith.constant 0 : index
    %314 = vector.load %arg4[%c9_389, %c0_390, %c0_391] : memref<10x96x24xf32, #tpu.memory_space<vmem>>, vector<1x96x24xf32>
    %315 = vector.shape_cast %314 : vector<1x96x24xf32> to vector<96x24xf32>
    %cst_392 = arith.constant dense<0.000000e+00> : vector<4x24xf32>
    %316 = tpu.matmul %313, %315, %cst_392 {dimension_numbers = #tpu.dot_dimension_numbers<[1], [0], [0], [1], [0, 0, 1, 1], [], []>} : vector<4x96xf32>, vector<96x24xf32>, vector<4x24xf32> -> vector<4x24xf32>
    %317 = arith.addf %311, %316 : vector<4x24xf32>
    %318 = arith.maximumf %288, %317 : vector<4x24xf32>
    %c1_393 = arith.constant 1 : index
    %c0_394 = arith.constant 0 : index
    %c0_395 = arith.constant 0 : index
    %319 = vector.load %arg13[%c1_393, %c0_394, %c0_395] : memref<2x6x96xf32, #tpu.memory_space<vmem>>, vector<1x4x96xf32>
    %320 = vector.shape_cast %319 : vector<1x4x96xf32> to vector<4x96xf32>
    %c0_396 = arith.constant 0 : index
    %c0_397 = arith.constant 0 : index
    %c0_398 = arith.constant 0 : index
    %321 = vector.load %arg4[%c0_396, %c0_397, %c0_398] : memref<10x96x24xf32, #tpu.memory_space<vmem>>, vector<1x96x24xf32>
    %322 = vector.shape_cast %321 : vector<1x96x24xf32> to vector<96x24xf32>
    %cst_399 = arith.constant dense<0.000000e+00> : vector<4x24xf32>
    %323 = tpu.matmul %320, %322, %cst_399 {dimension_numbers = #tpu.dot_dimension_numbers<[1], [0], [0], [1], [0, 0, 1, 1], [], []>} : vector<4x96xf32>, vector<96x24xf32>, vector<4x24xf32> -> vector<4x24xf32>
    %c0_400 = arith.constant 0 : index
    %c1_401 = arith.constant 1 : index
    %c0_402 = arith.constant 0 : index
    %324 = vector.load %arg13[%c0_400, %c1_401, %c0_402] : memref<2x6x96xf32, #tpu.memory_space<vmem>>, vector<1x4x96xf32>
    %325 = vector.shape_cast %324 : vector<1x4x96xf32> to vector<4x96xf32>
    %c1_403 = arith.constant 1 : index
    %c0_404 = arith.constant 0 : index
    %c0_405 = arith.constant 0 : index
    %326 = vector.load %arg4[%c1_403, %c0_404, %c0_405] : memref<10x96x24xf32, #tpu.memory_space<vmem>>, vector<1x96x24xf32>
    %327 = vector.shape_cast %326 : vector<1x96x24xf32> to vector<96x24xf32>
    %cst_406 = arith.constant dense<0.000000e+00> : vector<4x24xf32>
    %328 = tpu.matmul %325, %327, %cst_406 {dimension_numbers = #tpu.dot_dimension_numbers<[1], [0], [0], [1], [0, 0, 1, 1], [], []>} : vector<4x96xf32>, vector<96x24xf32>, vector<4x24xf32> -> vector<4x24xf32>
    %329 = arith.addf %323, %328 : vector<4x24xf32>
    %c1_407 = arith.constant 1 : index
    %c1_408 = arith.constant 1 : index
    %c0_409 = arith.constant 0 : index
    %330 = vector.load %arg13[%c1_407, %c1_408, %c0_409] : memref<2x6x96xf32, #tpu.memory_space<vmem>>, vector<1x4x96xf32>
    %331 = vector.shape_cast %330 : vector<1x4x96xf32> to vector<4x96xf32>
    %c2_410 = arith.constant 2 : index
    %c0_411 = arith.constant 0 : index
    %c0_412 = arith.constant 0 : index
    %332 = vector.load %arg4[%c2_410, %c0_411, %c0_412] : memref<10x96x24xf32, #tpu.memory_space<vmem>>, vector<1x96x24xf32>
    %333 = vector.shape_cast %332 : vector<1x96x24xf32> to vector<96x24xf32>
    %cst_413 = arith.constant dense<0.000000e+00> : vector<4x24xf32>
    %334 = tpu.matmul %331, %333, %cst_413 {dimension_numbers = #tpu.dot_dimension_numbers<[1], [0], [0], [1], [0, 0, 1, 1], [], []>} : vector<4x96xf32>, vector<96x24xf32>, vector<4x24xf32> -> vector<4x24xf32>
    %335 = arith.addf %329, %334 : vector<4x24xf32>
    %c0_414 = arith.constant 0 : index
    %c2_415 = arith.constant 2 : index
    %c0_416 = arith.constant 0 : index
    %336 = vector.load %arg13[%c0_414, %c2_415, %c0_416] : memref<2x6x96xf32, #tpu.memory_space<vmem>>, vector<1x4x96xf32>
    %337 = vector.shape_cast %336 : vector<1x4x96xf32> to vector<4x96xf32>
    %c3_417 = arith.constant 3 : index
    %c0_418 = arith.constant 0 : index
    %c0_419 = arith.constant 0 : index
    %338 = vector.load %arg4[%c3_417, %c0_418, %c0_419] : memref<10x96x24xf32, #tpu.memory_space<vmem>>, vector<1x96x24xf32>
    %339 = vector.shape_cast %338 : vector<1x96x24xf32> to vector<96x24xf32>
    %cst_420 = arith.constant dense<0.000000e+00> : vector<4x24xf32>
    %340 = tpu.matmul %337, %339, %cst_420 {dimension_numbers = #tpu.dot_dimension_numbers<[1], [0], [0], [1], [0, 0, 1, 1], [], []>} : vector<4x96xf32>, vector<96x24xf32>, vector<4x24xf32> -> vector<4x24xf32>
    %341 = arith.addf %335, %340 : vector<4x24xf32>
    %c1_421 = arith.constant 1 : index
    %c2_422 = arith.constant 2 : index
    %c0_423 = arith.constant 0 : index
    %342 = vector.load %arg13[%c1_421, %c2_422, %c0_423] : memref<2x6x96xf32, #tpu.memory_space<vmem>>, vector<1x4x96xf32>
    %343 = vector.shape_cast %342 : vector<1x4x96xf32> to vector<4x96xf32>
    %c4_424 = arith.constant 4 : index
    %c0_425 = arith.constant 0 : index
    %c0_426 = arith.constant 0 : index
    %344 = vector.load %arg4[%c4_424, %c0_425, %c0_426] : memref<10x96x24xf32, #tpu.memory_space<vmem>>, vector<1x96x24xf32>
    %345 = vector.shape_cast %344 : vector<1x96x24xf32> to vector<96x24xf32>
    %cst_427 = arith.constant dense<0.000000e+00> : vector<4x24xf32>
    %346 = tpu.matmul %343, %345, %cst_427 {dimension_numbers = #tpu.dot_dimension_numbers<[1], [0], [0], [1], [0, 0, 1, 1], [], []>} : vector<4x96xf32>, vector<96x24xf32>, vector<4x24xf32> -> vector<4x24xf32>
    %347 = arith.addf %341, %346 : vector<4x24xf32>
    %348 = arith.maximumf %318, %347 : vector<4x24xf32>
    %c1_428 = arith.constant 1 : index
    %c0_429 = arith.constant 0 : index
    %c0_430 = arith.constant 0 : index
    %349 = vector.load %arg13[%c1_428, %c0_429, %c0_430] : memref<2x6x96xf32, #tpu.memory_space<vmem>>, vector<1x4x96xf32>
    %350 = vector.shape_cast %349 : vector<1x4x96xf32> to vector<4x96xf32>
    %c5_431 = arith.constant 5 : index
    %c0_432 = arith.constant 0 : index
    %c0_433 = arith.constant 0 : index
    %351 = vector.load %arg4[%c5_431, %c0_432, %c0_433] : memref<10x96x24xf32, #tpu.memory_space<vmem>>, vector<1x96x24xf32>
    %352 = vector.shape_cast %351 : vector<1x96x24xf32> to vector<96x24xf32>
    %cst_434 = arith.constant dense<0.000000e+00> : vector<4x24xf32>
    %353 = tpu.matmul %350, %352, %cst_434 {dimension_numbers = #tpu.dot_dimension_numbers<[1], [0], [0], [1], [0, 0, 1, 1], [], []>} : vector<4x96xf32>, vector<96x24xf32>, vector<4x24xf32> -> vector<4x24xf32>
    %c0_435 = arith.constant 0 : index
    %c1_436 = arith.constant 1 : index
    %c0_437 = arith.constant 0 : index
    %354 = vector.load %arg13[%c0_435, %c1_436, %c0_437] : memref<2x6x96xf32, #tpu.memory_space<vmem>>, vector<1x4x96xf32>
    %355 = vector.shape_cast %354 : vector<1x4x96xf32> to vector<4x96xf32>
    %c6_438 = arith.constant 6 : index
    %c0_439 = arith.constant 0 : index
    %c0_440 = arith.constant 0 : index
    %356 = vector.load %arg4[%c6_438, %c0_439, %c0_440] : memref<10x96x24xf32, #tpu.memory_space<vmem>>, vector<1x96x24xf32>
    %357 = vector.shape_cast %356 : vector<1x96x24xf32> to vector<96x24xf32>
    %cst_441 = arith.constant dense<0.000000e+00> : vector<4x24xf32>
    %358 = tpu.matmul %355, %357, %cst_441 {dimension_numbers = #tpu.dot_dimension_numbers<[1], [0], [0], [1], [0, 0, 1, 1], [], []>} : vector<4x96xf32>, vector<96x24xf32>, vector<4x24xf32> -> vector<4x24xf32>
    %359 = arith.addf %353, %358 : vector<4x24xf32>
    %c1_442 = arith.constant 1 : index
    %c1_443 = arith.constant 1 : index
    %c0_444 = arith.constant 0 : index
    %360 = vector.load %arg13[%c1_442, %c1_443, %c0_444] : memref<2x6x96xf32, #tpu.memory_space<vmem>>, vector<1x4x96xf32>
    %361 = vector.shape_cast %360 : vector<1x4x96xf32> to vector<4x96xf32>
    %c7_445 = arith.constant 7 : index
    %c0_446 = arith.constant 0 : index
    %c0_447 = arith.constant 0 : index
    %362 = vector.load %arg4[%c7_445, %c0_446, %c0_447] : memref<10x96x24xf32, #tpu.memory_space<vmem>>, vector<1x96x24xf32>
    %363 = vector.shape_cast %362 : vector<1x96x24xf32> to vector<96x24xf32>
    %cst_448 = arith.constant dense<0.000000e+00> : vector<4x24xf32>
    %364 = tpu.matmul %361, %363, %cst_448 {dimension_numbers = #tpu.dot_dimension_numbers<[1], [0], [0], [1], [0, 0, 1, 1], [], []>} : vector<4x96xf32>, vector<96x24xf32>, vector<4x24xf32> -> vector<4x24xf32>
    %365 = arith.addf %359, %364 : vector<4x24xf32>
    %c0_449 = arith.constant 0 : index
    %c2_450 = arith.constant 2 : index
    %c0_451 = arith.constant 0 : index
    %366 = vector.load %arg13[%c0_449, %c2_450, %c0_451] : memref<2x6x96xf32, #tpu.memory_space<vmem>>, vector<1x4x96xf32>
    %367 = vector.shape_cast %366 : vector<1x4x96xf32> to vector<4x96xf32>
    %c8_452 = arith.constant 8 : index
    %c0_453 = arith.constant 0 : index
    %c0_454 = arith.constant 0 : index
    %368 = vector.load %arg4[%c8_452, %c0_453, %c0_454] : memref<10x96x24xf32, #tpu.memory_space<vmem>>, vector<1x96x24xf32>
    %369 = vector.shape_cast %368 : vector<1x96x24xf32> to vector<96x24xf32>
    %cst_455 = arith.constant dense<0.000000e+00> : vector<4x24xf32>
    %370 = tpu.matmul %367, %369, %cst_455 {dimension_numbers = #tpu.dot_dimension_numbers<[1], [0], [0], [1], [0, 0, 1, 1], [], []>} : vector<4x96xf32>, vector<96x24xf32>, vector<4x24xf32> -> vector<4x24xf32>
    %371 = arith.addf %365, %370 : vector<4x24xf32>
    %c1_456 = arith.constant 1 : index
    %c2_457 = arith.constant 2 : index
    %c0_458 = arith.constant 0 : index
    %372 = vector.load %arg13[%c1_456, %c2_457, %c0_458] : memref<2x6x96xf32, #tpu.memory_space<vmem>>, vector<1x4x96xf32>
    %373 = vector.shape_cast %372 : vector<1x4x96xf32> to vector<4x96xf32>
    %c9_459 = arith.constant 9 : index
    %c0_460 = arith.constant 0 : index
    %c0_461 = arith.constant 0 : index
    %374 = vector.load %arg4[%c9_459, %c0_460, %c0_461] : memref<10x96x24xf32, #tpu.memory_space<vmem>>, vector<1x96x24xf32>
    %375 = vector.shape_cast %374 : vector<1x96x24xf32> to vector<96x24xf32>
    %cst_462 = arith.constant dense<0.000000e+00> : vector<4x24xf32>
    %376 = tpu.matmul %373, %375, %cst_462 {dimension_numbers = #tpu.dot_dimension_numbers<[1], [0], [0], [1], [0, 0, 1, 1], [], []>} : vector<4x96xf32>, vector<96x24xf32>, vector<4x24xf32> -> vector<4x24xf32>
    %377 = arith.addf %371, %376 : vector<4x24xf32>
    %378 = arith.maximumf %348, %377 : vector<4x24xf32>
    %c0_463 = arith.constant 0 : index
    %c0_464 = arith.constant 0 : index
    %379 = vector.load %arg5[%c0_463, %c0_464] : memref<1x24xf32, #tpu.memory_space<vmem>>, vector<1x24xf32>
    %380 = vector.broadcast %379 : vector<1x24xf32> to vector<4x24xf32>
    %381 = arith.addf %378, %380 : vector<4x24xf32>
    %cst_465 = arith.constant 0.000000e+00 : f32
    %382 = vector.broadcast %cst_465 : f32 to vector<4x24xf32>
    %383 = arith.cmpf ogt, %381, %382 : vector<4x24xf32>
    %cst_466 = arith.constant 0.00999999977 : f32
    %384 = vector.broadcast %cst_466 : f32 to vector<4x24xf32>
    %385 = arith.mulf %384, %381 : vector<4x24xf32>
    %386 = arith.select %383, %381, %385 : vector<4x24xi1>, vector<4x24xf32>
    %c0_467 = arith.constant 0 : index
    %c0_468 = arith.constant 0 : index
    %387 = vector.load %arg14[%c0_467, %c0_468] : memref<4x24xf32, #tpu.memory_space<vmem>>, vector<4x24xf32>
    tpu.vector_store %arg14[%c0_467, %c0_468], %386 {strides = array<i32>} : memref<4x24xf32, #tpu.memory_space<vmem>>, vector<4x24xf32>,
    %c0_469 = arith.constant 0 : index
    %c0_470 = arith.constant 0 : index
    %388 = vector.load %arg14[%c0_469, %c0_470] : memref<4x24xf32, #tpu.memory_space<vmem>>, vector<3x24xf32>
    %c0_471 = arith.constant 0 : index
    %c0_472 = arith.constant 0 : index
    %c0_473 = arith.constant 0 : index
    %389 = vector.load %arg6[%c0_471, %c0_472, %c0_473] : memref<2x24x12xf32, #tpu.memory_space<vmem>>, vector<1x24x12xf32>
    %390 = vector.shape_cast %389 : vector<1x24x12xf32> to vector<24x12xf32>
    %cst_474 = arith.constant dense<0.000000e+00> : vector<3x12xf32>
    %391 = tpu.matmul %388, %390, %cst_474 {dimension_numbers = #tpu.dot_dimension_numbers<[1], [0], [0], [1], [0, 0, 1, 1], [], []>} : vector<3x24xf32>, vector<24x12xf32>, vector<3x12xf32> -> vector<3x12xf32>
    %c1_475 = arith.constant 1 : index
    %c0_476 = arith.constant 0 : index
    %392 = vector.load %arg14[%c1_475, %c0_476] : memref<4x24xf32, #tpu.memory_space<vmem>>, vector<3x24xf32>
    %c1_477 = arith.constant 1 : index
    %c0_478 = arith.constant 0 : index
    %c0_479 = arith.constant 0 : index
    %393 = vector.load %arg6[%c1_477, %c0_478, %c0_479] : memref<2x24x12xf32, #tpu.memory_space<vmem>>, vector<1x24x12xf32>
    %394 = vector.shape_cast %393 : vector<1x24x12xf32> to vector<24x12xf32>
    %cst_480 = arith.constant dense<0.000000e+00> : vector<3x12xf32>
    %395 = tpu.matmul %392, %394, %cst_480 {dimension_numbers = #tpu.dot_dimension_numbers<[1], [0], [0], [1], [0, 0, 1, 1], [], []>} : vector<3x24xf32>, vector<24x12xf32>, vector<3x12xf32> -> vector<3x12xf32>
    %396 = arith.addf %391, %395 : vector<3x12xf32>
    %c0_481 = arith.constant 0 : index
    %c0_482 = arith.constant 0 : index
    %397 = vector.load %arg7[%c0_481, %c0_482] : memref<1x12xf32, #tpu.memory_space<vmem>>, vector<1x12xf32>
    %398 = vector.broadcast %397 : vector<1x12xf32> to vector<3x12xf32>
    %399 = arith.addf %396, %398 : vector<3x12xf32>
    %cst_483 = arith.constant 0.000000e+00 : f32
    %400 = vector.broadcast %cst_483 : f32 to vector<3x12xf32>
    %401 = arith.cmpf ogt, %399, %400 : vector<3x12xf32>
    %cst_484 = arith.constant 0.00999999977 : f32
    %402 = vector.broadcast %cst_484 : f32 to vector<3x12xf32>
    %403 = arith.mulf %402, %399 : vector<3x12xf32>
    %404 = arith.select %401, %399, %403 : vector<3x12xi1>, vector<3x12xf32>
    %405 = vector.extract_strided_slice %404 {offsets = [0, 0], sizes = [1, 12], strides = [1, 1]} : vector<3x12xf32> to vector<1x12xf32>
    %c0_485 = arith.constant 0 : index
    %c0_486 = arith.constant 0 : index
    %c0_487 = arith.constant 0 : index
    %406 = vector.load %arg8[%c0_485, %c0_486, %c0_487] : memref<3x12x20xf32, #tpu.memory_space<vmem>>, vector<1x12x20xf32>
    %407 = vector.shape_cast %406 : vector<1x12x20xf32> to vector<12x20xf32>
    %cst_488 = arith.constant dense<0.000000e+00> : vector<1x20xf32>
    %408 = tpu.matmul %405, %407, %cst_488 {dimension_numbers = #tpu.dot_dimension_numbers<[1], [0], [0], [1], [0, 0, 1, 1], [], []>} : vector<1x12xf32>, vector<12x20xf32>, vector<1x20xf32> -> vector<1x20xf32>
    %409 = vector.extract_strided_slice %404 {offsets = [1, 0], sizes = [1, 12], strides = [1, 1]} : vector<3x12xf32> to vector<1x12xf32>
    %c1_489 = arith.constant 1 : index
    %c0_490 = arith.constant 0 : index
    %c0_491 = arith.constant 0 : index
    %410 = vector.load %arg8[%c1_489, %c0_490, %c0_491] : memref<3x12x20xf32, #tpu.memory_space<vmem>>, vector<1x12x20xf32>
    %411 = vector.shape_cast %410 : vector<1x12x20xf32> to vector<12x20xf32>
    %cst_492 = arith.constant dense<0.000000e+00> : vector<1x20xf32>
    %412 = tpu.matmul %409, %411, %cst_492 {dimension_numbers = #tpu.dot_dimension_numbers<[1], [0], [0], [1], [0, 0, 1, 1], [], []>} : vector<1x12xf32>, vector<12x20xf32>, vector<1x20xf32> -> vector<1x20xf32>
    %413 = arith.addf %408, %412 : vector<1x20xf32>
    %414 = vector.extract_strided_slice %404 {offsets = [2, 0], sizes = [1, 12], strides = [1, 1]} : vector<3x12xf32> to vector<1x12xf32>
    %c2_493 = arith.constant 2 : index
    %c0_494 = arith.constant 0 : index
    %c0_495 = arith.constant 0 : index
    %415 = vector.load %arg8[%c2_493, %c0_494, %c0_495] : memref<3x12x20xf32, #tpu.memory_space<vmem>>, vector<1x12x20xf32>
    %416 = vector.shape_cast %415 : vector<1x12x20xf32> to vector<12x20xf32>
    %cst_496 = arith.constant dense<0.000000e+00> : vector<1x20xf32>
    %417 = tpu.matmul %414, %416, %cst_496 {dimension_numbers = #tpu.dot_dimension_numbers<[1], [0], [0], [1], [0, 0, 1, 1], [], []>} : vector<1x12xf32>, vector<12x20xf32>, vector<1x20xf32> -> vector<1x20xf32>
    %418 = arith.addf %413, %417 : vector<1x20xf32>
    %c0_497 = arith.constant 0 : index
    %c0_498 = arith.constant 0 : index
    %419 = vector.load %arg9[%c0_497, %c0_498] : memref<1x20xf32, #tpu.memory_space<vmem>>, vector<1x20xf32>
    %420 = arith.addf %418, %419 : vector<1x20xf32>
    %cst_499 = arith.constant 0.000000e+00 : f32
    %421 = vector.broadcast %cst_499 : f32 to vector<1x20xf32>
    %422 = arith.cmpf ogt, %420, %421 : vector<1x20xf32>
    %cst_500 = arith.constant 0.00999999977 : f32
    %423 = vector.broadcast %cst_500 : f32 to vector<1x20xf32>
    %424 = arith.mulf %423, %420 : vector<1x20xf32>
    %425 = arith.select %422, %420, %424 : vector<1x20xi1>, vector<1x20xf32>
    %c0_501 = arith.constant 0 : index
    %c0_502 = arith.constant 0 : index
    %426 = vector.load %arg10[%c0_501, %c0_502] : memref<20x10xf32, #tpu.memory_space<vmem>>, vector<20x10xf32>
    %cst_503 = arith.constant dense<0.000000e+00> : vector<1x10xf32>
    %427 = tpu.matmul %425, %426, %cst_503 {dimension_numbers = #tpu.dot_dimension_numbers<[1], [0], [0], [1], [0, 0, 1, 1], [], []>} : vector<1x20xf32>, vector<20x10xf32>, vector<1x10xf32> -> vector<1x10xf32>
    %c0_504 = arith.constant 0 : index
    %c0_505 = arith.constant 0 : index
    %428 = vector.load %arg11[%c0_504, %c0_505] : memref<1x10xf32, #tpu.memory_space<vmem>>, vector<1x10xf32>
    %429 = arith.addf %427, %428 : vector<1x10xf32>
    %c0_506 = arith.constant 0 : index
    %c0_507 = arith.constant 0 : index
    %c0_508 = arith.constant 0 : index
    %430 = vector.load %arg12[%c0_506, %c0_507, %c0_508] : memref<1x1x10xf32, #tpu.memory_space<vmem>>, vector<1x1x10xf32>
    %431 = vector.shape_cast %430 : vector<1x1x10xf32> to vector<1x10xf32>
    %432 = vector.shape_cast %429 : vector<1x10xf32> to vector<1x1x10xf32>
    tpu.vector_store %arg12[%c0_506, %c0_507, %c0_508], %432 {strides = array<i32>} : memref<1x1x10xf32, #tpu.memory_space<vmem>>, vector<1x1x10xf32>,
    return
  }
  func.func @transform_0(%arg0: i32) -> (i32, i32, i32, i32) {
    %c0_i32 = arith.constant 0 : i32
    %c0_i32_0 = arith.constant 0 : i32
    %c0_i32_1 = arith.constant 0 : i32
    %c0_i32_2 = arith.constant 0 : i32
    return %arg0, %c0_i32, %c0_i32_0, %c0_i32_1 : i32, i32, i32, i32
  }
  func.func @transform_1(%arg0: i32) -> (i32, i32, i32) {
    %c0_i32 = arith.constant 0 : i32
    %c0_i32_0 = arith.constant 0 : i32
    %c0_i32_1 = arith.constant 0 : i32
    %c0_i32_2 = arith.constant 0 : i32
    return %c0_i32, %c0_i32_0, %c0_i32_1 : i32, i32, i32
  }
  func.func @transform_2(%arg0: i32) -> (i32, i32) {
    %c0_i32 = arith.constant 0 : i32
    %c0_i32_0 = arith.constant 0 : i32
    %c0_i32_1 = arith.constant 0 : i32
    return %c0_i32, %c0_i32_0 : i32, i32
  }
  func.func @transform_3(%arg0: i32) -> (i32, i32, i32) {
    %c0_i32 = arith.constant 0 : i32
    %c0_i32_0 = arith.constant 0 : i32
    %c0_i32_1 = arith.constant 0 : i32
    %c0_i32_2 = arith.constant 0 : i32
    return %c0_i32, %c0_i32_0, %c0_i32_1 : i32, i32, i32
  }
  func.func @transform_4(%arg0: i32) -> (i32, i32) {
    %c0_i32 = arith.constant 0 : i32
    %c0_i32_0 = arith.constant 0 : i32
    %c0_i32_1 = arith.constant 0 : i32
    return %c0_i32, %c0_i32_0 : i32, i32
  }
  func.func @transform_5(%arg0: i32) -> (i32, i32, i32) {
    %c0_i32 = arith.constant 0 : i32
    %c0_i32_0 = arith.constant 0 : i32
    %c0_i32_1 = arith.constant 0 : i32
    %c0_i32_2 = arith.constant 0 : i32
    return %c0_i32, %c0_i32_0, %c0_i32_1 : i32, i32, i32
  }
  func.func @transform_6(%arg0: i32) -> (i32, i32) {
    %c0_i32 = arith.constant 0 : i32
    %c0_i32_0 = arith.constant 0 : i32
    %c0_i32_1 = arith.constant 0 : i32
    return %c0_i32, %c0_i32_0 : i32, i32
  }
  func.func @transform_7(%arg0: i32) -> (i32, i32, i32) {
    %c0_i32 = arith.constant 0 : i32
    %c0_i32_0 = arith.constant 0 : i32
    %c0_i32_1 = arith.constant 0 : i32
    %c0_i32_2 = arith.constant 0 : i32
    return %c0_i32, %c0_i32_0, %c0_i32_1 : i32, i32, i32
  }
  func.func @transform_8(%arg0: i32) -> (i32, i32) {
    %c0_i32 = arith.constant 0 : i32
    %c0_i32_0 = arith.constant 0 : i32
    %c0_i32_1 = arith.constant 0 : i32
    return %c0_i32, %c0_i32_0 : i32, i32
  }
  func.func @transform_9(%arg0: i32) -> (i32, i32) {
    %c0_i32 = arith.constant 0 : i32
    %c0_i32_0 = arith.constant 0 : i32
    %c0_i32_1 = arith.constant 0 : i32
    return %c0_i32, %c0_i32_0 : i32, i32
  }
  func.func @transform_10(%arg0: i32) -> (i32, i32) {
    %c0_i32 = arith.constant 0 : i32
    %c0_i32_0 = arith.constant 0 : i32
    %c0_i32_1 = arith.constant 0 : i32
    return %c0_i32, %c0_i32_0 : i32, i32
  }
  func.func @transform_11(%arg0: i32) -> (i32, i32, i32) {
    %c0_i32 = arith.constant 0 : i32
    %c0_i32_0 = arith.constant 0 : i32
    %c0_i32_1 = arith.constant 0 : i32
    return %arg0, %c0_i32, %c0_i32_0 : i32, i32, i32
  }
}

</mosaic_0001>

<bundles_post_ra>
// kernel: cnn_forward.1
= control target key start
LH: loop header
LB: loop body
LE: loop exit
PB: predicated region body
PF: predicated region fallthrough
CT: control target
= control target key end

     0   :  { %s9747_s0 = inlined_call_operand.vmem [shape: f32[2,4,7,28], index: 0, kind: input, shape index: {}]   ;;  %s9748_s1 = inlined_call_operand.vmem [shape: f32[10,28,96], index: 1, kind: input, shape index: {}]   ;;  %s9749_s2 = inlined_call_operand.vmem [shape: f32[1,96], index: 2, kind: input, shape index: {}]   ;;  %s9750_s3 = inlined_call_operand.vmem [shape: f32[10,96,24], index: 3, kind: input, shape index: {}]   ;;  %s9751_s4 = inlined_call_operand.vmem [shape: f32[1,24], index: 4, kind: input, shape index: {}]   ;;  %s9752_s5 = inlined_call_operand.vmem [shape: f32[2,24,12], index: 5, kind: input, shape index: {}]   ;;  %s9753_s6 = inlined_call_operand.vmem [shape: f32[1,12], index: 6, kind: input, shape index: {}]   ;;  %s9754_s7 = inlined_call_operand.vmem [shape: f32[3,12,20], index: 7, kind: input, shape index: {}]   ;;  %s9755_s8 = inlined_call_operand.vmem [shape: f32[1,20], index: 8, kind: input, shape index: {}]   ;;  %s9756_s9 = inlined_call_operand.vmem [shape: f32[20,10], index: 9, kind: input, shape index: {}]   ;;  %s9757_s10 = inlined_call_operand.vmem [shape: f32[1,10], index: 10, kind: input, shape index: {}]   ;;  %s9758_s11 = inlined_call_operand.hbm [shape: f32[2,1,10], index: 11, kind: output, shape index: {}]  }
   0x1   :  { %9815 = sst [smem:[#allocation61_spill]] %s9747_s0 }
   0x2   :  { %16 = vsyncpa [#allocation5], 0 }
   0x3   :  { %18 = vsyncpa [#allocation5 + $0x1], 0  ;;  %s7580_s17 = smov 0   ;;  %s7582_s18 = smov 0  }
   0x4   :  { %s7584_s19 = smov 0   ;;  %s7586_s20 = smov 0  }
   0x5 LB: > { %s7601_s21 = sadd.s32 4294967295, %s7515_s20   ;;  %s5585_s22 = sadd.s32 4294967294, %s7515_s20   ;;  %s7515_s20 = sphi %s7586_s20, %s9931_s20   ;;  %s7511_s19 = sphi %s7584_s19, %s9930_s19   ;;  %s7507_s18 = sphi %s7582_s18, %s9929_s18   ;;  %s7503_s17 = sphi %s7580_s17, %s9928_s17  }
   0x6   : > { %s7605_s23 = sadd.s32 1, %s7515_s20   ;;  %s267_s24 = sadd.s32 1, %s7511_s19 }
   0x7   : > { %s264_s25 = ssub.s32 %s7515_s20, %s7605_s23  ;;  %p277_p0 = scmp.ne.s32.totalorder %s7511_s19, %s7507_s18 }
   0x8   : > { %p265_p1 = scmp.eq.s32.totalorder %s264_s25, 0  ;;  %p278_p2 = scmp.eq.s32.totalorder %s7601_s21, 1 }
   0x9   : > { %p283_p3 = scmp.ne.s32.totalorder %s7507_s18, %s7503_s17  ;;  %p284_p4 = scmp.eq.s32.totalorder %s5585_s22, 1 }
   0xa   : > { %s7616_s26 = scalar_select %p265_p1, %s7511_s19, %s267_s24  }
   0xb   : > { %p7618_p5 = por %p278_p2, %p277_p0  ;;  %p7622_p6 = por %p284_p4, %p283_p3 }
   0xc   : > { %p5588_p7 = scmp.ge.s32.totalorder %s7515_s20, 1  ;;  %p340_p8 = scmp.lt.s32.totalorder %s7515_s20, 3 }
   0xe   : > { %p341_p9 = pnand %p5588_p7, %p340_p8 }
  0x10   : > { %344 = sbr.rel (%p341_p9) target bundleno = 1492 (0x5d4), region = 64 }
  0x15   : > { %v7631_v0 = vld [vmem:[%s9748_s1 + $0x38] sm:$0xf]  ;;  %vm400_vm0 = vcmask 1043456   ;;  %v9759_v2 = vmov 0.0   ;;  %v7643_v3 = vld [vmem:[%s9748_s1 + $0x30] sm:$0xff]  ;;  %p379_p10 = scmp.lt.s32.totalorder %s7601_s21, 1 }
  0x16   : > { %v7636_v1 = vld [vmem:[%s9748_s1 + $0x18] sm:$0xf]  ;;  %6386 = vmatprep.subr.mxu0 %v9759_v2  ;;  %6397 = vmatprep.subr.mxu1 %v9759_v2  ;;  %v7648_v4 = vld [vmem:[%s9748_s1 + $0x10] sm:$0xff]  ;;  %v7660_v5 = vld [vmem:[%s9748_s1 + $0x28] sm:$0xff]  ;;  %s9818_s0 = sld [smem:[#allocation61_spill]]  ;;  %vm396_vm1 = vcmask 228352  }
  0x17   : > { %6387 = vmatpush3.msk.msra.mxu0 %vm400_vm0, %v7631_v0  ;;  %6398 = vmatpush3.msk.msra.mxu1 %vm400_vm0, %v7636_v1  ;;  %v7665_v6 = vld [vmem:[%s9748_s1 + $0x8] sm:$0xff]  ;;  %s380_s12 = scalar_select %p379_p10, %s7601_s21, 1  ;;  %v7675_v7 = vld [vmem:[%s9748_s1 + $0x20] sm:$0xff]  ;;  %vm7518_vm2 = vmmov 0   ;;  %v7706_v11 = vld [vmem:[%s9748_s1 + $0x58] sm:$0xf] }
  0x18   : > { %6388 = vmatprep.subr.mxu0 %v9759_v2  ;;  %6399 = vmatprep.subr.mxu1 %v9759_v2  ;;  %v7682_v8 = vld [vmem:[%s9748_s1] sm:$0xff]  ;;  %v7711_v12 = vld [vmem:[%s9748_s1 + $0x78] sm:$0xf]  ;;  %v7722_v13 = vld [vmem:[%s9748_s1 + $0x50] sm:$0xff]  ;;  %vm1918_vm4 = vcmask 783360   ;;  %vm3469_vm5 = vcmask 785408  }
  0x19   : > { %6389 = vmatpush3.msra.mxu0 %v7643_v3  ;;  %6400 = vmatpush3.msra.mxu1 %v7648_v4  ;;  %s5904_s15 = sshll.u32 %s380_s12, 5  ;;  %v7727_v14 = vld [vmem:[%s9748_s1 + $0x70] sm:$0xff]  ;;  %v7738_v15 = vld [vmem:[%s9748_s1 + $0x48] sm:$0xff]  ;;  %v7752_v17 = vld [vmem:[%s9748_s1 + $0x40] sm:$0xff]  ;;  %vm5022_vm8 = vcmask 191488   ;;  %vm5033_vm9 = vcmask 195584  }
  0x1a   : > { %6390 = vmatprep.subr.mxu0 %v9759_v2  ;;  %6401 = vmatprep.subr.mxu1 %v9759_v2  ;;  %v7743_v16 = vld [vmem:[%s9748_s1 + $0x68] sm:$0xff]  ;;  %v7759_v18 = vld [vmem:[%s9748_s1 + $0x60] sm:$0xff]  ;;  %v7778_v21 = vld [vmem:[%s9748_s1 + $0x98] sm:$0xf]  ;;  %vm5198_vm11 = vcmask 97280   ;;  %vm5438_vm13 = vcmask 162816  }
  0x1b   : > { %6391 = vmatpush3.msra.mxu0 %v7660_v5  ;;  %6402 = vmatpush3.msra.mxu1 %v7665_v6  ;;  %v7783_v22 = vld [vmem:[%s9748_s1 + $0xd8] sm:$0xf]  ;;  %v7794_v23 = vld [vmem:[%s9748_s1 + $0x90] sm:$0xff]  ;;  %v7810_v25 = vld [vmem:[%s9748_s1 + $0x88] sm:$0xff]  ;;  %s377_s12 = sand.u32 1, %s7507_s18   ;;  %s5901_s14 = sshll.u32 %s7601_s21, 4 }
  0x1c   : > { %s7687_s29 = scalar_lea.vmem %s9818_s0, %s5904_s15  ;;  %6392 = vmatprep.subr.mxu0 %v9759_v2  ;;  %6403 = vmatprep.subr.mxu1 %v9759_v2  ;;  %v7799_v24 = vld [vmem:[%s9748_s1 + $0xd0] sm:$0xff]  ;;  %v7815_v26 = vld [vmem:[%s9748_s1 + $0xc8] sm:$0xff]  ;;  %v7824_v27 = vld [vmem:[%s9748_s1 + $0x80] sm:$0xff]  ;;  %s378_s15 = scalar_lea.vmem [#allocation4], %s377_s12  ;;  %vm5515_vm14 = vcmask 73728  }
  0x1d   : > { %v7692_v9 = vld [vmem:[%s7687_s29 + $0x8] sm:$0x3f]  ;;  %6393 = vmatpush3.msra.mxu0 %v7675_v7  ;;  %6394 = vmatprep.mubr.msk.f32.mxu0 %vm7518_vm2, %v9759_v2  ;;  %v7698_v10 = vld [vmem:[%s7687_s29] sm:$0x3f]  ;;  %v7762_v19 = vld [vmem:[%s7687_s29 + $0x10] sm:$0x3f]  ;;  %s9712_s25 = scalar_lea.hbm %s9758_s11, %s5901_s14 }
  0x1e   : > { %6404 = vmatpush3.msra.mxu1 %v7682_v8  ;;  %6395 = vmatmul.mubr.msk.f32.vlgmr.msra.gmra.mxu0 %vm396_vm1, %v7692_v9  ;;  %v7770_v20 = vld [vmem:[%s7687_s29 + $0x18] sm:$0x3f]  ;;  %v7831_v28 = vld [vmem:[%s9748_s1 + $0xc0] sm:$0xff]  ;;  %v7863_v32 = vld [vmem:[%s9748_s1 + $0xb0] sm:$0xff]  ;;  %s5530_s16 = sshll.u32 %s378_s15, 4  ;;  %s5518_s30 = scalar_lea.sflag [#allocation5], %s377_s12  ;;  %s5531_s16 = int_to_ptr.vmem [resolvable:$true] %s5530_s16 }
  0x1f   : > { %6405 = vmatprep.mubr.msk.f32.mxu1 %vm7518_vm2, %v9759_v2  ;;  %6408 = vmatprep.subr.mxu0 %v9759_v2  ;;  %v7834_v29 = vld [vmem:[%s7687_s29 + $0x1] sm:$0x3f]  ;;  %v7847_v30 = vld [vmem:[%s9748_s1 + $0xb8] sm:$0xf]  ;;  %v7868_v33 = vld [vmem:[%s9748_s1 + $0xf0] sm:$0xff]  ;;  %s7455_s0 = scalar_lea.vmem %s5531_s16, 16 }
  0x20   : > { %6419 = vmatprep.subr.mxu1 %v9759_v2  ;;  %6406 = vmatmul.mubr.msk.f32.vlgmr.msra.gmra.mxu1 %vm396_vm1, %v7698_v10  ;;  %v7852_v31 = vld [vmem:[%s9748_s1 + $0xf8] sm:$0xf]  ;;  %v7879_v34 = vld [vmem:[%s9748_s1 + $0xa8] sm:$0xff]  ;;  %v7893_v36 = vld [vmem:[%s9748_s1 + $0xa0] sm:$0xff]  ;;  %p7456_p11 = scmp.ne.s32.totalorder %s5531_s16, %s7455_s0  ;;  %s7519_s21 = smov [#allocation4]  }
  0x21   : > { %6409 = vmatpush3.msk.msra.mxu0 %vm400_vm0, %v7706_v11  ;;  %6420 = vmatpush3.msk.msra.mxu1 %vm400_vm0, %v7711_v12  ;;  %v7884_v35 = vld [vmem:[%s9748_s1 + $0xe8] sm:$0xff]  ;;  %v7900_v37 = vld [vmem:[%s9748_s1 + $0xe0] sm:$0xff]  ;;  %v7913_v38 = vld [vmem:[%s9748_s1 + $0x118] sm:$0xf]  ;;  %s7459_s13 = sshll.u32 %s7519_s21, 4  ;;  %s7460_s13 = int_to_ptr.vmem [resolvable:$false] %s7459_s13 }
  0x22   : > { %6410 = vmatprep.subr.mxu0 %v9759_v2  ;;  %6421 = vmatprep.subr.mxu1 %v9759_v2  ;;  %v7918_v39 = vld [vmem:[%s9748_s1 + $0x138] sm:$0xf]  ;;  %v7929_v40 = vld [vmem:[%s9748_s1 + $0x110] sm:$0xff]  ;;  %v7945_v42 = vld [vmem:[%s9748_s1 + $0x108] sm:$0xff]  ;;  %p7457_p12 = pnand %p7456_p11, %p7618_p5  ;;  %p7462_p0 = scmp.lt.s32.totalorder %s5531_s16, %s7460_s13 }
  0x23   : > { %6411 = vmatpush3.msra.mxu0 %v7722_v13  ;;  %6422 = vmatpush3.msra.mxu1 %v7727_v14  ;;  %v7934_v41 = vld [vmem:[%s9748_s1 + $0x130] sm:$0xff]  ;;  %v7950_v43 = vld [vmem:[%s9748_s1 + $0x128] sm:$0xff]  ;;  %v7959_v44 = vld [vmem:[%s9748_s1 + $0x100] sm:$0xff] }
  0x24   : > { %6412 = vmatprep.subr.mxu0 %v9759_v2  ;;  %6423 = vmatprep.subr.mxu1 %v9759_v2  ;;  %v7966_v45 = vld [vmem:[%s9748_s1 + $0x120] sm:$0xff]  ;;  %v5658_v46 = vld [vmem:[%s7687_s29 + $0x9] sm:$0x3f]  ;;  %v8109_v47 = vld [vmem:[%s9748_s1 + $0x38] sm:$0xf]  ;;  %p7458_p13 = pneg %p7457_p12 }
  0x25   : > { %6413 = vmatpush3.msra.mxu0 %v7738_v15  ;;  %6424 = vmatpush3.msra.mxu1 %v7743_v16  ;;  %v8114_v48 = vld [vmem:[%s9748_s1 + $0x18] sm:$0xf]  ;;  %v8142_v50 = vld [vmem:[%s7687_s29 + $0x10] sm:$0x3f]  ;;  %v8176_v53 = vld [vmem:[%s7687_s29 + $0x1] sm:$0x3f] }
  0x26   : > { %6414 = vmatprep.subr.mxu0 %v9759_v2  ;;  %6425 = vmatprep.subr.mxu1 %v9759_v2  ;;  %v8134_v49 = vld [vmem:[%s7687_s29 + $0x18] sm:$0x3f]  ;;  %v8184_v54 = vld [vmem:[%s7687_s29 + $0x9] sm:$0x3f]  ;;  %v8218_v57 = vld [vmem:[%s7687_s29 + $0x11] sm:$0x3f] }
  0x27   : > { %6415 = vmatpush3.msra.mxu0 %v7752_v17  ;;  %6416 = vmatprep.mubr.msk.f32.mxu0 %vm7518_vm2, %v9759_v2  ;;  %v8150_v51 = vld [vmem:[%s9748_s1 + $0x58] sm:$0xf] }
  0x28   : > { %6426 = vmatpush3.msra.mxu1 %v7759_v18  ;;  %6417 = vmatmul.mubr.msk.f32.vlgmr.msra.gmra.mxu0 %vm396_vm1, %v7762_v19  ;;  %v8155_v52 = vld [vmem:[%s9748_s1 + $0x78] sm:$0xf] }
  0x29   : > { %6427 = vmatprep.mubr.msk.f32.mxu1 %vm7518_vm2, %v9759_v2  ;;  %6430 = vmatprep.subr.mxu0 %v9759_v2  ;;  %v8192_v55 = vld [vmem:[%s9748_s1 + $0x98] sm:$0xf] }
  0x2a   : > { %6441 = vmatprep.subr.mxu1 %v9759_v2  ;;  %6428 = vmatmul.mubr.msk.f32.vlgmr.msra.gmra.mxu1 %vm396_vm1, %v7770_v20  ;;  %v8197_v56 = vld [vmem:[%s9748_s1 + $0xd8] sm:$0xf] }
  0x2b   : > { %6431 = vmatpush3.msk.msra.mxu0 %vm400_vm0, %v7778_v21  ;;  %6442 = vmatpush3.msk.msra.mxu1 %vm400_vm0, %v7783_v22  ;;  %v8231_v58 = vld [vmem:[%s9748_s1 + $0xb8] sm:$0xf] }
  0x2c   : > { %6432 = vmatprep.subr.mxu0 %v9759_v2  ;;  %6443 = vmatprep.subr.mxu1 %v9759_v2  ;;  %v8236_v59 = vld [vmem:[%s9748_s1 + $0xf8] sm:$0xf] }
  0x2d   : > { %6433 = vmatpush3.msra.mxu0 %v7794_v23  ;;  %6444 = vmatpush3.msra.mxu1 %v7799_v24  ;;  %v8267_v60 = vld [vmem:[%s9748_s1 + $0x118] sm:$0xf] }
  0x2e   : > { %6434 = vmatprep.subr.mxu0 %v9759_v2  ;;  %6445 = vmatprep.subr.mxu1 %v9759_v2  ;;  %v8272_v61 = vld [vmem:[%s9748_s1 + $0x138] sm:$0xf] }
  0x2f   : > { %6435 = vmatpush3.msra.mxu0 %v7810_v25  ;;  %6446 = vmatpush3.msra.mxu1 %v7815_v26  ;;  %v5740_v62 = vld [vmem:[%s7687_s29 + $0x19] sm:$0x3f]  ;;  %s7461_s29 = scalar_lea.vmem %s7460_s13, 32 }
  0x30   : > { %6436 = vmatprep.subr.mxu0 %v9759_v2  ;;  %6447 = vmatprep.subr.mxu1 %v9759_v2  ;;  %v8433_v63 = vld [vmem:[%s9750_s3 + $0x58] sm:$0xff]  ;;  %p7463_p1 = scmp.lt.s32.totalorder %s7461_s29, %s7455_s0 }
  0x31   : > { %6437 = vmatpush3.msra.mxu0 %v7824_v27  ;;  %6438 = vmatprep.mubr.msk.f32.mxu0 %vm7518_vm2, %v9759_v2 }
  0x32   : > { %6448 = vmatpush3.msra.mxu1 %v7831_v28  ;;  %6439 = vmatmul.mubr.msk.f32.vlgmr.msra.gmra.mxu0 %vm396_vm1, %v7834_v29  ;;  %p7464_p2 = por %p7463_p1, %p7462_p0 }
  0x33   : > { %6449 = vmatprep.mubr.msk.f32.mxu1 %vm7518_vm2, %v9759_v2  ;;  %6452 = vmatprep.subr.mxu0 %v9759_v2 }
  0x34   : > { %6463 = vmatprep.subr.mxu1 %v9759_v2  ;;  %6450 = vmatmul.mubr.msk.f32.vlgmr.msra.gmra.mxu1 %vm396_vm1, %v7692_v9  ;;  %p7465_p3 = pnand %p7464_p2, %p7458_p13 }
  0x35   : > { %6453 = vmatpush3.msk.msra.mxu0 %vm400_vm0, %v7847_v30  ;;  %6464 = vmatpush3.msk.msra.mxu1 %vm400_vm0, %v7852_v31 }
  0x36   : > { %6454 = vmatprep.subr.mxu0 %v9759_v2  ;;  %6465 = vmatprep.subr.mxu1 %v9759_v2 }
  0x37   : > { %6455 = vmatpush3.msra.mxu0 %v7863_v32  ;;  %6466 = vmatpush3.msra.mxu1 %v7868_v33 }
  0x38   : > { %6456 = vmatprep.subr.mxu0 %v9759_v2  ;;  %6467 = vmatprep.subr.mxu1 %v9759_v2 }
  0x39   : > { %6457 = vmatpush3.msra.mxu0 %v7879_v34  ;;  %6468 = vmatpush3.msra.mxu1 %v7884_v35 }
  0x3a   : > { %6458 = vmatprep.subr.mxu0 %v9759_v2  ;;  %6469 = vmatprep.subr.mxu1 %v9759_v2 }
  0x3b   : > { %6459 = vmatpush3.msra.mxu0 %v7893_v36  ;;  %6460 = vmatprep.mubr.msk.f32.mxu0 %vm7518_vm2, %v9759_v2 }
  0x3c   : > { %6470 = vmatpush3.msra.mxu1 %v7900_v37  ;;  %6461 = vmatmul.mubr.msk.f32.vlgmr.msra.gmra.mxu0 %vm396_vm1, %v7698_v10  ;;  %v8475_v10 = vld [vmem:[%s9750_s3 + $0x30] sm:$0xff] }
  0x3d   : > { %6471 = vmatprep.mubr.msk.f32.mxu1 %vm7518_vm2, %v9759_v2  ;;  %6474 = vmatprep.subr.mxu0 %v9759_v2 }
  0x3e   : > { %6485 = vmatprep.subr.mxu1 %v9759_v2  ;;  %6472 = vmatmul.mubr.msk.f32.vlgmr.msra.gmra.mxu1 %vm396_vm1, %v7762_v19 }
  0x3f   : > { %6475 = vmatpush3.msk.msra.mxu0 %vm400_vm0, %v7913_v38  ;;  %6486 = vmatpush3.msk.msra.mxu1 %vm400_vm0, %v7918_v39 }
  0x40   : > { %6476 = vmatprep.subr.mxu0 %v9759_v2  ;;  %6487 = vmatprep.subr.mxu1 %v9759_v2 }
  0x41   : > { %6477 = vmatpush3.msra.mxu0 %v7929_v40  ;;  %6488 = vmatpush3.msra.mxu1 %v7934_v41 }
  0x42   : > { %6478 = vmatprep.subr.mxu0 %v9759_v2  ;;  %6489 = vmatprep.subr.mxu1 %v9759_v2 }
  0x43   : > { %6479 = vmatpush3.msra.mxu0 %v7945_v42  ;;  %6490 = vmatpush3.msra.mxu1 %v7950_v43 }
  0x44   : > { %6480 = vmatprep.subr.mxu0 %v9759_v2  ;;  %6491 = vmatprep.subr.mxu1 %v9759_v2 }
  0x45   : > { %6481 = vmatpush3.msra.mxu0 %v7959_v44  ;;  %6482 = vmatprep.mubr.msk.f32.mxu0 %vm7518_vm2, %v9759_v2 }
  0x46   : > { %6492 = vmatpush3.msra.mxu1 %v7966_v45  ;;  %6483 = vmatmul.mubr.msk.f32.vlgmr.msra.gmra.mxu0 %vm396_vm1, %v7770_v20 }
  0x47   : > { %6493 = vmatprep.mubr.msk.f32.mxu1 %vm7518_vm2, %v9759_v2  ;;  %6496 = vmatprep.subr.mxu0 %v9759_v2 }
  0x48   : > { %6507 = vmatprep.subr.mxu1 %v9759_v2  ;;  %6494 = vmatmul.mubr.msk.f32.vlgmr.msra.gmra.mxu1 %vm396_vm1, %v7834_v29 }
  0x49   : > { %6497 = vmatpush3.msk.msra.mxu0 %vm400_vm0, %v7631_v0  ;;  %6508 = vmatpush3.msk.msra.mxu1 %vm400_vm0, %v7636_v1  ;;  %v8442_v1 = vld [vmem:[%s9750_s3 + $0x50] sm:$0xff] }
  0x4a   : > { %6498 = vmatprep.subr.mxu0 %v9759_v2  ;;  %6509 = vmatprep.subr.mxu1 %v9759_v2 }
  0x4b   : > { %6499 = vmatpush3.msra.mxu0 %v7643_v3  ;;  %6510 = vmatpush3.msra.mxu1 %v7648_v4 }
  0x4c   : > { %6500 = vmatprep.subr.mxu0 %v9759_v2  ;;  %6511 = vmatprep.subr.mxu1 %v9759_v2 }
  0x4d   : > { %6501 = vmatpush3.msra.mxu0 %v7660_v5  ;;  %6512 = vmatpush3.msra.mxu1 %v7665_v6 }
  0x4e   : > { %6502 = vmatprep.subr.mxu0 %v9759_v2  ;;  %6513 = vmatprep.subr.mxu1 %v9759_v2 }
  0x4f   : > { %6503 = vmatpush3.msra.mxu0 %v7675_v7  ;;  %6504 = vmatprep.mubr.msk.f32.mxu0 %vm7518_vm2, %v9759_v2 }
  0x50   : > { %6514 = vmatpush3.msra.mxu1 %v7682_v8  ;;  %6505 = vmatmul.mubr.msk.f32.vlgmr.msra.gmra.mxu0 %vm396_vm1, %v7762_v19 }
  0x51   : > { %6515 = vmatprep.mubr.msk.f32.mxu1 %vm7518_vm2, %v9759_v2  ;;  %6518 = vmatprep.subr.mxu0 %v9759_v2 }
  0x52   : > { %6529 = vmatprep.subr.mxu1 %v9759_v2  ;;  %6516 = vmatmul.mubr.msk.f32.vlgmr.msra.gmra.mxu1 %vm396_vm1, %v7692_v9 }
  0x53   : > { %6519 = vmatpush3.msk.msra.mxu0 %vm400_vm0, %v7706_v11  ;;  %6530 = vmatpush3.msk.msra.mxu1 %vm400_vm0, %v7711_v12  ;;  %v8482_v12 = vld [vmem:[%s9750_s3 + $0x28] sm:$0xff] }
  0x54   : > { %6520 = vmatprep.subr.mxu0 %v9759_v2  ;;  %6531 = vmatprep.subr.mxu1 %v9759_v2 }
  0x55   : > { %6521 = vmatpush3.msra.mxu0 %v7722_v13  ;;  %6532 = vmatpush3.msra.mxu1 %v7727_v14 }
  0x56   : > { %6522 = vmatprep.subr.mxu0 %v9759_v2  ;;  %6533 = vmatprep.subr.mxu1 %v9759_v2 }
  0x57   : > { %6523 = vmatpush3.msra.mxu0 %v7738_v15  ;;  %6534 = vmatpush3.msra.mxu1 %v7743_v16 }
  0x58   : > { %6524 = vmatprep.subr.mxu0 %v9759_v2  ;;  %6535 = vmatprep.subr.mxu1 %v9759_v2 }
  0x59   : > { %6525 = vmatpush3.msra.mxu0 %v7752_v17  ;;  %6526 = vmatprep.mubr.msk.f32.mxu0 %vm7518_vm2, %v9759_v2 }
  0x5a   : > { %6536 = vmatpush3.msra.mxu1 %v7759_v18  ;;  %6527 = vmatmul.mubr.msk.f32.vlgmr.msra.gmra.mxu0 %vm396_vm1, %v7770_v20 }
  0x5b   : > { %6537 = vmatprep.mubr.msk.f32.mxu1 %vm7518_vm2, %v9759_v2  ;;  %6540 = vmatprep.subr.mxu0 %v9759_v2 }
  0x5c   : > { %6551 = vmatprep.subr.mxu1 %v9759_v2  ;;  %6538 = vmatmul.mubr.msk.f32.vlgmr.msra.gmra.mxu1 %vm396_vm1, %v7834_v29 }
  0x5d   : > { %6541 = vmatpush3.msk.msra.mxu0 %vm400_vm0, %v7778_v21  ;;  %6552 = vmatpush3.msk.msra.mxu1 %vm400_vm0, %v7783_v22  ;;  %v8510_v21 = vld [vmem:[%s9750_s3 + $0x8] sm:$0xff] }
  0x5e   : > { %6542 = vmatprep.subr.mxu0 %v9759_v2  ;;  %6553 = vmatprep.subr.mxu1 %v9759_v2 }
  0x5f   : > { %6543 = vmatpush3.msra.mxu0 %v7794_v23  ;;  %6554 = vmatpush3.msra.mxu1 %v7799_v24 }
  0x60   : > { %6544 = vmatprep.subr.mxu0 %v9759_v2  ;;  %6555 = vmatprep.subr.mxu1 %v9759_v2 }
  0x61   : > { %6545 = vmatpush3.msra.mxu0 %v7810_v25  ;;  %6556 = vmatpush3.msra.mxu1 %v7815_v26 }
  0x62   : > { %6546 = vmatprep.subr.mxu0 %v9759_v2  ;;  %6557 = vmatprep.subr.mxu1 %v9759_v2 }
  0x63   : > { %6547 = vmatpush3.msra.mxu0 %v7824_v27  ;;  %6548 = vmatprep.mubr.msk.f32.mxu0 %vm7518_vm2, %v9759_v2 }
  0x64   : > { %6558 = vmatpush3.msra.mxu1 %v7831_v28  ;;  %6549 = vmatmul.mubr.msk.f32.vlgmr.msra.gmra.mxu0 %vm396_vm1, %v5658_v46 }
  0x65   : > { %6559 = vmatprep.mubr.msk.f32.mxu1 %vm7518_vm2, %v9759_v2  ;;  %6562 = vmatprep.subr.mxu0 %v9759_v2 }
  0x66   : > { %6573 = vmatprep.subr.mxu1 %v9759_v2  ;;  %6560 = vmatmul.mubr.msk.f32.vlgmr.msra.gmra.mxu1 %vm396_vm1, %v7762_v19  ;;  %v8496_v19 = vld [vmem:[%s9750_s3 + $0x18] sm:$0xff] }
  0x67   : > { %6563 = vmatpush3.msk.msra.mxu0 %vm400_vm0, %v7847_v30  ;;  %6574 = vmatpush3.msk.msra.mxu1 %vm400_vm0, %v7852_v31 }
  0x68   : > { %6564 = vmatprep.subr.mxu0 %v9759_v2  ;;  %6575 = vmatprep.subr.mxu1 %v9759_v2 }
  0x69   : > { %6565 = vmatpush3.msra.mxu0 %v7863_v32  ;;  %6576 = vmatpush3.msra.mxu1 %v7868_v33 }
  0x6a   : > { %6566 = vmatprep.subr.mxu0 %v9759_v2  ;;  %6577 = vmatprep.subr.mxu1 %v9759_v2 }
  0x6b   : > { %6567 = vmatpush3.msra.mxu0 %v7879_v34  ;;  %6578 = vmatpush3.msra.mxu1 %v7884_v35 }
  0x6c   : > { %6568 = vmatprep.subr.mxu0 %v9759_v2  ;;  %6579 = vmatprep.subr.mxu1 %v9759_v2 }
  0x6d   : > { %6569 = vmatpush3.msra.mxu0 %v7893_v36  ;;  %6570 = vmatprep.mubr.msk.f32.mxu0 %vm7518_vm2, %v9759_v2 }
  0x6e   : > { %6580 = vmatpush3.msra.mxu1 %v7900_v37  ;;  %6571 = vmatmul.mubr.msk.f32.vlgmr.msra.gmra.mxu0 %vm396_vm1, %v7692_v9  ;;  %v8468_v9 = vld [vmem:[%s9750_s3 + $0x38] sm:$0xff] }
  0x6f   : > { %6581 = vmatprep.mubr.msk.f32.mxu1 %vm7518_vm2, %v9759_v2  ;;  %6584 = vmatprep.subr.mxu0 %v9759_v2 }
  0x70   : > { %6595 = vmatprep.subr.mxu1 %v9759_v2  ;;  %6582 = vmatmul.mubr.msk.f32.vlgmr.msra.gmra.mxu1 %vm396_vm1, %v7770_v20  ;;  %v8503_v20 = vld [vmem:[%s9750_s3 + $0x10] sm:$0xff] }
  0x71   : > { %6585 = vmatpush3.msk.msra.mxu0 %vm400_vm0, %v7913_v38  ;;  %6596 = vmatpush3.msk.msra.mxu1 %vm400_vm0, %v7918_v39 }
  0x72   : > { %6586 = vmatprep.subr.mxu0 %v9759_v2  ;;  %6597 = vmatprep.subr.mxu1 %v9759_v2 }
  0x73   : > { %6587 = vmatpush3.msra.mxu0 %v7929_v40  ;;  %6598 = vmatpush3.msra.mxu1 %v7934_v41 }
  0x74   : > { %6588 = vmatprep.subr.mxu0 %v9759_v2  ;;  %6599 = vmatprep.subr.mxu1 %v9759_v2 }
  0x75   : > { %6589 = vmatpush3.msra.mxu0 %v7945_v42  ;;  %6600 = vmatpush3.msra.mxu1 %v7950_v43 }
  0x76   : > { %6590 = vmatprep.subr.mxu0 %v9759_v2  ;;  %6601 = vmatprep.subr.mxu1 %v9759_v2 }
  0x77   : > { %6591 = vmatpush3.msra.mxu0 %v7959_v44  ;;  %6592 = vmatprep.mubr.msk.f32.mxu0 %vm7518_vm2, %v9759_v2 }
  0x78   : > { %6602 = vmatpush3.msra.mxu1 %v7966_v45  ;;  %6593 = vmatmul.mubr.msk.f32.vlgmr.msra.gmra.mxu0 %vm396_vm1, %v7834_v29 }
  0x79   : > { %6603 = vmatprep.mubr.msk.f32.mxu1 %vm7518_vm2, %v9759_v2  ;;  %6606 = vmatprep.subr.mxu0 %v9759_v2 }
  0x7a   : > { %6617 = vmatprep.subr.mxu1 %v9759_v2  ;;  %6604 = vmatmul.mubr.msk.f32.vlgmr.msra.gmra.mxu1 %vm396_vm1, %v5658_v46 }
  0x7b   : > { %6607 = vmatpush3.msk.msra.mxu0 %vm400_vm0, %v8109_v47  ;;  %6618 = vmatpush3.msk.msra.mxu1 %vm400_vm0, %v8114_v48 }
  0x7c   : > { %6608 = vmatprep.subr.mxu0 %v9759_v2  ;;  %6619 = vmatprep.subr.mxu1 %v9759_v2 }
  0x7d   : > { %6609 = vmatpush3.msra.mxu0 %v7643_v3  ;;  %6620 = vmatpush3.msra.mxu1 %v7648_v4 }
  0x7e   : > { %6610 = vmatprep.subr.mxu0 %v9759_v2  ;;  %6621 = vmatprep.subr.mxu1 %v9759_v2 }
  0x7f   : > { %6611 = vmatpush3.msra.mxu0 %v7660_v5  ;;  %6622 = vmatpush3.msra.mxu1 %v7665_v6 }
  0x80   : > { %6612 = vmatprep.subr.mxu0 %v9759_v2  ;;  %6623 = vmatprep.subr.mxu1 %v9759_v2 }
  0x81   : > { %6613 = vmatpush3.msra.mxu0 %v7675_v7  ;;  %6614 = vmatprep.mubr.msk.f32.mxu0 %vm7518_vm2, %v9759_v2 }
  0x82   : > { %6624 = vmatpush3.msra.mxu1 %v7682_v8  ;;  %6615 = vmatmul.mubr.msk.f32.vlgmr.msra.gmra.mxu0 %vm396_vm1, %v8134_v49 }
  0x83   : > { %6625 = vmatprep.mubr.msk.f32.mxu1 %vm7518_vm2, %v9759_v2  ;;  %6628 = vmatprep.subr.mxu0 %v9759_v2 }
  0x84   : > { %6639 = vmatprep.subr.mxu1 %v9759_v2  ;;  %6626 = vmatmul.mubr.msk.f32.vlgmr.msra.gmra.mxu1 %vm396_vm1, %v8142_v50 }
  0x85   : > { %6629 = vmatpush3.msk.msra.mxu0 %vm400_vm0, %v8150_v51  ;;  %6640 = vmatpush3.msk.msra.mxu1 %vm400_vm0, %v8155_v52 }
  0x86   : > { %6630 = vmatprep.subr.mxu0 %v9759_v2  ;;  %6641 = vmatprep.subr.mxu1 %v9759_v2 }
  0x87   : > { %6631 = vmatpush3.msra.mxu0 %v7722_v13  ;;  %6642 = vmatpush3.msra.mxu1 %v7727_v14 }
  0x88   : > { %6632 = vmatprep.subr.mxu0 %v9759_v2  ;;  %6643 = vmatprep.subr.mxu1 %v9759_v2 }
  0x89   : > { %6633 = vmatpush3.msra.mxu0 %v7738_v15  ;;  %6644 = vmatpush3.msra.mxu1 %v7743_v16 }
  0x8a   : > { %6634 = vmatprep.subr.mxu0 %v9759_v2  ;;  %6645 = vmatprep.subr.mxu1 %v9759_v2 }
  0x8b   : > { %6635 = vmatpush3.msra.mxu0 %v7752_v17  ;;  %6636 = vmatprep.mubr.msk.f32.mxu0 %vm7518_vm2, %v9759_v2 }
  0x8c   : > { %6646 = vmatpush3.msra.mxu1 %v7759_v18  ;;  %6637 = vmatmul.mubr.msk.f32.vlgmr.msra.gmra.mxu0 %vm396_vm1, %v8176_v53 }
  0x8d   : > { %6647 = vmatprep.mubr.msk.f32.mxu1 %vm7518_vm2, %v9759_v2  ;;  %6650 = vmatprep.subr.mxu0 %v9759_v2 }
  0x8e   : > { %6661 = vmatprep.subr.mxu1 %v9759_v2  ;;  %6648 = vmatmul.mubr.msk.f32.vlgmr.msra.gmra.mxu1 %vm396_vm1, %v8184_v54 }
  0x8f   : > { %6651 = vmatpush3.msk.msra.mxu0 %vm400_vm0, %v8192_v55  ;;  %6662 = vmatpush3.msk.msra.mxu1 %vm400_vm0, %v8197_v56 }
  0x90   : > { %6652 = vmatprep.subr.mxu0 %v9759_v2  ;;  %6663 = vmatprep.subr.mxu1 %v9759_v2 }
  0x91   : > { %6653 = vmatpush3.msra.mxu0 %v7794_v23  ;;  %6664 = vmatpush3.msra.mxu1 %v7799_v24 }
  0x92   : > { %6654 = vmatprep.subr.mxu0 %v9759_v2  ;;  %6665 = vmatprep.subr.mxu1 %v9759_v2 }
  0x93   : > { %6655 = vmatpush3.msra.mxu0 %v7810_v25  ;;  %6666 = vmatpush3.msra.mxu1 %v7815_v26 }
  0x94   : > { %6656 = vmatprep.subr.mxu0 %v9759_v2  ;;  %6667 = vmatprep.subr.mxu1 %v9759_v2 }
  0x95   : > { %6657 = vmatpush3.msra.mxu0 %v7824_v27  ;;  %6658 = vmatprep.mubr.msk.f32.mxu0 %vm7518_vm2, %v9759_v2 }
  0x96   : > { %6668 = vmatpush3.msra.mxu1 %v7831_v28  ;;  %6659 = vmatmul.mubr.msk.f32.vlgmr.msra.gmra.mxu0 %vm396_vm1, %v8218_v57 }
  0x97   : > { %6669 = vmatprep.mubr.msk.f32.mxu1 %vm7518_vm2, %v9759_v2  ;;  %6672 = vmatprep.subr.mxu0 %v9759_v2 }
  0x98   : > { %6683 = vmatprep.subr.mxu1 %v9759_v2  ;;  %6670 = vmatmul.mubr.msk.f32.vlgmr.msra.gmra.mxu1 %vm396_vm1, %v8134_v49 }
  0x99   : > { %6673 = vmatpush3.msk.msra.mxu0 %vm400_vm0, %v8231_v58  ;;  %6684 = vmatpush3.msk.msra.mxu1 %vm400_vm0, %v8236_v59 }
  0x9a   : > { %6674 = vmatprep.subr.mxu0 %v9759_v2  ;;  %6685 = vmatprep.subr.mxu1 %v9759_v2 }
  0x9b   : > { %6675 = vmatpush3.msra.mxu0 %v7863_v32  ;;  %6686 = vmatpush3.msra.mxu1 %v7868_v33 }
  0x9c   : > { %6676 = vmatprep.subr.mxu0 %v9759_v2  ;;  %6687 = vmatprep.subr.mxu1 %v9759_v2 }
  0x9d   : > { %6677 = vmatpush3.msra.mxu0 %v7879_v34  ;;  %6688 = vmatpush3.msra.mxu1 %v7884_v35 }
  0x9e   : > { %6678 = vmatprep.subr.mxu0 %v9759_v2  ;;  %6689 = vmatprep.subr.mxu1 %v9759_v2 }
  0x9f   : > { %6679 = vmatpush3.msra.mxu0 %v7893_v36  ;;  %6680 = vmatprep.mubr.msk.f32.mxu0 %vm7518_vm2, %v9759_v2 }
  0xa0   : > { %6690 = vmatpush3.msra.mxu1 %v7900_v37  ;;  %6681 = vmatmul.mubr.msk.f32.vlgmr.msra.gmra.mxu0 %vm396_vm1, %v8142_v50 }
  0xa1   : > { %6691 = vmatprep.mubr.msk.f32.mxu1 %vm7518_vm2, %v9759_v2  ;;  %6694 = vmatprep.subr.mxu0 %v9759_v2 }
  0xa2   : > { %6705 = vmatprep.subr.mxu1 %v9759_v2  ;;  %6692 = vmatmul.mubr.msk.f32.vlgmr.msra.gmra.mxu1 %vm396_vm1, %v8176_v53 }
  0xa3   : > { %6695 = vmatpush3.msk.msra.mxu0 %vm400_vm0, %v8267_v60  ;;  %6706 = vmatpush3.msk.msra.mxu1 %vm400_vm0, %v8272_v61 }
  0xa4   : > { %6696 = vmatprep.subr.mxu0 %v9759_v2  ;;  %6707 = vmatprep.subr.mxu1 %v9759_v2 }
  0xa5   : > { %6697 = vmatpush3.msra.mxu0 %v7929_v40  ;;  %6708 = vmatpush3.msra.mxu1 %v7934_v41 }
  0xa6   : > { %6698 = vmatprep.subr.mxu0 %v9759_v2  ;;  %6709 = vmatprep.subr.mxu1 %v9759_v2 }
  0xa7   : > { %6699 = vmatpush3.msra.mxu0 %v7945_v42  ;;  %6710 = vmatpush3.msra.mxu1 %v7950_v43 }
  0xa8   : > { %6700 = vmatprep.subr.mxu0 %v9759_v2  ;;  %6711 = vmatprep.subr.mxu1 %v9759_v2 }
  0xa9   : > { %6701 = vmatpush3.msra.mxu0 %v7959_v44  ;;  %6702 = vmatprep.mubr.msk.f32.mxu0 %vm7518_vm2, %v9759_v2 }
  0xaa   : > { %6712 = vmatpush3.msra.mxu1 %v7966_v45  ;;  %6703 = vmatmul.mubr.msk.f32.vlgmr.msra.gmra.mxu0 %vm396_vm1, %v8184_v54 }
  0xab   : > { %6713 = vmatprep.mubr.msk.f32.mxu1 %vm7518_vm2, %v9759_v2  ;;  %6716 = vmatprep.subr.mxu0 %v9759_v2 }
  0xac   : > { %6727 = vmatprep.subr.mxu1 %v9759_v2  ;;  %6714 = vmatmul.mubr.msk.f32.vlgmr.msra.gmra.mxu1 %vm396_vm1, %v8218_v57 }
  0xad   : > { %6717 = vmatpush3.msk.msra.mxu0 %vm400_vm0, %v8109_v47  ;;  %6728 = vmatpush3.msk.msra.mxu1 %vm400_vm0, %v8114_v48  ;;  %v8549_v47 = vld [vmem:[%s9750_s3 + $0xa0] sm:$0xff]  ;;  %v8556_v48 = vld [vmem:[%s9750_s3 + $0x98] sm:$0xff] }
  0xae   : > { %6718 = vmatprep.subr.mxu0 %v9759_v2  ;;  %6729 = vmatprep.subr.mxu1 %v9759_v2 }
  0xaf   : > { %6719 = vmatpush3.msra.mxu0 %v7643_v3  ;;  %6730 = vmatpush3.msra.mxu1 %v7648_v4 }
  0xb0   : > { %6720 = vmatprep.subr.mxu0 %v9759_v2  ;;  %6731 = vmatprep.subr.mxu1 %v9759_v2 }
  0xb1   : > { %6721 = vmatpush3.msra.mxu0 %v7660_v5  ;;  %6732 = vmatpush3.msra.mxu1 %v7665_v6  ;;  %v8452_v5 = vld [vmem:[%s9750_s3 + $0x48] sm:$0xff] }
  0xb2   : > { %6722 = vmatprep.subr.mxu0 %v9759_v2  ;;  %6733 = vmatprep.subr.mxu1 %v9759_v2 }
  0xb3   : > { %6723 = vmatpush3.msra.mxu0 %v7675_v7  ;;  %6724 = vmatprep.mubr.msk.f32.mxu0 %vm7518_vm2, %v9759_v2 }
  0xb4   : > { %6734 = vmatpush3.msra.mxu1 %v7682_v8  ;;  %6725 = vmatmul.mubr.msk.f32.vlgmr.msra.gmra.mxu0 %vm396_vm1, %v8176_v53  ;;  %v8461_v8 = vld [vmem:[%s9750_s3 + $0x40] sm:$0xff] }
  0xb5   : > { %6735 = vmatprep.mubr.msk.f32.mxu1 %vm7518_vm2, %v9759_v2  ;;  %6738 = vmatprep.subr.mxu0 %v9759_v2 }
  0xb6   : > { %6749 = vmatprep.subr.mxu1 %v9759_v2  ;;  %6736 = vmatmul.mubr.msk.f32.vlgmr.msra.gmra.mxu1 %vm396_vm1, %v8134_v49 }
  0xb7   : > { %6739 = vmatpush3.msk.msra.mxu0 %vm400_vm0, %v8150_v51  ;;  %6750 = vmatpush3.msk.msra.mxu1 %vm400_vm0, %v8155_v52  ;;  %v8570_v51 = vld [vmem:[%s9750_s3 + $0x88] sm:$0xff] }
  0xb8   : > { %6740 = vmatprep.subr.mxu0 %v9759_v2  ;;  %6751 = vmatprep.subr.mxu1 %v9759_v2 }
  0xb9   : > { %6741 = vmatpush3.msra.mxu0 %v7722_v13  ;;  %6752 = vmatpush3.msra.mxu1 %v7727_v14 }
  0xba   : > { %6742 = vmatprep.subr.mxu0 %v9759_v2  ;;  %6753 = vmatprep.subr.mxu1 %v9759_v2 }
  0xbb   : > { %6743 = vmatpush3.msra.mxu0 %v7738_v15  ;;  %6754 = vmatpush3.msra.mxu1 %v7743_v16  ;;  %v8489_v16 = vld [vmem:[%s9750_s3 + $0x20] sm:$0xff] }
  0xbc   : > { %6744 = vmatprep.subr.mxu0 %v9759_v2  ;;  %6755 = vmatprep.subr.mxu1 %v9759_v2 }
  0xbd   : > { %6745 = vmatpush3.msra.mxu0 %v7752_v17  ;;  %6746 = vmatprep.mubr.msk.f32.mxu0 %vm7518_vm2, %v9759_v2 }
  0xbe   : > { %6756 = vmatpush3.msra.mxu1 %v7759_v18  ;;  %6747 = vmatmul.mubr.msk.f32.vlgmr.msra.gmra.mxu0 %vm396_vm1, %v8184_v54 }
  0xbf   : > { %6757 = vmatprep.mubr.msk.f32.mxu1 %vm7518_vm2, %v9759_v2  ;;  %6760 = vmatprep.subr.mxu0 %v9759_v2 }
  0xc0   : > { %6771 = vmatprep.subr.mxu1 %v9759_v2  ;;  %6758 = vmatmul.mubr.msk.f32.vlgmr.msra.gmra.mxu1 %vm396_vm1, %v8218_v57 }
  0xc1   : > { %6761 = vmatpush3.msk.msra.mxu0 %vm400_vm0, %v8192_v55  ;;  %6772 = vmatpush3.msk.msra.mxu1 %vm400_vm0, %v8197_v56  ;;  %v8584_v56 = vld [vmem:[%s9750_s3 + $0x78] sm:$0xff] }
  0xc2   : > { %6762 = vmatprep.subr.mxu0 %v9759_v2  ;;  %6773 = vmatprep.subr.mxu1 %v9759_v2 }
  0xc3   : > { %6763 = vmatpush3.msra.mxu0 %v7794_v23  ;;  %6774 = vmatpush3.msra.mxu1 %v7799_v24  ;;  %v8517_v23 = vld [vmem:[%s9750_s3] sm:$0xff] }
  0xc4   : > { %6764 = vmatprep.subr.mxu0 %v9759_v2  ;;  %6775 = vmatprep.subr.mxu1 %v9759_v2 }
  0xc5   : > { %6765 = vmatpush3.msra.mxu0 %v7810_v25  ;;  %6776 = vmatpush3.msra.mxu1 %v7815_v26 }
  0xc6   : > { %6766 = vmatprep.subr.mxu0 %v9759_v2  ;;  %6777 = vmatprep.subr.mxu1 %v9759_v2 }
  0xc7   : > { %6767 = vmatpush3.msra.mxu0 %v7824_v27  ;;  %6768 = vmatprep.mubr.msk.f32.mxu0 %vm7518_vm2, %v9759_v2 }
  0xc8   : > { %6778 = vmatpush3.msra.mxu1 %v7831_v28  ;;  %6769 = vmatmul.mubr.msk.f32.vlgmr.msra.gmra.mxu0 %vm396_vm1, %v5740_v62 }
  0xc9   : > { %6779 = vmatprep.mubr.msk.f32.mxu1 %vm7518_vm2, %v9759_v2  ;;  %6782 = vmatprep.subr.mxu0 %v9759_v2 }
  0xca   : > { %6793 = vmatprep.subr.mxu1 %v9759_v2  ;;  %6780 = vmatmul.mubr.msk.f32.vlgmr.msra.gmra.mxu1 %vm396_vm1, %v8176_v53 }
  0xcb   : > { %6783 = vmatpush3.msk.msra.mxu0 %vm400_vm0, %v8231_v58  ;;  %6794 = vmatpush3.msk.msra.mxu1 %vm400_vm0, %v8236_v59  ;;  %v8596_v58 = vld [vmem:[%s9750_s3 + $0x68] sm:$0xff] }
  0xcc   : > { %6784 = vmatprep.subr.mxu0 %v9759_v2  ;;  %6795 = vmatprep.subr.mxu1 %v9759_v2  ;;  %9819 = vst [vmem:[#allocation7_spill] sm:$0xff] %v8596_v58 }
  0xcd   : > { %6785 = vmatpush3.msra.mxu0 %v7863_v32  ;;  %6796 = vmatpush3.msra.mxu1 %v7868_v33 }
  0xce   : > { %6786 = vmatprep.subr.mxu0 %v9759_v2  ;;  %6797 = vmatprep.subr.mxu1 %v9759_v2 }
  0xcf   : > { %6787 = vmatpush3.msra.mxu0 %v7879_v34  ;;  %6798 = vmatpush3.msra.mxu1 %v7884_v35 }
  0xd0   : > { %6788 = vmatprep.subr.mxu0 %v9759_v2  ;;  %6799 = vmatprep.subr.mxu1 %v9759_v2 }
  0xd1   : > { %6789 = vmatpush3.msra.mxu0 %v7893_v36  ;;  %6790 = vmatprep.mubr.msk.f32.mxu0 %vm7518_vm2, %v9759_v2 }
  0xd2   : > { %6800 = vmatpush3.msra.mxu1 %v7900_v37  ;;  %6791 = vmatmul.mubr.msk.f32.vlgmr.msra.gmra.mxu0 %vm396_vm1, %v8134_v49  ;;  %v8563_v49 = vld [vmem:[%s9750_s3 + $0x90] sm:$0xff] }
  0xd3   : > { %6801 = vmatprep.mubr.msk.f32.mxu1 %vm7518_vm2, %v9759_v2  ;;  %6804 = vmatprep.subr.mxu0 %v9759_v2 }
  0xd4   : > { %6815 = vmatprep.subr.mxu1 %v9759_v2  ;;  %6802 = vmatmul.mubr.msk.f32.vlgmr.msra.gmra.mxu1 %vm396_vm1, %v8184_v54  ;;  %v8577_v54 = vld [vmem:[%s9750_s3 + $0x80] sm:$0xff] }
  0xd5   : > { %6805 = vmatpush3.msk.msra.mxu0 %vm400_vm0, %v8267_v60  ;;  %6816 = vmatpush3.msk.msra.mxu1 %vm400_vm0, %v8272_v61  ;;  %v8603_v60 = vld [vmem:[%s9750_s3 + $0x60] sm:$0xff] }
  0xd6   : > { %6806 = vmatprep.subr.mxu0 %v9759_v2  ;;  %6817 = vmatprep.subr.mxu1 %v9759_v2  ;;  %9820 = vst [vmem:[#allocation8_spill] sm:$0xff] %v8603_v60 }
  0xd7   : > { %6807 = vmatpush3.msra.mxu0 %v7929_v40  ;;  %6818 = vmatpush3.msra.mxu1 %v7934_v41  ;;  %v8528_v40 = vld [vmem:[%s9750_s3 + $0xb8] sm:$0xff]  ;;  %v8533_v41 = vld [vmem:[%s9750_s3 + $0xb0] sm:$0xff] }
  0xd8   : > { %6808 = vmatprep.subr.mxu0 %v9759_v2  ;;  %6819 = vmatprep.subr.mxu1 %v9759_v2 }
  0xd9   : > { %6809 = vmatpush3.msra.mxu0 %v7945_v42  ;;  %6820 = vmatpush3.msra.mxu1 %v7950_v43 }
  0xda   : > { %6810 = vmatprep.subr.mxu0 %v9759_v2  ;;  %6821 = vmatprep.subr.mxu1 %v9759_v2 }
  0xdb   : > { %6811 = vmatpush3.msra.mxu0 %v7959_v44  ;;  %6812 = vmatprep.mubr.msk.f32.mxu0 %vm7518_vm2, %v9759_v2 }
  0xdc   : > { %6822 = vmatpush3.msra.mxu1 %v7966_v45  ;;  %6823 = vmatprep.mubr.msk.f32.mxu1 %vm7518_vm2, %v9759_v2  ;;  %v8542_v45 = vld [vmem:[%s9750_s3 + $0xa8] sm:$0xff] }
  0xdd   : > { %6813 = vmatmul.mubr.msk.f32.vlgmr.msra.gmra.mxu0 %vm396_vm1, %v8218_v57  ;;  %6824 = vmatmul.mubr.msk.f32.vlgmr.msra.gmra.mxu1 %vm396_vm1, %v5740_v62  ;;  %v8590_v57 = vld [vmem:[%s9750_s3 + $0x70] sm:$0xff] }
  0xde   : > { %v470_v0 = vpop.f32.mrf.mxu0  ;;  %6853 = vmatprep.subr.mxu1 %v9759_v2  ;;  %6877 = vmatprep.mubr.msk.f32.mxu1 %vm7518_vm2, %v9759_v2 }
  0xdf   : > { %6854 = vmatpush3.msra.mxu1 %v8433_v63  ;;  %6826 = vmatprep.subr.mxu0 %v9759_v2 }
  0xe0   : > { %v546_v3 = vpop.f32.mrf.mxu1  ;;  %v6396_v4 = vpop.f32.mrf.mxu0  ;;  %6855 = vmatprep.subr.mxu1 %v9759_v2  ;;  %6850 = vmatprep.mubr.msk.f32.mxu0 %vm7518_vm2, %v9759_v2 }
  0xe1   : > { %v547_v6 = vadd.f32 %v546_v3, %v470_v0  ;;  %6856 = vmatpush3.msra.mxu1 %v8442_v1  ;;  %6827 = vmatpush3.msra.mxu0 %v8528_v40 }
  0xe2   : > { %v6407_v7 = vpop.f32.mrf.mxu1  ;;  %6857 = vmatprep.subr.mxu1 %v9759_v2  ;;  %6828 = vmatprep.subr.mxu0 %v9759_v2 }
  0xe3   : > { %6858 = vmatpush3.msra.mxu1 %v8452_v5  ;;  %6829 = vmatpush3.msra.mxu0 %v8533_v41 }
  0xe4   : > { %6859 = vmatprep.subr.mxu1 %v9759_v2  ;;  %6830 = vmatprep.subr.mxu0 %v9759_v2 }
  0xe5   : > { %6860 = vmatpush3.msra.mxu1 %v8461_v8  ;;  %6831 = vmatpush3.msra.mxu0 %v8542_v45 }
  0xe6   : > { %6861 = vmatprep.subr.mxu1 %v9759_v2  ;;  %6832 = vmatprep.subr.mxu0 %v9759_v2 }
  0xe7   : > { %6862 = vmatpush3.msra.mxu1 %v8468_v9  ;;  %6833 = vmatpush3.msra.mxu0 %v8549_v47 }
  0xe8   : > { %v629_v11 = vpop.f32.mrf.mxu0  ;;  %6863 = vmatprep.subr.mxu1 %v9759_v2  ;;  %6834 = vmatprep.subr.mxu0 %v9759_v2 }
  0xe9   : > { %v633_v13 = vadd.f32 %v629_v11, %v547_v6  ;;  %6864 = vmatpush3.msra.mxu1 %v8475_v10  ;;  %6835 = vmatpush3.msra.mxu0 %v8556_v48 }
  0xea   : > { %v713_v14 = vpop.f32.mrf.mxu1  ;;  %v6418_v15 = vpop.f32.mrf.mxu0  ;;  %6865 = vmatprep.subr.mxu1 %v9759_v2  ;;  %6836 = vmatprep.subr.mxu0 %v9759_v2 }
  0xeb   : > { %v717_v17 = vadd.f32 %v713_v14, %v633_v13  ;;  %6866 = vmatpush3.msra.mxu1 %v8482_v12  ;;  %6837 = vmatpush3.msra.mxu0 %v8563_v49 }
  0xec   : > { %v6429_v18 = vpop.f32.mrf.mxu1  ;;  %6867 = vmatprep.subr.mxu1 %v9759_v2  ;;  %6838 = vmatprep.subr.mxu0 %v9759_v2 }
  0xed   : > { %6868 = vmatpush3.msra.mxu1 %v8489_v16  ;;  %6839 = vmatpush3.msra.mxu0 %v8570_v51 }
  0xee   : > { %6869 = vmatprep.subr.mxu1 %v9759_v2  ;;  %6840 = vmatprep.subr.mxu0 %v9759_v2 }
  0xef   : > { %6870 = vmatpush3.msra.mxu1 %v8496_v19  ;;  %6841 = vmatpush3.msra.mxu0 %v8577_v54 }
  0xf0   : > { %6871 = vmatprep.subr.mxu1 %v9759_v2  ;;  %6842 = vmatprep.subr.mxu0 %v9759_v2 }
  0xf1   : > { %6872 = vmatpush3.msra.mxu1 %v8503_v20  ;;  %6843 = vmatpush3.msra.mxu0 %v8584_v56 }
  0xf2   : > { %v796_v22 = vpop.f32.mrf.mxu0  ;;  %6873 = vmatprep.subr.mxu1 %v9759_v2  ;;  %6844 = vmatprep.subr.mxu0 %v9759_v2 }
  0xf3   : > { %v8519_v24 = vadd.f32 %v796_v22, %v717_v17  ;;  %6874 = vmatpush3.msra.mxu1 %v8510_v21  ;;  %6845 = vmatpush3.msra.mxu0 %v8590_v57 }
  0xf4   : > { %v880_v25 = vpop.f32.mrf.mxu1  ;;  %v6440_v26 = vpop.f32.mrf.mxu0  ;;  %6875 = vmatprep.subr.mxu1 %v9759_v2  ;;  %6846 = vmatprep.subr.mxu0 %v9759_v2 }
  0xf5   : > { %6876 = vmatpush3.msra.mxu1 %v8517_v23  ;;  %6847 = vmatpush3.msra.mxu0 %v8596_v58 }
  0xf6   : > { %v6451_v27 = vpop.f32.mrf.mxu1  ;;  %6907 = vmatprep.subr.mxu1 %v9759_v2  ;;  %6848 = vmatprep.subr.mxu0 %v9759_v2 }
  0xf7   : > { %6849 = vmatpush3.msra.mxu0 %v8603_v60 }
  0xf8   : > { %6880 = vmatprep.subr.mxu0 %v9759_v2 }
  0xfc   : > { %v953_v28 = vpop.f32.mrf.mxu0 }
  0xfd   : > { %v954_v59 = vadd.f32 %v953_v28, %v880_v25 }
  0xfe   : > { %v1031_v29 = vpop.f32.mrf.mxu1  ;;  %v6462_v30 = vpop.f32.mrf.mxu0 }
  0xff   : > { %v1035_v62 = vadd.f32 %v1031_v29, %v954_v59  ;;  %v8638_v59 = vld [vmem:[%s9750_s3 + $0x168] sm:$0xff] }
 0x100   : > { %v6473_v31 = vpop.f32.mrf.mxu1 }
 0x101   : > { %v8613_v31 = vld [vmem:[%s9749_s2] ss:$0 sm:$0xff] }
 0x106   : > { %v1110_v32 = vpop.f32.mrf.mxu0 }
 0x107   : > { %v1114_v6 = vadd.f32 %v1110_v32, %v1035_v62 }
 0x108   : > { %v1189_v33 = vpop.f32.mrf.mxu1  ;;  %v6484_v34 = vpop.f32.mrf.mxu0 }
 0x109   : > { %v1193_v14 = vadd.f32 %v1189_v33, %v1114_v6 }
 0x10a   : > { %v6495_v35 = vpop.f32.mrf.mxu1 }
 0x10b   : > { %v1194_v25 = vmax.f32 %v8519_v24, %v1193_v14 }
 0x110   : > { %v1261_v36 = vpop.f32.mrf.mxu0 }
 0x112   : > { %v1331_v37 = vpop.f32.mrf.mxu1  ;;  %v6506_v38 = vpop.f32.mrf.mxu0 }
 0x113   : > { %v1332_v0 = vadd.f32 %v1331_v37, %v1261_v36 }
 0x114   : > { %v6517_v39 = vpop.f32.mrf.mxu1 }
 0x11a   : > { %v1401_v42 = vpop.f32.mrf.mxu0 }
 0x11b   : > { %v1405_v7 = vadd.f32 %v1401_v42, %v1332_v0  ;;  %v8645_v0 = vld [vmem:[%s9750_s3 + $0x160] sm:$0xff] }
 0x11c   : > { %v1472_v43 = vpop.f32.mrf.mxu1  ;;  %v6528_v44 = vpop.f32.mrf.mxu0 }
 0x11d   : > { %v1476_v15 = vadd.f32 %v1472_v43, %v1405_v7  ;;  %v8620_v43 = vld [vmem:[%s9750_s3 + $0x178] sm:$0xff]  ;;  %v8666_v7 = vld [vmem:[%s9750_s3 + $0x148] sm:$0xff] }
 0x11e   : > { %v6539_v46 = vpop.f32.mrf.mxu1 }
 0x124   : > { %v1547_v50 = vpop.f32.mrf.mxu0 }
 0x125   : > { %v1551_v17 = vadd.f32 %v1547_v50, %v1476_v15  ;;  %v8629_v50 = vld [vmem:[%s9750_s3 + $0x170] sm:$0xff]  ;;  %v8675_v15 = vld [vmem:[%s9750_s3 + $0x140] sm:$0xff] }
 0x126   : > { %v1619_v52 = vpop.f32.mrf.mxu1  ;;  %v6550_v53 = vpop.f32.mrf.mxu0 }
 0x127   : > { %v1552_v29 = vmax.f32 %v1194_v25, %v1551_v17  ;;  %v8696_v25 = vld [vmem:[%s9750_s3 + $0x128] sm:$0xff] }
 0x128   : > { %v6561_v55 = vpop.f32.mrf.mxu1  ;;  %9822 = vst [vmem:[#allocation10_spill] sm:$0xff] %v8696_v25 }
 0x12e   : > { %v1689_v61 = vpop.f32.mrf.mxu0 }
 0x12f   : > { %v1690_v13 = vadd.f32 %v1689_v61, %v1619_v52 }
 0x130   : > { %v1759_v3 = vpop.f32.mrf.mxu1  ;;  %v6572_v4 = vpop.f32.mrf.mxu0 }
 0x131   : > { %v1763_v18 = vadd.f32 %v1759_v3, %v1690_v13  ;;  %v8652_v3 = vld [vmem:[%s9750_s3 + $0x158] sm:$0xff]  ;;  %v8659_v4 = vld [vmem:[%s9750_s3 + $0x150] sm:$0xff] }
 0x132   : > { %v6583_v11 = vpop.f32.mrf.mxu1 }
 0x138   : > { %v1830_v22 = vpop.f32.mrf.mxu0 }
 0x139   : > { %v1834_v26 = vadd.f32 %v1830_v22, %v1763_v18  ;;  %v8682_v18 = vld [vmem:[%s9750_s3 + $0x138] sm:$0xff]  ;;  %v8689_v22 = vld [vmem:[%s9750_s3 + $0x130] sm:$0xff] }
 0x13a   : > { %v1901_v27 = vpop.f32.mrf.mxu1  ;;  %v6594_v28 = vpop.f32.mrf.mxu0  ;;  %9821 = vst [vmem:[#allocation9_spill] sm:$0xff] %v8689_v22 }
 0x13b   : > { %v1905_v30 = vadd.f32 %v1901_v27, %v1834_v26  ;;  %v8703_v27 = vld [vmem:[%s9750_s3 + $0x120] sm:$0xff] }
 0x13c   : > { %v6605_v32 = vpop.f32.mrf.mxu1  ;;  %9823 = vst [vmem:[#allocation11_spill] sm:$0xff] %v8703_v27 }
 0x13d   : > { %v1906_v34 = vmax.f32 %v1552_v29, %v1905_v30 }
 0x13f   : > { %v1914_v33 = vadd.f32 %v8613_v31, %v1906_v34 }
 0x141   : > { %vm1915_vm3 = vcmp.gt.f32.partialorder %v1914_v33, 0.0  ;;  %v1916_v35 = vmul.f32 0.01, %v1914_v33 }
 0x142   : > { %v2002_v36 = vpop.f32.mrf.mxu0 }
 0x143   : > { %v1917_v37 = vsel %vm1915_vm3, %v1914_v33, %v1916_v35 }
 0x144   : > { %1919 = vst.msk [vmem:[#allocation2] sm:$0x3f] %vm1918_vm4, %v1917_v37  ;;  %v2078_v24 = vpop.f32.mrf.mxu1  ;;  %v6616_v38 = vpop.f32.mrf.mxu0 }
 0x145   : > { %v2079_v39 = vadd.f32 %v2078_v24, %v2002_v36 }
 0x146   : > { %v6627_v42 = vpop.f32.mrf.mxu1 }
 0x14b   : > { %v8622_v44 = vld [vmem:[#allocation2] sm:$0xf] }
 0x14c   : > { %v2159_v46 = vpop.f32.mrf.mxu0  ;;  %6878 = vmatmul.mubr.msk.f32.vlgmr.msra.gmra.mxu1 %vm3469_vm5, %v8622_v44 }
 0x14d   : > { %v2163_v52 = vadd.f32 %v2159_v46, %v2079_v39  ;;  %6908 = vmatpush3.msra.mxu1 %v8620_v43  ;;  %6931 = vmatprep.mubr.msk.f32.mxu1 %vm7518_vm2, %v9759_v2 }
 0x14e   : > { %v2241_v53 = vpop.f32.mrf.mxu1  ;;  %v6638_v55 = vpop.f32.mrf.mxu0  ;;  %6909 = vmatprep.subr.mxu1 %v9759_v2 }
 0x14f   : > { %v2245_v61 = vadd.f32 %v2241_v53, %v2163_v52  ;;  %6910 = vmatpush3.msra.mxu1 %v8629_v50 }
 0x150   : > { %v6649_v62 = vpop.f32.mrf.mxu1  ;;  %6911 = vmatprep.subr.mxu1 %v9759_v2 }
 0x151   : > { %6912 = vmatpush3.msra.mxu1 %v8638_v59 }
 0x152   : > { %6913 = vmatprep.subr.mxu1 %v9759_v2 }
 0x153   : > { %6914 = vmatpush3.msra.mxu1 %v8645_v0 }
 0x154   : > { %6915 = vmatprep.subr.mxu1 %v9759_v2 }
 0x155   : > { %6916 = vmatpush3.msra.mxu1 %v8652_v3 }
 0x156   : > { %v2323_v6 = vpop.f32.mrf.mxu0  ;;  %6917 = vmatprep.subr.mxu1 %v9759_v2 }
 0x157   : > { %v8668_v11 = vadd.f32 %v2323_v6, %v2245_v61  ;;  %6918 = vmatpush3.msra.mxu1 %v8659_v4 }
 0x158   : > { %v2405_v13 = vpop.f32.mrf.mxu1  ;;  %v6660_v14 = vpop.f32.mrf.mxu0  ;;  %6919 = vmatprep.subr.mxu1 %v9759_v2 }
 0x159   : > { %6920 = vmatpush3.msra.mxu1 %v8666_v7 }
 0x15a   : > { %v6671_v17 = vpop.f32.mrf.mxu1  ;;  %6921 = vmatprep.subr.mxu1 %v9759_v2 }
 0x15b   : > { %6922 = vmatpush3.msra.mxu1 %v8675_v15 }
 0x15c   : > { %6923 = vmatprep.subr.mxu1 %v9759_v2 }
 0x15d   : > { %6924 = vmatpush3.msra.mxu1 %v8682_v18 }
 0x15e   : > { %6925 = vmatprep.subr.mxu1 %v9759_v2 }
 0x15f   : > { %6926 = vmatpush3.msra.mxu1 %v8689_v22 }
 0x160   : > { %v2478_v26 = vpop.f32.mrf.mxu0  ;;  %6927 = vmatprep.subr.mxu1 %v9759_v2 }
 0x161   : > { %6928 = vmatpush3.msra.mxu1 %v8696_v25  ;;  %v2479_v6 = vadd.f32 %v2478_v26, %v2405_v13 }
 0x162   : > { %v2555_v28 = vpop.f32.mrf.mxu1  ;;  %v6682_v29 = vpop.f32.mrf.mxu0  ;;  %6929 = vmatprep.subr.mxu1 %v9759_v2 }
 0x163   : > { %6930 = vmatpush3.msra.mxu1 %v8703_v27  ;;  %v2559_v17 = vadd.f32 %v2555_v28, %v2479_v6  ;;  %v8780_v6 = vld [vmem:[%s9750_s3 + $0x278] sm:$0xff] }
 0x164   : > { %v6693_v30 = vpop.f32.mrf.mxu1  ;;  %6961 = vmatprep.subr.mxu1 %v9759_v2 }
 0x16a   : > { %v2633_v32 = vpop.f32.mrf.mxu0 }
 0x16c   : > { %v2711_v34 = vpop.f32.mrf.mxu1  ;;  %v6704_v33 = vpop.f32.mrf.mxu0 }
 0x16d   : > { %v2637_v33 = vadd.f32 %v2633_v32, %v2559_v17  ;;  %v8794_v17 = vld [vmem:[%s9750_s3 + $0x270] sm:$0xff] }
 0x16e   : > { %v6715_v35 = vpop.f32.mrf.mxu1 }
 0x174   : > { %v2783_v36 = vpop.f32.mrf.mxu0 }
 0x176   : > { %v2853_v37 = vpop.f32.mrf.mxu1  ;;  %v6726_v24 = vpop.f32.mrf.mxu0 }
 0x177   : > { %v2854_v29 = vadd.f32 %v2853_v37, %v2783_v36  ;;  %v2715_v24 = vadd.f32 %v2711_v34, %v2637_v33  ;;  %v9824_v34 = vmov 0.0   ;;  %v8747_v37 = vld [vmem:[%s9750_s3 + $0x108] sm:$0xff]  ;;  %v8817_v33 = vld [vmem:[%s9750_s3 + $0xe0] sm:$0xff] }
 0x178   : > { %v6737_v38 = vpop.f32.mrf.mxu1 }
 0x179   : > { %v2716_v22 = vmax.f32 %v8668_v11, %v2715_v24  ;;  %v8831_v24 = vld [vmem:[%s9750_s3 + $0xd8] sm:$0xff] }
 0x17e   : > { %v2923_v39 = vpop.f32.mrf.mxu0 }
 0x17f   : > { %v2927_v35 = vadd.f32 %v2923_v39, %v2854_v29  ;;  %v8752_v39 = vld [vmem:[%s9750_s3 + $0x288] sm:$0xff] }
 0x180   : > { %v2994_v42 = vpop.f32.mrf.mxu1  ;;  %v6748_v46 = vpop.f32.mrf.mxu0  ;;  %v8803_v29 = vld [vmem:[%s9750_s3 + $0xe8] sm:$0xff] }
 0x181   : > { %v2998_v38 = vadd.f32 %v2994_v42, %v2927_v35  ;;  %v8761_v42 = vld [vmem:[%s9750_s3 + $0x100] sm:$0xff] }
 0x182   : > { %v6759_v52 = vpop.f32.mrf.mxu1  ;;  %v8822_v35 = vld [vmem:[%s9750_s3 + $0x260] sm:$0xff] }
 0x188   : > { %v3069_v53 = vpop.f32.mrf.mxu0 }
 0x189   : > { %v3073_v25 = vadd.f32 %v3069_v53, %v2998_v38  ;;  %v8766_v53 = vld [vmem:[%s9750_s3 + $0x280] sm:$0xff]  ;;  %v8836_v38 = vld [vmem:[%s9750_s3 + $0x258] sm:$0xff] }
 0x18a   : > { %v3141_v55 = vpop.f32.mrf.mxu1  ;;  %v6770_v61 = vpop.f32.mrf.mxu0 }
 0x18b   : > { %v3074_v26 = vmax.f32 %v2716_v22, %v3073_v25  ;;  %v8738_v25 = vld [vmem:[%s9750_s3 + $0x290] sm:$0xff] }
 0x18c   : > { %v6781_v62 = vpop.f32.mrf.mxu1 }
 0x192   : > { %v3211_v14 = vpop.f32.mrf.mxu0 }
 0x193   : > { %v3212_v60 = vadd.f32 %v3211_v14, %v3141_v55  ;;  %v8775_v55 = vld [vmem:[%s9750_s3 + $0xf8] sm:$0xff]  ;;  %v8789_v14 = vld [vmem:[%s9750_s3 + $0xf0] sm:$0xff] }
 0x194   : > { %v3281_v30 = vpop.f32.mrf.mxu1  ;;  %v6792_v2 = vpop.f32.mrf.mxu0 }
 0x195   : > { %v3285_v58 = vadd.f32 %v3281_v30, %v3212_v60  ;;  %v8715_v60 = vld [vmem:[%s9750_s3 + $0x118] sm:$0xff]  ;;  %v8808_v30 = vld [vmem:[%s9750_s3 + $0x268] sm:$0xff] }
 0x196   : > { %v6803_v27 = vpop.f32.mrf.mxu1 }
 0x19d   : > { %v3352_v46 = vpop.f32.mrf.mxu0  ;;  %v3423_v52 = vpop.f32.mrf.mxu1 }
 0x19e   : > { %v3356_v61 = vadd.f32 %v3352_v46, %v3285_v58  ;;  %v8720_v58 = vld [vmem:[%s9750_s3 + $0x298] sm:$0xff]  ;;  %v8845_v46 = vld [vmem:[%s9750_s3 + $0xd0] sm:$0xff] }
 0x19f   : > { %v6814_v62 = vpop.f32.mrf.mxu0  ;;  %v6825_v13 = vpop.f32.mrf.mxu1 }
 0x1a0   : > { %v3427_v28 = vadd.f32 %v3423_v52, %v3356_v61  ;;  %v8850_v52 = vld [vmem:[%s9750_s3 + $0x250] sm:$0xff]  ;;  %v8859_v61 = vld [vmem:[%s9750_s3 + $0xc8] sm:$0xff]  ;;  %v8873_v13 = vld [vmem:[%s9750_s3 + $0xc0] sm:$0xff] }
 0x1a1   : > { %v8864_v62 = vld [vmem:[%s9750_s3 + $0x248] sm:$0xff]  ;;  %9826 = vst [vmem:[#allocation13_spill] sm:$0xff] %v8873_v13 }
 0x1a2   : > { %v3428_v36 = vmax.f32 %v3074_v26, %v3427_v28  ;;  %9825 = vst [vmem:[#allocation12_spill] sm:$0xff] %v8864_v62  ;;  %v8880_v26 = vld [vmem:[%s9750_s3 + $0x240] sm:$0xff] }
 0x1a3   : > { %9827 = vst [vmem:[#allocation14_spill] sm:$0xff] %v8880_v26  ;;  %v8890_v28 = vld [vmem:[#allocation2 + $0x1] sm:$0xf] }
 0x1a4   : > { %v3436_v2 = vadd.f32 %v8613_v31, %v3428_v36  ;;  %v8733_v31 = vld [vmem:[%s9750_s3 + $0x110] sm:$0xff]  ;;  %v8895_v36 = vld [vmem:[%s9750_s3 + $0x1d8] sm:$0xff] }
 0x1a5   : > { %9828 = vst [vmem:[#allocation15_spill] sm:$0xff] %v8895_v36 }
 0x1a6   : > { %vm3437_vm6 = vcmp.gt.f32.partialorder %v3436_v2, 0.0  ;;  %v3438_v32 = vmul.f32 0.01, %v3436_v2 }
 0x1a8   : > { %v3439_v27 = vsel %vm3437_vm6, %v3436_v2, %v3438_v32  ;;  %v8900_v2 = vld [vmem:[%s9750_s3 + $0x2f8] sm:$0xff]  ;;  %v8911_v32 = vld [vmem:[%s9750_s3 + $0x1d0] sm:$0xff] }
 0x1a9   : > { %3441 = vst.msk [vmem:[#allocation2 + $0x8] sm:$0x3f] %vm1918_vm4, %v3439_v27  ;;  %9829 = vst [vmem:[#allocation16_spill] sm:$0xff] %v8900_v2  ;;  %v8916_v27 = vld [vmem:[%s9750_s3 + $0x2f0] sm:$0xff] }
 0x1aa   : > { %9830 = vst [vmem:[#allocation17_spill] sm:$0xff] %v8911_v32  ;;  %9831 = vst [vmem:[#allocation18_spill] sm:$0xff] %v8916_v27 }
 0x1b0   : > { %v8722_v11 = vld [vmem:[#allocation2 + $0x8] sm:$0xf] }
 0x1b1   : > { %v8724_v22 = vld [vmem:[#allocation2 + $0x9] sm:$0xf]  ;;  %6851 = vmatmul.mubr.msk.f32.vlgmr.msra.gmra.mxu0 %vm3469_vm5, %v8722_v11 }
 0x1b2   : > { %6932 = vmatmul.mubr.msk.f32.vlgmr.msra.gmra.mxu1 %vm3469_vm5, %v8724_v22  ;;  %6881 = vmatpush3.msra.mxu0 %v8715_v60 }
 0x1b3   : > { %6962 = vmatpush3.msra.mxu1 %v8720_v58  ;;  %6882 = vmatprep.subr.mxu0 %v9824_v34 }
 0x1b4   : > { %6963 = vmatprep.subr.mxu1 %v9824_v34  ;;  %6883 = vmatpush3.msra.mxu0 %v8733_v31 }
 0x1b5   : > { %6964 = vmatpush3.msra.mxu1 %v8738_v25  ;;  %6884 = vmatprep.subr.mxu0 %v9824_v34 }
 0x1b6   : > { %6965 = vmatprep.subr.mxu1 %v9824_v34  ;;  %6885 = vmatpush3.msra.mxu0 %v8747_v37 }
 0x1b7   : > { %6966 = vmatpush3.msra.mxu1 %v8752_v39  ;;  %6886 = vmatprep.subr.mxu0 %v9824_v34 }
 0x1b8   : > { %6967 = vmatprep.subr.mxu1 %v9824_v34  ;;  %6887 = vmatpush3.msra.mxu0 %v8761_v42 }
 0x1b9   : > { %6968 = vmatpush3.msra.mxu1 %v8766_v53  ;;  %6888 = vmatprep.subr.mxu0 %v9824_v34 }
 0x1ba   : > { %6969 = vmatprep.subr.mxu1 %v9824_v34  ;;  %6889 = vmatpush3.msra.mxu0 %v8775_v55 }
 0x1bb   : > { %6970 = vmatpush3.msra.mxu1 %v8780_v6  ;;  %6890 = vmatprep.subr.mxu0 %v9824_v34 }
 0x1bc   : > { %6971 = vmatprep.subr.mxu1 %v9824_v34  ;;  %6891 = vmatpush3.msra.mxu0 %v8789_v14 }
 0x1bd   : > { %6972 = vmatpush3.msra.mxu1 %v8794_v17  ;;  %6892 = vmatprep.subr.mxu0 %v9824_v34 }
 0x1be   : > { %6973 = vmatprep.subr.mxu1 %v9824_v34  ;;  %6893 = vmatpush3.msra.mxu0 %v8803_v29 }
 0x1bf   : > { %6974 = vmatpush3.msra.mxu1 %v8808_v30  ;;  %6894 = vmatprep.subr.mxu0 %v9824_v34 }
 0x1c0   : > { %6975 = vmatprep.subr.mxu1 %v9824_v34  ;;  %6895 = vmatpush3.msra.mxu0 %v8817_v33 }
 0x1c1   : > { %6976 = vmatpush3.msra.mxu1 %v8822_v35  ;;  %6896 = vmatprep.subr.mxu0 %v9824_v34 }
 0x1c2   : > { %6977 = vmatprep.subr.mxu1 %v9824_v34  ;;  %6897 = vmatpush3.msra.mxu0 %v8831_v24 }
 0x1c3   : > { %6978 = vmatpush3.msra.mxu1 %v8836_v38  ;;  %6898 = vmatprep.subr.mxu0 %v9824_v34 }
 0x1c4   : > { %6979 = vmatprep.subr.mxu1 %v9824_v34  ;;  %6899 = vmatpush3.msra.mxu0 %v8845_v46 }
 0x1c5   : > { %6980 = vmatpush3.msra.mxu1 %v8850_v52  ;;  %6900 = vmatprep.subr.mxu0 %v9824_v34 }
 0x1c6   : > { %6981 = vmatprep.subr.mxu1 %v9824_v34  ;;  %6901 = vmatpush3.msra.mxu0 %v8859_v61 }
 0x1c7   : > { %6982 = vmatpush3.msra.mxu1 %v8864_v62  ;;  %6902 = vmatprep.subr.mxu0 %v9824_v34  ;;  %v9108_v62 = vld [vmem:[%s9750_s3 + $0x3a8] sm:$0xff] }
 0x1c8   : > { %6983 = vmatprep.subr.mxu1 %v9824_v34  ;;  %6903 = vmatpush3.msra.mxu0 %v8873_v13  ;;  %v8930_v13 = vld [vmem:[%s9750_s3 + $0x2e8] sm:$0xff]  ;;  %9857 = vst [vmem:[#allocation44_spill] sm:$0xff] %v9108_v62 }
 0x1c9   : > { %6904 = vmatprep.mubr.msk.f32.mxu0 %vm7518_vm2, %v9824_v34  ;;  %6984 = vmatpush3.msra.mxu1 %v8880_v26  ;;  %v8925_v26 = vld [vmem:[%s9750_s3 + $0x1c8] sm:$0xff]  ;;  %9833 = vst [vmem:[#allocation20_spill] sm:$0xff] %v8930_v13 }
 0x1ca   : > { %6985 = vmatprep.mubr.msk.f32.mxu1 %vm7518_vm2, %v9824_v34  ;;  %6905 = vmatmul.mubr.msk.f32.vlgmr.msra.gmra.mxu0 %vm3469_vm5, %v8890_v28  ;;  %9832 = vst [vmem:[#allocation19_spill] sm:$0xff] %v8925_v26 }
 0x1cb   : > { %6934 = vmatprep.subr.mxu0 %v9824_v34  ;;  %6986 = vmatmul.mubr.msk.f32.vlgmr.msra.gmra.mxu1 %vm3469_vm5, %v8722_v11 }
 0x1cc   : > { %7015 = vmatprep.subr.mxu1 %v9824_v34  ;;  %6935 = vmatpush3.msra.mxu0 %v8895_v36  ;;  %v8944_v36 = vld [vmem:[%s9750_s3 + $0x2e0] sm:$0xff] }
 0x1cd   : > { %7016 = vmatpush3.msra.mxu1 %v8900_v2  ;;  %6936 = vmatprep.subr.mxu0 %v9824_v34  ;;  %v8939_v2 = vld [vmem:[%s9750_s3 + $0x1c0] sm:$0xff]  ;;  %9835 = vst [vmem:[#allocation22_spill] sm:$0xff] %v8944_v36 }
 0x1ce   : > { %7017 = vmatprep.subr.mxu1 %v9824_v34  ;;  %6937 = vmatpush3.msra.mxu0 %v8911_v32  ;;  %9834 = vst [vmem:[#allocation21_spill] sm:$0xff] %v8939_v2  ;;  %v8958_v32 = vld [vmem:[%s9750_s3 + $0x2d8] sm:$0xff] }
 0x1cf   : > { %7018 = vmatpush3.msra.mxu1 %v8916_v27  ;;  %6938 = vmatprep.subr.mxu0 %v9824_v34  ;;  %v8953_v27 = vld [vmem:[%s9750_s3 + $0x1b8] sm:$0xff]  ;;  %9837 = vst [vmem:[#allocation24_spill] sm:$0xff] %v8958_v32 }
 0x1d0   : > { %7019 = vmatprep.subr.mxu1 %v9824_v34  ;;  %6939 = vmatpush3.msra.mxu0 %v8925_v26  ;;  %9836 = vst [vmem:[#allocation23_spill] sm:$0xff] %v8953_v27  ;;  %v8972_v26 = vld [vmem:[%s9750_s3 + $0x2d0] sm:$0xff] }
 0x1d1   : > { %7020 = vmatpush3.msra.mxu1 %v8930_v13  ;;  %6940 = vmatprep.subr.mxu0 %v9824_v34  ;;  %v8967_v13 = vld [vmem:[%s9750_s3 + $0x1b0] sm:$0xff]  ;;  %9839 = vst [vmem:[#allocation26_spill] sm:$0xff] %v8972_v26 }
 0x1d2   : > { %7021 = vmatprep.subr.mxu1 %v9824_v34  ;;  %6941 = vmatpush3.msra.mxu0 %v8939_v2  ;;  %9838 = vst [vmem:[#allocation25_spill] sm:$0xff] %v8967_v13  ;;  %v8986_v2 = vld [vmem:[%s9750_s3 + $0x2c8] sm:$0xff] }
 0x1d3   : > { %7022 = vmatpush3.msra.mxu1 %v8944_v36  ;;  %6942 = vmatprep.subr.mxu0 %v9824_v34  ;;  %v8981_v36 = vld [vmem:[%s9750_s3 + $0x1a8] sm:$0xff]  ;;  %9841 = vst [vmem:[#allocation28_spill] sm:$0xff] %v8986_v2 }
 0x1d4   : > { %7023 = vmatprep.subr.mxu1 %v9824_v34  ;;  %6943 = vmatpush3.msra.mxu0 %v8953_v27  ;;  %9840 = vst [vmem:[#allocation27_spill] sm:$0xff] %v8981_v36  ;;  %v9000_v27 = vld [vmem:[%s9750_s3 + $0x2c0] sm:$0xff] }
 0x1d5   : > { %7024 = vmatpush3.msra.mxu1 %v8958_v32  ;;  %6944 = vmatprep.subr.mxu0 %v9824_v34  ;;  %v8995_v32 = vld [vmem:[%s9750_s3 + $0x1a0] sm:$0xff]  ;;  %9843 = vst [vmem:[#allocation30_spill] sm:$0xff] %v9000_v27 }
 0x1d6   : > { %7025 = vmatprep.subr.mxu1 %v9824_v34  ;;  %6945 = vmatpush3.msra.mxu0 %v8967_v13  ;;  %9842 = vst [vmem:[#allocation29_spill] sm:$0xff] %v8995_v32  ;;  %v9014_v13 = vld [vmem:[%s9750_s3 + $0x2b8] sm:$0xff] }
 0x1d7   : > { %7026 = vmatpush3.msra.mxu1 %v8972_v26  ;;  %6946 = vmatprep.subr.mxu0 %v9824_v34  ;;  %v9009_v26 = vld [vmem:[%s9750_s3 + $0x198] sm:$0xff]  ;;  %9845 = vst [vmem:[#allocation32_spill] sm:$0xff] %v9014_v13 }
 0x1d8   : > { %7027 = vmatprep.subr.mxu1 %v9824_v34  ;;  %6947 = vmatpush3.msra.mxu0 %v8981_v36  ;;  %9844 = vst [vmem:[#allocation31_spill] sm:$0xff] %v9009_v26  ;;  %v9028_v36 = vld [vmem:[%s9750_s3 + $0x2b0] sm:$0xff] }
 0x1d9   : > { %7028 = vmatpush3.msra.mxu1 %v8986_v2  ;;  %6948 = vmatprep.subr.mxu0 %v9824_v34  ;;  %v9023_v2 = vld [vmem:[%s9750_s3 + $0x190] sm:$0xff]  ;;  %9847 = vst [vmem:[#allocation34_spill] sm:$0xff] %v9028_v36 }
 0x1da   : > { %7029 = vmatprep.subr.mxu1 %v9824_v34  ;;  %6949 = vmatpush3.msra.mxu0 %v8995_v32  ;;  %9846 = vst [vmem:[#allocation33_spill] sm:$0xff] %v9023_v2  ;;  %v9042_v32 = vld [vmem:[%s9750_s3 + $0x2a8] sm:$0xff] }
 0x1db   : > { %7030 = vmatpush3.msra.mxu1 %v9000_v27  ;;  %6950 = vmatprep.subr.mxu0 %v9824_v34  ;;  %v9037_v27 = vld [vmem:[%s9750_s3 + $0x188] sm:$0xff]  ;;  %9849 = vst [vmem:[#allocation36_spill] sm:$0xff] %v9042_v32 }
 0x1dc   : > { %7031 = vmatprep.subr.mxu1 %v9824_v34  ;;  %6951 = vmatpush3.msra.mxu0 %v9009_v26  ;;  %9848 = vst [vmem:[#allocation35_spill] sm:$0xff] %v9037_v27  ;;  %v9058_v26 = vld [vmem:[%s9750_s3 + $0x2a0] sm:$0xff] }
 0x1dd   : > { %7032 = vmatpush3.msra.mxu1 %v9014_v13  ;;  %6952 = vmatprep.subr.mxu0 %v9824_v34  ;;  %v9051_v13 = vld [vmem:[%s9750_s3 + $0x180] sm:$0xff]  ;;  %9851 = vst [vmem:[#allocation38_spill] sm:$0xff] %v9058_v26 }
 0x1de   : > { %7033 = vmatprep.subr.mxu1 %v9824_v34  ;;  %6953 = vmatpush3.msra.mxu0 %v9023_v2  ;;  %9850 = vst [vmem:[#allocation37_spill] sm:$0xff] %v9051_v13  ;;  %v9103_v2 = vld [vmem:[%s9750_s3 + $0x228] sm:$0xff] }
 0x1df   : > { %7034 = vmatpush3.msra.mxu1 %v9028_v36  ;;  %6954 = vmatprep.subr.mxu0 %v9824_v34  ;;  %v9078_v36 = vld [vmem:[%s9750_s3 + $0x3b8] sm:$0xff]  ;;  %9856 = vst [vmem:[#allocation43_spill] sm:$0xff] %v9103_v2 }
 0x1e0   : > { %7035 = vmatprep.subr.mxu1 %v9824_v34  ;;  %6955 = vmatpush3.msra.mxu0 %v9037_v27  ;;  %v9073_v27 = vld [vmem:[%s9750_s3 + $0x238] sm:$0xff]  ;;  %9853 = vst [vmem:[#allocation40_spill] sm:$0xff] %v9078_v36 }
 0x1e1   : > { %7036 = vmatpush3.msra.mxu1 %v9042_v32  ;;  %6956 = vmatprep.subr.mxu0 %v9824_v34  ;;  %v9068_v32 = vld [vmem:[#allocation2 + $0x2] sm:$0xf]  ;;  %9852 = vst [vmem:[#allocation39_spill] sm:$0xff] %v9073_v27 }
 0x1e2   : > { %7037 = vmatprep.subr.mxu1 %v9824_v34  ;;  %6957 = vmatpush3.msra.mxu0 %v9051_v13  ;;  %v9094_v13 = vld [vmem:[%s9750_s3 + $0x3b0] sm:$0xff] }
 0x1e3   : > { %6958 = vmatprep.mubr.msk.f32.mxu0 %vm7518_vm2, %v9824_v34  ;;  %7038 = vmatpush3.msra.mxu1 %v9058_v26  ;;  %v9089_v26 = vld [vmem:[%s9750_s3 + $0x230] sm:$0xff]  ;;  %9855 = vst [vmem:[#allocation42_spill] sm:$0xff] %v9094_v13 }
 0x1e4   : > { %7039 = vmatprep.mubr.msk.f32.mxu1 %vm7518_vm2, %v9824_v34  ;;  %6959 = vmatmul.mubr.msk.f32.vlgmr.msra.gmra.mxu0 %vm3469_vm5, %v9068_v32  ;;  %9854 = vst [vmem:[#allocation41_spill] sm:$0xff] %v9089_v26 }
 0x1e5   : > { %6988 = vmatprep.subr.mxu0 %v9824_v34  ;;  %7040 = vmatmul.mubr.msk.f32.vlgmr.msra.gmra.mxu1 %vm3469_vm5, %v8890_v28 }
 0x1e6   : > { %7069 = vmatprep.subr.mxu1 %v9824_v34  ;;  %6989 = vmatpush3.msra.mxu0 %v9073_v27  ;;  %v9122_v27 = vld [vmem:[%s9750_s3 + $0x3a0] sm:$0xff] }
 0x1e7   : > { %7070 = vmatpush3.msra.mxu1 %v9078_v36  ;;  %6990 = vmatprep.subr.mxu0 %v9824_v34  ;;  %v9117_v36 = vld [vmem:[%s9750_s3 + $0x220] sm:$0xff]  ;;  %9859 = vst [vmem:[#allocation46_spill] sm:$0xff] %v9122_v27 }
 0x1e8   : > { %7071 = vmatprep.subr.mxu1 %v9824_v34  ;;  %6991 = vmatpush3.msra.mxu0 %v9089_v26  ;;  %9858 = vst [vmem:[#allocation45_spill] sm:$0xff] %v9117_v36  ;;  %v9136_v26 = vld [vmem:[%s9750_s3 + $0x398] sm:$0xff] }
 0x1e9   : > { %7072 = vmatpush3.msra.mxu1 %v9094_v13  ;;  %6992 = vmatprep.subr.mxu0 %v9824_v34  ;;  %v9131_v13 = vld [vmem:[%s9750_s3 + $0x218] sm:$0xff]  ;;  %9861 = vst [vmem:[#allocation48_spill] sm:$0xff] %v9136_v26 }
 0x1ea   : > { %7073 = vmatprep.subr.mxu1 %v9824_v34  ;;  %6993 = vmatpush3.msra.mxu0 %v9103_v2  ;;  %9860 = vst [vmem:[#allocation47_spill] sm:$0xff] %v9131_v13  ;;  %v9150_v2 = vld [vmem:[%s9750_s3 + $0x390] sm:$0xff] }
 0x1eb   : > { %7074 = vmatpush3.msra.mxu1 %v9108_v62  ;;  %6994 = vmatprep.subr.mxu0 %v9824_v34  ;;  %v9145_v62 = vld [vmem:[%s9750_s3 + $0x210] sm:$0xff]  ;;  %9863 = vst [vmem:[#allocation50_spill] sm:$0xff] %v9150_v2 }
 0x1ec   : > { %7075 = vmatprep.subr.mxu1 %v9824_v34  ;;  %6995 = vmatpush3.msra.mxu0 %v9117_v36  ;;  %9862 = vst [vmem:[#allocation49_spill] sm:$0xff] %v9145_v62  ;;  %v9164_v36 = vld [vmem:[%s9750_s3 + $0x388] sm:$0xff] }
 0x1ed   : > { %7076 = vmatpush3.msra.mxu1 %v9122_v27  ;;  %6996 = vmatprep.subr.mxu0 %v9824_v34  ;;  %v9159_v27 = vld [vmem:[%s9750_s3 + $0x208] sm:$0xff]  ;;  %9865 = vst [vmem:[#allocation52_spill] sm:$0xff] %v9164_v36 }
 0x1ee   : > { %7077 = vmatprep.subr.mxu1 %v9824_v34  ;;  %6997 = vmatpush3.msra.mxu0 %v9131_v13  ;;  %9864 = vst [vmem:[#allocation51_spill] sm:$0xff] %v9159_v27  ;;  %v9178_v13 = vld [vmem:[%s9750_s3 + $0x380] sm:$0xff] }
 0x1ef   : > { %7078 = vmatpush3.msra.mxu1 %v9136_v26  ;;  %6998 = vmatprep.subr.mxu0 %v9824_v34  ;;  %v9173_v26 = vld [vmem:[%s9750_s3 + $0x200] sm:$0xff]  ;;  %9867 = vst [vmem:[#allocation54_spill] sm:$0xff] %v9178_v13 }
 0x1f0   : > { %7079 = vmatprep.subr.mxu1 %v9824_v34  ;;  %6999 = vmatpush3.msra.mxu0 %v9145_v62  ;;  %9866 = vst [vmem:[#allocation53_spill] sm:$0xff] %v9173_v26  ;;  %v9192_v62 = vld [vmem:[%s9750_s3 + $0x378] sm:$0xff] }
 0x1f1   : > { %7080 = vmatpush3.msra.mxu1 %v9150_v2  ;;  %7000 = vmatprep.subr.mxu0 %v9824_v34  ;;  %v9187_v2 = vld [vmem:[%s9750_s3 + $0x1f8] sm:$0xff]  ;;  %9869 = vst [vmem:[#allocation56_spill] sm:$0xff] %v9192_v62 }
 0x1f2   : > { %7081 = vmatprep.subr.mxu1 %v9824_v34  ;;  %7001 = vmatpush3.msra.mxu0 %v9159_v27  ;;  %9868 = vst [vmem:[#allocation55_spill] sm:$0xff] %v9187_v2  ;;  %v9206_v27 = vld [vmem:[%s9750_s3 + $0x370] sm:$0xff] }
 0x1f3   : > { %7082 = vmatpush3.msra.mxu1 %v9164_v36  ;;  %7002 = vmatprep.subr.mxu0 %v9824_v34  ;;  %v9201_v36 = vld [vmem:[%s9750_s3 + $0x1f0] sm:$0xff] }
 0x1f4   : > { %7083 = vmatprep.subr.mxu1 %v9824_v34  ;;  %7003 = vmatpush3.msra.mxu0 %v9173_v26  ;;  %v9220_v26 = vld [vmem:[%s9750_s3 + $0x368] sm:$0xff] }
 0x1f5   : > { %7084 = vmatpush3.msra.mxu1 %v9178_v13  ;;  %7004 = vmatprep.subr.mxu0 %v9824_v34  ;;  %v9215_v13 = vld [vmem:[%s9750_s3 + $0x1e8] sm:$0xff]  ;;  %9870 = vst [vmem:[#allocation57_spill] sm:$0xff] %v9220_v26 }
 0x1f6   : > { %7085 = vmatprep.subr.mxu1 %v9824_v34  ;;  %7005 = vmatpush3.msra.mxu0 %v9187_v2  ;;  %v9236_v2 = vld [vmem:[%s9750_s3 + $0x360] sm:$0xff] }
 0x1f7   : > { %7086 = vmatpush3.msra.mxu1 %v9192_v62  ;;  %7006 = vmatprep.subr.mxu0 %v9824_v34  ;;  %v9229_v62 = vld [vmem:[%s9750_s3 + $0x1e0] sm:$0xff]  ;;  %9871 = vst [vmem:[#allocation58_spill] sm:$0xff] %v9236_v2 }
 0x1f8   : > { %7087 = vmatprep.subr.mxu1 %v9824_v34  ;;  %7007 = vmatpush3.msra.mxu0 %v9201_v36 }
 0x1f9   : > { %7088 = vmatpush3.msra.mxu1 %v9206_v27  ;;  %7008 = vmatprep.subr.mxu0 %v9824_v34 }
 0x1fa   : > { %7089 = vmatprep.subr.mxu1 %v9824_v34  ;;  %7009 = vmatpush3.msra.mxu0 %v9215_v13 }
 0x1fb   : > { %7090 = vmatpush3.msra.mxu1 %v9220_v26  ;;  %7010 = vmatprep.subr.mxu0 %v9824_v34  ;;  %v9249_v26 = vld [vmem:[%s9750_s3 + $0x358] sm:$0xff] }
 0x1fc   : > { %7091 = vmatprep.subr.mxu1 %v9824_v34  ;;  %7011 = vmatpush3.msra.mxu0 %v9229_v62 }
 0x1fd   : > { %7012 = vmatprep.mubr.msk.f32.mxu0 %vm7518_vm2, %v9824_v34  ;;  %7092 = vmatpush3.msra.mxu1 %v9236_v2  ;;  %v9260_v2 = vld [vmem:[%s9750_s3 + $0x350] sm:$0xff] }
 0x1fe   : > { %7093 = vmatprep.mubr.msk.f32.mxu1 %vm7518_vm2, %v9824_v34  ;;  %7013 = vmatmul.mubr.msk.f32.vlgmr.msra.gmra.mxu0 %vm3469_vm5, %v8622_v44  ;;  %v9269_v44 = vld [vmem:[%s9750_s3 + $0x348] sm:$0xff] }
 0x1ff   : > { %7042 = vmatprep.subr.mxu0 %v9824_v34  ;;  %7094 = vmatmul.mubr.msk.f32.vlgmr.msra.gmra.mxu1 %vm3469_vm5, %v9068_v32 }
 0x200   : > { %7123 = vmatprep.subr.mxu1 %v9824_v34  ;;  %7043 = vmatpush3.msra.mxu0 %v9249_v26 }
 0x201   : > { %7124 = vmatpush3.msra.mxu1 %v8433_v63  ;;  %7044 = vmatprep.subr.mxu0 %v9824_v34  ;;  %v9278_v63 = vld [vmem:[%s9750_s3 + $0x340] sm:$0xff] }
 0x202   : > { %7125 = vmatprep.subr.mxu1 %v9824_v34  ;;  %7045 = vmatpush3.msra.mxu0 %v9260_v2 }
 0x203   : > { %7126 = vmatpush3.msra.mxu1 %v8442_v1  ;;  %7046 = vmatprep.subr.mxu0 %v9824_v34  ;;  %v9287_v1 = vld [vmem:[%s9750_s3 + $0x338] sm:$0xff] }
 0x204   : > { %7127 = vmatprep.subr.mxu1 %v9824_v34  ;;  %7047 = vmatpush3.msra.mxu0 %v9269_v44  ;;  %9872 = vst [vmem:[#allocation59_spill] sm:$0xff] %v9287_v1 }
 0x205   : > { %7128 = vmatpush3.msra.mxu1 %v8452_v5  ;;  %7048 = vmatprep.subr.mxu0 %v9824_v34  ;;  %v9296_v5 = vld [vmem:[%s9750_s3 + $0x330] sm:$0xff] }
 0x206   : > { %7129 = vmatprep.subr.mxu1 %v9824_v34  ;;  %7049 = vmatpush3.msra.mxu0 %v9278_v63  ;;  %9873 = vst [vmem:[#allocation60_spill] sm:$0xff] %v9296_v5 }
 0x207   : > { %7130 = vmatpush3.msra.mxu1 %v8461_v8  ;;  %7050 = vmatprep.subr.mxu0 %v9824_v34  ;;  %v9305_v8 = vld [vmem:[%s9750_s3 + $0x328] sm:$0xff] }
 0x208   : > { %7131 = vmatprep.subr.mxu1 %v9824_v34  ;;  %7051 = vmatpush3.msra.mxu0 %v9287_v1 }
 0x209   : > { %7132 = vmatpush3.msra.mxu1 %v8468_v9  ;;  %7052 = vmatprep.subr.mxu0 %v9824_v34  ;;  %v9314_v9 = vld [vmem:[%s9750_s3 + $0x320] sm:$0xff] }
 0x20a   : > { %7133 = vmatprep.subr.mxu1 %v9824_v34  ;;  %7053 = vmatpush3.msra.mxu0 %v9296_v5 }
 0x20b   : > { %7134 = vmatpush3.msra.mxu1 %v8475_v10  ;;  %7054 = vmatprep.subr.mxu0 %v9824_v34  ;;  %v9325_v10 = vld [vmem:[%s9750_s3 + $0x318] sm:$0xff] }
 0x20c   : > { %7135 = vmatprep.subr.mxu1 %v9824_v34  ;;  %7055 = vmatpush3.msra.mxu0 %v9305_v8  ;;  %v9318_v1 = vpop.f32.mrf.mxu1 }
 0x20d   : > { %7136 = vmatpush3.msra.mxu1 %v8482_v12  ;;  %7056 = vmatprep.subr.mxu0 %v9824_v34  ;;  %v9334_v12 = vld [vmem:[%s9750_s3 + $0x310] sm:$0xff] }
 0x20e   : > { %7137 = vmatprep.subr.mxu1 %v9824_v34  ;;  %7057 = vmatpush3.msra.mxu0 %v9314_v9  ;;  %v6879_v5 = vpop.f32.mrf.mxu1 }
 0x20f   : > { %7138 = vmatpush3.msra.mxu1 %v8489_v16  ;;  %7058 = vmatprep.subr.mxu0 %v9824_v34  ;;  %v9343_v16 = vld [vmem:[%s9750_s3 + $0x308] sm:$0xff] }
 0x210   : > { %7139 = vmatprep.subr.mxu1 %v9824_v34  ;;  %7059 = vmatpush3.msra.mxu0 %v9325_v10  ;;  %v9916_v5 = vld [vmem:[#allocation49_spill] sm:$0xff] }
 0x211   : > { %7140 = vmatpush3.msra.mxu1 %v8496_v19  ;;  %7060 = vmatprep.subr.mxu0 %v9824_v34  ;;  %v9352_v19 = vld [vmem:[%s9750_s3 + $0x300] sm:$0xff] }
 0x212   : > { %7141 = vmatprep.subr.mxu1 %v9824_v34  ;;  %7061 = vmatpush3.msra.mxu0 %v9334_v12 }
 0x213   : > { %7142 = vmatpush3.msra.mxu1 %v8503_v20  ;;  %7062 = vmatprep.subr.mxu0 %v9824_v34  ;;  %v9874_v20 = vld [vmem:[#allocation9_spill] sm:$0xff] }
 0x214   : > { %7143 = vmatprep.subr.mxu1 %v9824_v34  ;;  %7063 = vmatpush3.msra.mxu0 %v9343_v16 }
 0x215   : > { %7144 = vmatpush3.msra.mxu1 %v8510_v21  ;;  %7064 = vmatprep.subr.mxu0 %v9824_v34  ;;  %v9875_v21 = vld [vmem:[#allocation7_spill] sm:$0xff] }
 0x216   : > { %7145 = vmatprep.subr.mxu1 %v9824_v34  ;;  %7065 = vmatpush3.msra.mxu0 %v9352_v19 }
 0x217   : > { %7066 = vmatprep.mubr.msk.f32.mxu0 %vm7518_vm2, %v9824_v34  ;;  %7146 = vmatpush3.msra.mxu1 %v8517_v23  ;;  %v9876_v23 = vld [vmem:[#allocation10_spill] sm:$0xff] }
 0x218   : > { %7147 = vmatprep.mubr.msk.f32.mxu1 %vm7518_vm2, %v9824_v34  ;;  %7067 = vmatmul.mubr.msk.f32.vlgmr.msra.gmra.mxu0 %vm3469_vm5, %v8724_v22 }
 0x219   : > { %7096 = vmatprep.subr.mxu0 %v9824_v34  ;;  %7148 = vmatmul.mubr.msk.f32.vlgmr.msra.gmra.mxu1 %vm3469_vm5, %v8722_v11 }
 0x21a   : > { %7177 = vmatprep.subr.mxu1 %v9824_v34  ;;  %7097 = vmatpush3.msra.mxu0 %v8528_v40  ;;  %v9877_v40 = vld [vmem:[#allocation8_spill] sm:$0xff] }
 0x21b   : > { %7178 = vmatpush3.msra.mxu1 %v8620_v43  ;;  %7098 = vmatprep.subr.mxu0 %v9824_v34  ;;  %v9887_v43 = vld [vmem:[#allocation20_spill] sm:$0xff] }
 0x21c   : > { %7179 = vmatprep.subr.mxu1 %v9824_v34  ;;  %7099 = vmatpush3.msra.mxu0 %v8533_v41  ;;  %v9878_v41 = vld [vmem:[#allocation11_spill] sm:$0xff] }
 0x21d   : > { %7180 = vmatpush3.msra.mxu1 %v8629_v50  ;;  %7100 = vmatprep.subr.mxu0 %v9824_v34  ;;  %v9888_v50 = vld [vmem:[#allocation21_spill] sm:$0xff] }
 0x21e   : > { %7181 = vmatprep.subr.mxu1 %v9824_v34  ;;  %7101 = vmatpush3.msra.mxu0 %v8542_v45  ;;  %v9879_v45 = vld [vmem:[#allocation12_spill] sm:$0xff] }
 0x21f   : > { %7182 = vmatpush3.msra.mxu1 %v8638_v59  ;;  %7102 = vmatprep.subr.mxu0 %v9824_v34  ;;  %v9889_v59 = vld [vmem:[#allocation22_spill] sm:$0xff] }
 0x220   : > { %7183 = vmatprep.subr.mxu1 %v9824_v34  ;;  %7103 = vmatpush3.msra.mxu0 %v8549_v47  ;;  %v9880_v47 = vld [vmem:[#allocation13_spill] sm:$0xff] }
 0x221   : > { %7184 = vmatpush3.msra.mxu1 %v8645_v0  ;;  %7104 = vmatprep.subr.mxu0 %v9824_v34  ;;  %v9890_v0 = vld [vmem:[#allocation23_spill] sm:$0xff] }
 0x222   : > { %7185 = vmatprep.subr.mxu1 %v9824_v34  ;;  %7105 = vmatpush3.msra.mxu0 %v8556_v48  ;;  %v9881_v48 = vld [vmem:[#allocation14_spill] sm:$0xff] }
 0x223   : > { %7186 = vmatpush3.msra.mxu1 %v8652_v3  ;;  %7106 = vmatprep.subr.mxu0 %v9824_v34  ;;  %v9891_v3 = vld [vmem:[#allocation24_spill] sm:$0xff] }
 0x224   : > { %7187 = vmatprep.subr.mxu1 %v9824_v34  ;;  %7107 = vmatpush3.msra.mxu0 %v8563_v49  ;;  %v9882_v49 = vld [vmem:[#allocation15_spill] sm:$0xff] }
 0x225   : > { %7188 = vmatpush3.msra.mxu1 %v8659_v4  ;;  %7108 = vmatprep.subr.mxu0 %v9824_v34  ;;  %v9892_v4 = vld [vmem:[#allocation25_spill] sm:$0xff] }
 0x226   : > { %7189 = vmatprep.subr.mxu1 %v9824_v34  ;;  %7109 = vmatpush3.msra.mxu0 %v8570_v51  ;;  %v9883_v51 = vld [vmem:[#allocation16_spill] sm:$0xff] }
 0x227   : > { %7190 = vmatpush3.msra.mxu1 %v8666_v7  ;;  %7110 = vmatprep.subr.mxu0 %v9824_v34  ;;  %v9893_v7 = vld [vmem:[#allocation26_spill] sm:$0xff] }
 0x228   : > { %7191 = vmatprep.subr.mxu1 %v9824_v34  ;;  %7111 = vmatpush3.msra.mxu0 %v8577_v54  ;;  %v9884_v54 = vld [vmem:[#allocation17_spill] sm:$0xff] }
 0x229   : > { %7192 = vmatpush3.msra.mxu1 %v8675_v15  ;;  %7112 = vmatprep.subr.mxu0 %v9824_v34  ;;  %v9894_v15 = vld [vmem:[#allocation27_spill] sm:$0xff] }
 0x22a   : > { %7193 = vmatprep.subr.mxu1 %v9824_v34  ;;  %7113 = vmatpush3.msra.mxu0 %v8584_v56  ;;  %v9885_v56 = vld [vmem:[#allocation18_spill] sm:$0xff] }
 0x22b   : > { %7194 = vmatpush3.msra.mxu1 %v8682_v18  ;;  %7114 = vmatprep.subr.mxu0 %v9824_v34  ;;  %v9895_v18 = vld [vmem:[#allocation28_spill] sm:$0xff] }
 0x22c   : > { %7195 = vmatprep.subr.mxu1 %v9824_v34  ;;  %7115 = vmatpush3.msra.mxu0 %v8590_v57  ;;  %v9886_v57 = vld [vmem:[#allocation19_spill] sm:$0xff] }
 0x22d   : > { %7196 = vmatpush3.msra.mxu1 %v9874_v20  ;;  %7116 = vmatprep.subr.mxu0 %v9824_v34  ;;  %v9917_v20 = vld [vmem:[#allocation50_spill] sm:$0xff] }
 0x22e   : > { %7197 = vmatprep.subr.mxu1 %v9824_v34  ;;  %7117 = vmatpush3.msra.mxu0 %v9875_v21 }
 0x22f   : > { %7198 = vmatpush3.msra.mxu1 %v9876_v23  ;;  %7118 = vmatprep.subr.mxu0 %v9824_v34 }
 0x230   : > { %7199 = vmatprep.subr.mxu1 %v9824_v34  ;;  %7119 = vmatpush3.msra.mxu0 %v9877_v40  ;;  %v9918_v40 = vld [vmem:[#allocation51_spill] sm:$0xff] }
 0x231   : > { %7120 = vmatprep.mubr.msk.f32.mxu0 %vm7518_vm2, %v9824_v34  ;;  %7200 = vmatpush3.msra.mxu1 %v9878_v41  ;;  %v9919_v41 = vld [vmem:[#allocation52_spill] sm:$0xff] }
 0x232   : > { %7201 = vmatprep.mubr.msk.f32.mxu1 %vm7518_vm2, %v9824_v34  ;;  %7121 = vmatmul.mubr.msk.f32.vlgmr.msra.gmra.mxu0 %vm3469_vm5, %v8890_v28 }
 0x233   : > { %7150 = vmatprep.subr.mxu0 %v9824_v34  ;;  %7202 = vmatmul.mubr.msk.f32.vlgmr.msra.gmra.mxu1 %vm3469_vm5, %v9068_v32 }
 0x234   : > { %7231 = vmatprep.subr.mxu1 %v9824_v34  ;;  %7151 = vmatpush3.msra.mxu0 %v8715_v60  ;;  %v9896_v60 = vld [vmem:[#allocation29_spill] sm:$0xff] }
 0x235   : > { %7232 = vmatpush3.msra.mxu1 %v8720_v58  ;;  %7152 = vmatprep.subr.mxu0 %v9824_v34  ;;  %v9897_v58 = vld [vmem:[#allocation30_spill] sm:$0xff] }
 0x236   : > { %7233 = vmatprep.subr.mxu1 %v9824_v34  ;;  %7153 = vmatpush3.msra.mxu0 %v8733_v31  ;;  %v9898_v31 = vld [vmem:[#allocation31_spill] sm:$0xff] }
 0x237   : > { %7234 = vmatpush3.msra.mxu1 %v8738_v25  ;;  %7154 = vmatprep.subr.mxu0 %v9824_v34  ;;  %v9899_v25 = vld [vmem:[#allocation32_spill] sm:$0xff] }
 0x238   : > { %7235 = vmatprep.subr.mxu1 %v9824_v34  ;;  %7155 = vmatpush3.msra.mxu0 %v8747_v37  ;;  %v9900_v37 = vld [vmem:[#allocation33_spill] sm:$0xff] }
 0x239   : > { %7236 = vmatpush3.msra.mxu1 %v8752_v39  ;;  %7156 = vmatprep.subr.mxu0 %v9824_v34  ;;  %v9901_v39 = vld [vmem:[#allocation34_spill] sm:$0xff] }
 0x23a   : > { %7237 = vmatprep.subr.mxu1 %v9824_v34  ;;  %7157 = vmatpush3.msra.mxu0 %v8761_v42  ;;  %v9902_v42 = vld [vmem:[#allocation35_spill] sm:$0xff] }
 0x23b   : > { %7238 = vmatpush3.msra.mxu1 %v8766_v53  ;;  %7158 = vmatprep.subr.mxu0 %v9824_v34  ;;  %v9903_v53 = vld [vmem:[#allocation36_spill] sm:$0xff] }
 0x23c   : > { %7239 = vmatprep.subr.mxu1 %v9824_v34  ;;  %7159 = vmatpush3.msra.mxu0 %v8775_v55  ;;  %v9904_v55 = vld [vmem:[#allocation37_spill] sm:$0xff] }
 0x23d   : > { %7240 = vmatpush3.msra.mxu1 %v8780_v6  ;;  %7160 = vmatprep.subr.mxu0 %v9824_v34  ;;  %v9905_v6 = vld [vmem:[#allocation38_spill] sm:$0xff] }
 0x23e   : > { %7241 = vmatprep.subr.mxu1 %v9824_v34  ;;  %7161 = vmatpush3.msra.mxu0 %v8789_v14  ;;  %v4581_v14 = vld [vmem:[#allocation2 + $0xa] sm:$0xf] }
 0x23f   : > { %7242 = vmatpush3.msra.mxu1 %v8794_v17  ;;  %7162 = vmatprep.subr.mxu0 %v9824_v34  ;;  %v9906_v17 = vld [vmem:[#allocation39_spill] sm:$0xff] }
 0x240   : > { %7243 = vmatprep.subr.mxu1 %v9824_v34  ;;  %7163 = vmatpush3.msra.mxu0 %v8803_v29  ;;  %v9907_v29 = vld [vmem:[#allocation40_spill] sm:$0xff] }
 0x241   : > { %7244 = vmatpush3.msra.mxu1 %v8808_v30  ;;  %7164 = vmatprep.subr.mxu0 %v9824_v34  ;;  %v9908_v30 = vld [vmem:[#allocation41_spill] sm:$0xff] }
 0x242   : > { %7245 = vmatprep.subr.mxu1 %v9824_v34  ;;  %7165 = vmatpush3.msra.mxu0 %v8817_v33  ;;  %v9909_v33 = vld [vmem:[#allocation42_spill] sm:$0xff] }
 0x243   : > { %7246 = vmatpush3.msra.mxu1 %v8822_v35  ;;  %7166 = vmatprep.subr.mxu0 %v9824_v34  ;;  %v9910_v35 = vld [vmem:[#allocation43_spill] sm:$0xff] }
 0x244   : > { %7247 = vmatprep.subr.mxu1 %v9824_v34  ;;  %7167 = vmatpush3.msra.mxu0 %v8831_v24  ;;  %v9912_v24 = vld [vmem:[#allocation45_spill] sm:$0xff] }
 0x245   : > { %7248 = vmatpush3.msra.mxu1 %v8836_v38  ;;  %7168 = vmatprep.subr.mxu0 %v9824_v34  ;;  %v9913_v38 = vld [vmem:[#allocation46_spill] sm:$0xff] }
 0x246   : > { %7249 = vmatprep.subr.mxu1 %v9824_v34  ;;  %7169 = vmatpush3.msra.mxu0 %v8845_v46  ;;  %v9914_v46 = vld [vmem:[#allocation47_spill] sm:$0xff] }
 0x247   : > { %7250 = vmatpush3.msra.mxu1 %v8850_v52  ;;  %7170 = vmatprep.subr.mxu0 %v9824_v34  ;;  %v9915_v52 = vld [vmem:[#allocation48_spill] sm:$0xff] }
 0x248   : > { %7251 = vmatprep.subr.mxu1 %v9824_v34  ;;  %7171 = vmatpush3.msra.mxu0 %v8859_v61 }
 0x249   : > { %7252 = vmatpush3.msra.mxu1 %v9879_v45  ;;  %7172 = vmatprep.subr.mxu0 %v9824_v34  ;;  %v9920_v45 = vld [vmem:[#allocation53_spill] sm:$0xff] }
 0x24a   : > { %7253 = vmatprep.subr.mxu1 %v9824_v34  ;;  %7173 = vmatpush3.msra.mxu0 %v9880_v47  ;;  %v9921_v47 = vld [vmem:[#allocation54_spill] sm:$0xff] }
 0x24b   : > { %7174 = vmatprep.mubr.msk.f32.mxu0 %vm7518_vm2, %v9824_v34  ;;  %7254 = vmatpush3.msra.mxu1 %v9881_v48  ;;  %v9922_v48 = vld [vmem:[#allocation55_spill] sm:$0xff] }
 0x24c   : > { %7255 = vmatprep.mubr.msk.f32.mxu1 %vm7518_vm2, %v9824_v34  ;;  %7175 = vmatmul.mubr.msk.f32.vlgmr.msra.gmra.mxu0 %vm3469_vm5, %v8724_v22 }
 0x24d   : > { %7204 = vmatprep.subr.mxu0 %v9824_v34  ;;  %7256 = vmatmul.mubr.msk.f32.vlgmr.msra.gmra.mxu1 %vm3469_vm5, %v8890_v28 }
 0x24e   : > { %7285 = vmatprep.subr.mxu1 %v9824_v34  ;;  %7205 = vmatpush3.msra.mxu0 %v9882_v49  ;;  %v9923_v49 = vld [vmem:[#allocation56_spill] sm:$0xff] }
 0x24f   : > { %7286 = vmatpush3.msra.mxu1 %v9883_v51  ;;  %7206 = vmatprep.subr.mxu0 %v9824_v34  ;;  %v9924_v51 = vld [vmem:[#allocation57_spill] sm:$0xff] }
 0x250   : > { %7287 = vmatprep.subr.mxu1 %v9824_v34  ;;  %7207 = vmatpush3.msra.mxu0 %v9884_v54 }
 0x251   : > { %7288 = vmatpush3.msra.mxu1 %v9885_v56  ;;  %7208 = vmatprep.subr.mxu0 %v9824_v34 }
 0x252   : > { %7289 = vmatprep.subr.mxu1 %v9824_v34  ;;  %7209 = vmatpush3.msra.mxu0 %v9886_v57 }
 0x253   : > { %7290 = vmatpush3.msra.mxu1 %v9887_v43  ;;  %7210 = vmatprep.subr.mxu0 %v9824_v34 }
 0x254   : > { %7291 = vmatprep.subr.mxu1 %v9824_v34  ;;  %7211 = vmatpush3.msra.mxu0 %v9888_v50 }
 0x255   : > { %7292 = vmatpush3.msra.mxu1 %v9889_v59  ;;  %7212 = vmatprep.subr.mxu0 %v9824_v34 }
 0x256   : > { %7293 = vmatprep.subr.mxu1 %v9824_v34  ;;  %7213 = vmatpush3.msra.mxu0 %v9890_v0 }
 0x257   : > { %7294 = vmatpush3.msra.mxu1 %v9891_v3  ;;  %7214 = vmatprep.subr.mxu0 %v9824_v34 }
 0x258   : > { %7295 = vmatprep.subr.mxu1 %v9824_v34  ;;  %7215 = vmatpush3.msra.mxu0 %v9892_v4 }
 0x259   : > { %7296 = vmatpush3.msra.mxu1 %v9893_v7  ;;  %7216 = vmatprep.subr.mxu0 %v9824_v34 }
 0x25a   : > { %7297 = vmatprep.subr.mxu1 %v9824_v34  ;;  %7217 = vmatpush3.msra.mxu0 %v9894_v15 }
 0x25b   : > { %7298 = vmatpush3.msra.mxu1 %v9895_v18  ;;  %7218 = vmatprep.subr.mxu0 %v9824_v34  ;;  %v5885_v18 = vld [vmem:[%s9752_s5 + $0x28] sm:$0xff] }
 0x25c   : > { %7299 = vmatprep.subr.mxu1 %v9824_v34  ;;  %7219 = vmatpush3.msra.mxu0 %v9896_v60  ;;  %v5027_v60 = vld [vmem:[%s9752_s5 + $0x10] sm:$0xff] }
 0x25d   : > { %7300 = vmatpush3.msra.mxu1 %v9897_v58  ;;  %7220 = vmatprep.subr.mxu0 %v9824_v34  ;;  %v5884_v58 = vld [vmem:[%s9752_s5 + $0x20] sm:$0xff] }
 0x25e   : > { %7301 = vmatprep.subr.mxu1 %v9824_v34  ;;  %7221 = vmatpush3.msra.mxu0 %v9898_v31  ;;  %v5026_v31 = vld [vmem:[%s9752_s5 + $0x8] sm:$0xff] }
 0x25f   : > { %7302 = vmatpush3.msra.mxu1 %v9899_v25  ;;  %7222 = vmatprep.subr.mxu0 %v9824_v34  ;;  %v5883_v25 = vld [vmem:[%s9752_s5 + $0x18] sm:$0xff] }
 0x260   : > { %7303 = vmatprep.subr.mxu1 %v9824_v34  ;;  %7223 = vmatpush3.msra.mxu0 %v9900_v37  ;;  %v5025_v37 = vld [vmem:[%s9752_s5] sm:$0xff] }
 0x261   : > { %7304 = vmatpush3.msra.mxu1 %v9901_v39  ;;  %7224 = vmatprep.subr.mxu0 %v9824_v34 }
 0x262   : > { %7305 = vmatprep.subr.mxu1 %v9824_v34  ;;  %7225 = vmatpush3.msra.mxu0 %v9902_v42 }
 0x263   : > { %7306 = vmatpush3.msra.mxu1 %v9903_v53  ;;  %7226 = vmatprep.subr.mxu0 %v9824_v34 }
 0x264   : > { %7307 = vmatprep.subr.mxu1 %v9824_v34  ;;  %7227 = vmatpush3.msra.mxu0 %v9904_v55 }
 0x265   : > { %7228 = vmatprep.mubr.msk.f32.mxu0 %vm7518_vm2, %v9824_v34  ;;  %7308 = vmatpush3.msra.mxu1 %v9905_v6 }
 0x266   : > { %7309 = vmatprep.mubr.msk.f32.mxu1 %vm7518_vm2, %v9824_v34  ;;  %7229 = vmatmul.mubr.msk.f32.vlgmr.msra.gmra.mxu0 %vm3469_vm5, %v4581_v14 }
 0x267   : > { %7258 = vmatprep.subr.mxu0 %v9824_v34  ;;  %7310 = vmatmul.mubr.msk.f32.vlgmr.msra.gmra.mxu1 %vm3469_vm5, %v8724_v22  ;;  %v9911_v22 = vld [vmem:[#allocation44_spill] sm:$0xff] }
 0x268   : > { %7339 = vmatprep.subr.mxu1 %v9824_v34  ;;  %7259 = vmatpush3.msra.mxu0 %v9906_v17 }
 0x269   : > { %7340 = vmatpush3.msra.mxu1 %v9907_v29  ;;  %7260 = vmatprep.subr.mxu0 %v9824_v34 }
 0x26a   : > { %7341 = vmatprep.subr.mxu1 %v9824_v34  ;;  %7261 = vmatpush3.msra.mxu0 %v9908_v30 }
 0x26b   : > { %7342 = vmatpush3.msra.mxu1 %v9909_v33  ;;  %7262 = vmatprep.subr.mxu0 %v9824_v34 }
 0x26c   : > { %7343 = vmatprep.subr.mxu1 %v9824_v34  ;;  %7263 = vmatpush3.msra.mxu0 %v9910_v35 }
 0x26d   : > { %7344 = vmatpush3.msra.mxu1 %v9911_v22  ;;  %7264 = vmatprep.subr.mxu0 %v9824_v34 }
 0x26e   : > { %7345 = vmatprep.subr.mxu1 %v9824_v34  ;;  %7265 = vmatpush3.msra.mxu0 %v9912_v24 }
 0x26f   : > { %7346 = vmatpush3.msra.mxu1 %v9913_v38  ;;  %7266 = vmatprep.subr.mxu0 %v9824_v34 }
 0x270   : > { %7347 = vmatprep.subr.mxu1 %v9824_v34  ;;  %7267 = vmatpush3.msra.mxu0 %v9914_v46 }
 0x271   : > { %7348 = vmatpush3.msra.mxu1 %v9915_v52  ;;  %7268 = vmatprep.subr.mxu0 %v9824_v34  ;;  %v3539_v61 = vpop.f32.mrf.mxu0 }
 0x272   : > { %7349 = vmatprep.subr.mxu1 %v9824_v34  ;;  %v3787_v28 = vpop.f32.mrf.mxu1  ;;  %7269 = vmatpush3.msra.mxu0 %v9916_v5 }
 0x273   : > { %7350 = vmatpush3.msra.mxu1 %v9917_v20  ;;  %7270 = vmatprep.subr.mxu0 %v9824_v34  ;;  %v6852_v21 = vpop.f32.mrf.mxu0 }
 0x274   : > { %7351 = vmatprep.subr.mxu1 %v9824_v34  ;;  %v6933_v23 = vpop.f32.mrf.mxu1  ;;  %7271 = vmatpush3.msra.mxu0 %v9918_v40 }
 0x275   : > { %7352 = vmatpush3.msra.mxu1 %v9919_v41  ;;  %7272 = vmatprep.subr.mxu0 %v9824_v34 }
 0x276   : > { %7353 = vmatprep.subr.mxu1 %v9824_v34  ;;  %7273 = vmatpush3.msra.mxu0 %v9920_v45 }
 0x277   : > { %7354 = vmatpush3.msra.mxu1 %v9921_v47  ;;  %7274 = vmatprep.subr.mxu0 %v9824_v34 }
 0x278   : > { %7355 = vmatprep.subr.mxu1 %v9824_v34  ;;  %7275 = vmatpush3.msra.mxu0 %v9922_v48 }
 0x279   : > { %7356 = vmatpush3.msra.mxu1 %v9923_v49  ;;  %7276 = vmatprep.subr.mxu0 %v9824_v34  ;;  %v5882_v49 = vld [vmem:[%s9751_s4] ss:$0 sm:$0xff] }
 0x27a   : > { %7357 = vmatprep.subr.mxu1 %v9824_v34  ;;  %7277 = vmatpush3.msra.mxu0 %v9201_v36  ;;  %v9925_v36 = vld [vmem:[#allocation58_spill] sm:$0xff] }
 0x27b   : > { %7358 = vmatpush3.msra.mxu1 %v9206_v27  ;;  %7278 = vmatprep.subr.mxu0 %v9824_v34 }
 0x27c   : > { %7359 = vmatprep.subr.mxu1 %v9824_v34  ;;  %7279 = vmatpush3.msra.mxu0 %v9215_v13 }
 0x27d   : > { %7360 = vmatpush3.msra.mxu1 %v9924_v51  ;;  %7280 = vmatprep.subr.mxu0 %v9824_v34 }
 0x27e   : > { %7361 = vmatprep.subr.mxu1 %v9824_v34  ;;  %7281 = vmatpush3.msra.mxu0 %v9229_v62  ;;  %v9926_v62 = vld [vmem:[#allocation59_spill] sm:$0xff] }
 0x27f   : > { %7282 = vmatprep.mubr.msk.f32.mxu0 %vm7518_vm2, %v9824_v34  ;;  %7362 = vmatpush3.msra.mxu1 %v9925_v36 }
 0x280   : > { %7363 = vmatprep.mubr.msk.f32.mxu1 %vm7518_vm2, %v9824_v34  ;;  %7283 = vmatmul.mubr.msk.f32.vlgmr.msra.gmra.mxu0 %vm3469_vm5, %v8722_v11  ;;  %v3613_v11 = vadd.f32 %v9318_v1, %v3539_v61 }
 0x281   : > { %7312 = vmatprep.subr.mxu0 %v9824_v34  ;;  %7364 = vmatmul.mubr.msk.f32.vlgmr.msra.gmra.mxu1 %vm3469_vm5, %v4581_v14 }
 0x282   : > { %7313 = vmatpush3.msra.mxu0 %v9249_v26  ;;  %7336 = vmatprep.mubr.msk.f32.mxu0 %vm7518_vm2, %v9824_v34  ;;  %v9927_v26 = vld [vmem:[#allocation60_spill] sm:$0xff] }
 0x283   : > { %7314 = vmatprep.subr.mxu0 %v9824_v34  ;;  %7375 = vmatprep.subr.mxu1 %v9824_v34 }
 0x284   : > { %7315 = vmatpush3.msra.mxu0 %v9260_v2  ;;  %7381 = vmatprep.mubr.msk.f32.mxu1 %vm7518_vm2, %v9824_v34 }
 0x285   : > { %7316 = vmatprep.subr.mxu0 %v9824_v34  ;;  %7376 = vmatpush3.msra.mxu1 %v5027_v60 }
 0x286   : > { %7317 = vmatpush3.msra.mxu0 %v9269_v44  ;;  %7377 = vmatprep.subr.mxu1 %v9824_v34 }
 0x287   : > { %7318 = vmatprep.subr.mxu0 %v9824_v34  ;;  %7378 = vmatpush3.msra.mxu1 %v5026_v31  ;;  %v5429_v31 = vld [vmem:[%s9755_s8] sm:$0x1] }
 0x288   : > { %7319 = vmatpush3.msra.mxu0 %v9278_v63  ;;  %7379 = vmatprep.subr.mxu1 %v9824_v34 }
 0x289   : > { %7320 = vmatprep.subr.mxu0 %v9824_v34  ;;  %7380 = vmatpush3.msra.mxu1 %v5025_v37 }
 0x28a   : > { %7321 = vmatpush3.msra.mxu0 %v9926_v62  ;;  %v3699_v13 = vpop.f32.mrf.mxu0  ;;  %7391 = vmatprep.subr.mxu1 %v9824_v34 }
 0x28b   : > { %7322 = vmatprep.subr.mxu0 %v9824_v34  ;;  %v3703_v2 = vadd.f32 %v3699_v13, %v3613_v11  ;;  %v3972_v27 = vpop.f32.mrf.mxu1 }
 0x28c   : > { %7323 = vmatpush3.msra.mxu0 %v9927_v26  ;;  %v6906_v44 = vpop.f32.mrf.mxu0 }
 0x28d   : > { %7324 = vmatprep.subr.mxu0 %v9824_v34  ;;  %v6987_v54 = vpop.f32.mrf.mxu1  ;;  %v3791_v63 = vadd.f32 %v3787_v28, %v3703_v2  ;;  %v5192_v2 = vld [vmem:[%s9754_s7 + $0x8] sm:$0xf]  ;;  %v5191_v44 = vld [vmem:[%s9754_s7] sm:$0xff] }
 0x28e   : > { %7325 = vmatpush3.msra.mxu0 %v9305_v8  ;;  %v5889_v54 = vld [vmem:[%s9754_s7 + $0x10] sm:$0xff] }
 0x28f   : > { %7326 = vmatprep.subr.mxu0 %v9824_v34 }
 0x290   : > { %7327 = vmatpush3.msra.mxu0 %v9314_v9 }
 0x291   : > { %7328 = vmatprep.subr.mxu0 %v9824_v34 }
 0x292   : > { %7329 = vmatpush3.msra.mxu0 %v9325_v10 }
 0x293   : > { %7330 = vmatprep.subr.mxu0 %v9824_v34 }
 0x294   : > { %7331 = vmatpush3.msra.mxu0 %v9334_v12 }
 0x295   : > { %7332 = vmatprep.subr.mxu0 %v9824_v34 }
 0x296   : > { %7333 = vmatpush3.msra.mxu0 %v9343_v16 }
 0x297   : > { %7334 = vmatprep.subr.mxu0 %v9824_v34 }
 0x298   : > { %7335 = vmatpush3.msra.mxu0 %v9352_v19 }
 0x299   : > { %7337 = vmatmul.mubr.msk.f32.vlgmr.msra.gmra.mxu0 %vm3469_vm5, %v9068_v32  ;;  %7366 = vmatprep.subr.mxu0 %v9824_v34 }
 0x29a   : > { %7372 = vmatprep.mubr.msk.f32.mxu0 %vm7518_vm2, %v9824_v34  ;;  %7367 = vmatpush3.msra.mxu0 %v5885_v18 }
 0x29b   : > { %7368 = vmatprep.subr.mxu0 %v9824_v34 }
 0x29c   : > { %7369 = vmatpush3.msra.mxu0 %v5884_v58 }
 0x29d   : > { %7370 = vmatprep.subr.mxu0 %v9824_v34 }
 0x29e   : > { %7371 = vmatpush3.msra.mxu0 %v5883_v25 }
 0x29f   : > { %7384 = vmatprep.subr.mxu0 %v9824_v34 }
 0x2a4   : > { %v3875_v1 = vpop.f32.mrf.mxu0 }
 0x2a5   : > { %v3879_v8 = vadd.f32 %v3875_v1, %v3791_v63  ;;  %v4125_v9 = vpop.f32.mrf.mxu1 }
 0x2a6   : > { %v6960_v10 = vpop.f32.mrf.mxu0 }
 0x2a7   : > { %v7041_v12 = vpop.f32.mrf.mxu1 }
 0x2be   : > { %v4042_v56 = vpop.f32.mrf.mxu0 }
 0x2bf   : > { %v4043_v57 = vadd.f32 %v4042_v56, %v3972_v27  ;;  %v4293_v16 = vpop.f32.mrf.mxu1  ;;  %v5890_v27 = vld [vmem:[%s9754_s7 + $0x18] sm:$0xf] }
 0x2c0   : > { %v7014_v43 = vpop.f32.mrf.mxu0 }
 0x2c1   : > { %v7095_v50 = vpop.f32.mrf.mxu1  ;;  %v4129_v59 = vadd.f32 %v4125_v9, %v4043_v57 }
 0x2c2   : > { %v5896_v50 = vld [vmem:[%s9754_s7 + $0x28] sm:$0xf] }
 0x2d8   : > { %v4209_v19 = vpop.f32.mrf.mxu0 }
 0x2d9   : > { %v4213_v0 = vadd.f32 %v4209_v19, %v4129_v59  ;;  %v4435_v3 = vpop.f32.mrf.mxu1  ;;  %v5895_v59 = vld [vmem:[%s9754_s7 + $0x20] sm:$0xff] }
 0x2da   : > { %v7068_v32 = vpop.f32.mrf.mxu0 }
 0x2db   : > { %v4297_v4 = vadd.f32 %v4293_v16, %v4213_v0  ;;  %v7149_v7 = vpop.f32.mrf.mxu1  ;;  %v5436_v0 = vld [vmem:[%s9756_s9 + $0x10] sm:$0xf]  ;;  %v5434_v32 = vld [vmem:[%s9756_s9] sm:$0xff] }
 0x2dd   : > { %v4298_v15 = vmax.f32 %v3879_v8, %v4297_v4  ;;  %v5888_v8 = vld [vmem:[%s9753_s6] ss:$0 sm:$0xff] }
 0x2f2   : > { %v4365_v39 = vpop.f32.mrf.mxu0 }
 0x2f3   : > { %v4436_v42 = vadd.f32 %v4435_v3, %v4365_v39  ;;  %v4576_v53 = vpop.f32.mrf.mxu1  ;;  %v5435_v3 = vld [vmem:[%s9756_s9 + $0x8] sm:$0xff] }
 0x2f4   : > { %v7122_v55 = vpop.f32.mrf.mxu0 }
 0x2f5   : > { %v7203_v6 = vpop.f32.mrf.mxu1 }
 0x30c   : > { %v4505_v14 = vpop.f32.mrf.mxu0 }
 0x30d   : > { %v4509_v17 = vadd.f32 %v4505_v14, %v4436_v42  ;;  %v4723_v29 = vpop.f32.mrf.mxu1 }
 0x30e   : > { %v7176_v30 = vpop.f32.mrf.mxu0 }
 0x30f   : > { %v7257_v33 = vpop.f32.mrf.mxu1  ;;  %v4580_v35 = vadd.f32 %v4576_v53, %v4509_v17  ;;  %v5437_v53 = vld [vmem:[%s9757_s10] sm:$0x1] }
 0x326   : > { %v4651_v22 = vpop.f32.mrf.mxu0 }
 0x327   : > { %v4655_v24 = vadd.f32 %v4651_v22, %v4580_v35  ;;  %v4863_v38 = vpop.f32.mrf.mxu1 }
 0x328   : > { %v7230_v46 = vpop.f32.mrf.mxu0 }
 0x329   : > { %v4656_v52 = vmax.f32 %v4298_v15, %v4655_v24  ;;  %v7311_v61 = vpop.f32.mrf.mxu1 }
 0x340   : > { %v4793_v28 = vpop.f32.mrf.mxu0 }
 0x341   : > { %v5005_v5 = vpop.f32.mrf.mxu1  ;;  %v4794_v23 = vadd.f32 %v4793_v28, %v4723_v29 }
 0x342   : > { %v7284_v20 = vpop.f32.mrf.mxu0 }
 0x343   : > { %v7365_v21 = vpop.f32.mrf.mxu1  ;;  %v4867_v40 = vadd.f32 %v4863_v38, %v4794_v23 }
 0x359   : > { %v4934_v41 = vpop.f32.mrf.mxu0 }
 0x35a   : > { %v4938_v45 = vadd.f32 %v4934_v41, %v4867_v40 }
 0x35b   : > { %v7338_v47 = vpop.f32.mrf.mxu0 }
 0x35c   : > { %v5009_v48 = vadd.f32 %v5005_v5, %v4938_v45 }
 0x35e   : > { %v5010_v51 = vmax.f32 %v4656_v52, %v5009_v48 }
 0x360   : > { %v5018_v36 = vadd.f32 %v5882_v49, %v5010_v51 }
 0x362   : > { %vm5019_vm7 = vcmp.gt.f32.partialorder %v5018_v36, 0.0  ;;  %v5020_v11 = vmul.f32 0.01, %v5018_v36 }
 0x364   : > { %v5021_v62 = vsel %vm5019_vm7, %v5018_v36, %v5020_v11 }
 0x365   : > { %5023 = vst.msk [vmem:[#allocation3] sm:$0xf] %vm5022_vm8, %v5021_v62 }
 0x36c   : > { %v5028_v13 = vld [vmem:[#allocation3 + $0x1] sm:$0x7] }
 0x36d   : > { %v5024_v26 = vld [vmem:[#allocation3] sm:$0x7]  ;;  %7373 = vmatmul.mubr.msk.f32.vlgmr.msra.gmra.mxu0 %vm5033_vm9, %v5028_v13 }
 0x36e   : > { %7382 = vmatmul.mubr.msk.f32.vlgmr.msra.gmra.mxu1 %vm5033_vm9, %v5024_v26  ;;  %7388 = vmatprep.mubr.msk.f32.mxu0 %vm7518_vm2, %v9824_v34 }
 0x36f   : > { %7395 = vmatprep.mubr.msk.f32.mxu1 %vm7518_vm2, %v9824_v34  ;;  %7392 = vmatpush3.msk.msra.mxu1 %vm400_vm0, %v5192_v2 }
 0x370   : > { %7385 = vmatpush3.msk.msra.mxu0 %vm400_vm0, %v5890_v27  ;;  %7393 = vmatprep.subr.mxu1 %v9824_v34 }
 0x371   : > { %7386 = vmatprep.subr.mxu0 %v9824_v34  ;;  %7394 = vmatpush3.msra.mxu1 %v5191_v44 }
 0x372   : > { %7387 = vmatpush3.msra.mxu0 %v5889_v54  ;;  %7405 = vmatprep.subr.mxu1 %v9824_v34 }
 0x373   : > { %7398 = vmatprep.subr.mxu0 %v9824_v34 }
 0x42d   : > { %v5103_v63 = vpop.f32.mrf.mxu0 }
 0x42e   : > { %v5176_v1 = vpop.f32.mrf.mxu1 }
 0x42f   : > { %v5177_v9 = vadd.f32 %v5176_v1, %v5103_v63  ;;  %v7374_v10 = vpop.f32.mrf.mxu0 }
 0x430   : > { %v7383_v12 = vpop.f32.mrf.mxu1 }
 0x431   : > { %v5187_v56 = vadd.f32 %v5888_v8, %v5177_v9 }
 0x433   : > { %vm5188_vm10 = vcmp.gt.f32.partialorder %v5187_v56, 0.0  ;;  %v5189_v57 = vmul.f32 0.01, %v5187_v56 }
 0x435   : > { %v5190_v16 = vsel %vm5188_vm10, %v5187_v56, %v5189_v57 }
 0x436   : > { %v5197_v43 = vrot.slane %v5190_v16, 1  ;;  %7396 = vmatmul.mubr.msk.f32.vlgmr.msra.gmra.mxu1 %vm5198_vm11, %v5190_v16  ;;  %v5352_v19 = vrot.slane %v5190_v16, 2 }
 0x437   : > { %7411 = vmatprep.mubr.msk.f32.mxu1 %vm7518_vm2, %v9824_v34  ;;  %7406 = vmatpush3.msk.msra.mxu1 %vm400_vm0, %v5436_v0 }
 0x438   : > { %7389 = vmatmul.mubr.msk.f32.vlgmr.msra.gmra.mxu0 %vm5198_vm11, %v5197_v43  ;;  %7407 = vmatprep.subr.mxu1 %v9824_v34 }
 0x439   : > { %7399 = vmatpush3.msk.msra.mxu0 %vm400_vm0, %v5896_v50  ;;  %7402 = vmatprep.mubr.msk.f32.mxu0 %vm7518_vm2, %v9824_v34 }
 0x43a   : > { %7400 = vmatprep.subr.mxu0 %v9824_v34  ;;  %7408 = vmatpush3.msra.mxu1 %v5435_v3 }
 0x43b   : > { %7401 = vmatpush3.msra.mxu0 %v5895_v59  ;;  %7409 = vmatprep.subr.mxu1 %v9824_v34 }
 0x43c   : > { %7403 = vmatmul.mubr.msk.f32.vlgmr.msra.gmra.mxu0 %vm5198_vm11, %v5352_v19  ;;  %7410 = vmatpush3.msra.mxu1 %v5434_v32 }
 0x4f6   : > { %v5345_v4 = vpop.f32.mrf.mxu1 }
 0x4f8   : > { %v5270_v7 = vpop.f32.mrf.mxu0  ;;  %v7397_v15 = vpop.f32.mrf.mxu1 }
 0x4f9   : > { %v5346_v60 = vadd.f32 %v5345_v4, %v5270_v7 }
 0x4fa   : > { %v7390_v18 = vpop.f32.mrf.mxu0 }
 0x4fc   : > { %v5424_v58 = vpop.f32.mrf.mxu0 }
 0x4fd   : > { %v5428_v25 = vadd.f32 %v5424_v58, %v5346_v60 }
 0x4fe   : > { %v7404_v37 = vpop.f32.mrf.mxu0 }
 0x4ff   : > { %v5430_v39 = vadd.f32 %v5429_v31, %v5428_v25 }
 0x501   : > { %vm5431_vm12 = vcmp.gt.f32.partialorder %v5430_v39, 0.0  ;;  %v5432_v42 = vmul.f32 0.01, %v5430_v39 }
 0x503   : > { %v5433_v34 = vsel %vm5431_vm12, %v5430_v39, %v5432_v42 }
 0x504   : > { %7412 = vmatmul.mubr.msk.f32.vlgmr.msra.gmra.mxu1 %vm5438_vm13, %v5433_v34 }
 0x5c4   : > { %v5511_v55 = vpop.f32.mrf.mxu1 }
 0x5c5   : > { %v5512_v6 = vadd.f32 %v5511_v55, %v5437_v53 }
 0x5c6   : > { %v7413_v14 = vpop.f32.mrf.mxu1 }
 0x5c7   : > { %5516 = vst.msk [vmem:[%s378_s15] sm:$0x1] %vm5515_vm14, %v5512_v6 }
 0x5c8   : > { %7468 = shalt.err (!%p7465_p3)
}
 0x5c9   : > { %s7469_s14 = scalar_lea.hbm %s9712_s25, 16  ;;  %s7473_s22 = scalar_lea.hbm %s9758_s11, 32 }
 0x5ca   : > { %p7470_p4 = scmp.ne.s32.totalorder %s9712_s25, %s7469_s14  ;;  %p7474_p9 = scmp.lt.s32.totalorder %s9712_s25, %s9758_s11 }
 0x5cb   : > { %p7475_p10 = scmp.lt.s32.totalorder %s7473_s22, %s7469_s14 }
 0x5cc   : > { %p7471_p7 = pnand %p7470_p4, %p7618_p5 }
 0x5cd   : > { %p7476_p11 = por %p7475_p10, %p7474_p9 }
 0x5ce   : > { %p7472_p8 = pneg %p7471_p7 }
 0x5d0   : > { %p7477_p12 = pnand %p7476_p11, %p7472_p8 }
 0x5d2   : > { %7480 = shalt.err (!%p7477_p12)
}
 0x5d3   : > { %7414 = dma.vmem_to_hbm [thread:$0]  (%p7618_p5), %s5531_s16, 16, %s9712_s25, %s5518_s30  }
 0x5d4 PF: > { %p7420_p13 = scmp.ge.s32.totalorder %s7515_s20, 2  ;;  %s5542_s0 = sand.u32 1, %s7503_s17  }
 0x5d5   : > { %s5543_s13 = scalar_lea.sflag [#allocation5], %s5542_s0 }
 0x5d6   : > { %p7417_p0 = pnand %p7420_p13, %p7622_p6 }
 0x5d8   : > { %p7418_p1 = pneg %p7417_p0 }
 0x5da   : > { %7498 = dma.done.wait (%p7418_p1), %s5543_s13, 16  }
 0x5db   : > { %7500 = vsyncadd (%p7418_p1), %s5543_s13, 4294967280  ;;  %p21_p2 = scmp.ge.s32.totalorder %s7605_s23, 4   ;;  %s9928_s17 = smov %s7507_s18 }
 0x5dc   : > { %s9929_s18 = smov %s7511_s19  ;;  %s9930_s19 = smov %s7616_s26 }
 0x5dd   : > { %s9931_s20 = smov %s7605_s23  ;;  %23 = sbr.rel (!%p21_p2) target bundleno = 5 (0x5), region = 124 }
 0x5e2   :  { %5547 = vsyncpa [#allocation5], 1 }
 0x5e3   :  { %5549 = vsyncpa [#allocation5 + $0x1], 1 }

</bundles_post_ra>
